<compile_context>
chip_gen: v7x
topology: tpu7x:2x2x1
jax: 0.10.0
libtpu: 0.0.40
codegen_flags: <defaults>
</compile_context>

<pallas_src>
import jax
import jax.numpy as jnp
import numpy as np
from jax.experimental import pallas as pl
from jax.experimental.pallas import tpu as pltpu


def _lstm_kernel(x2d_ref,   # (T*Bp, I)  time-major input, flattened, f32
                 wih0_ref,  # (I, 4H)    W_ih0^T (gate cols [i,f,o,g]), f32
                 b0_ref,    # (1, 4H)    b_ih0 + b_hh0, f32
                 wa_ref,    # (H, 8H)    [W_hh0^T | W_ih1^T], bf16
                 wb_ref,    # (H, 4H)    W_hh1^T, bf16
                 b1_ref,    # (1, 4H)    b_ih1 + b_hh1, f32
                 wfc_ref,   # (H, 128)   W_fc^T zero-padded to 128 lanes, f32
                 bfc_ref,   # (1, 128)   f32
                 out_ref,   # (Bp, 128)  f32
                 xg0_scr):  # VMEM scratch (T*Bp, 4H) f32
    TB = x2d_ref.shape[0]
    H = wb_ref.shape[0]
    Bp = out_ref.shape[0]
    T = TB // Bp
    H3, H4 = 3 * H, 4 * H

    # ---- Hoisted, non-recurrent layer-0 input projection: one big MXU matmul. ----
    xg0_scr[...] = (
        jnp.dot(x2d_ref[...], wih0_ref[...], preferred_element_type=jnp.float32)
        + b0_ref[...]
    )

    # Hoist the layer-1 bias broadcast out of the unrolled recurrence
    # (JAX does not CSE broadcast_in_dim; leaving it in the loop re-emits it T times).
    b1b = jnp.broadcast_to(b1_ref[...], (Bp, H4))

    def sigm(x):
        # Exactly sigmoid, but a single EUP push (tanh) instead of exp + divide.
        return 0.5 * jnp.tanh(0.5 * x) + 0.5

    def gates_to_hc(gates, c):
        # Host-permuted gate order [i, f, o, g]:
        # one wide sigmoid over the first 3H lanes, one tanh over the last H.
        s = sigm(gates[:, :H3])
        i = s[:, 0 * H:1 * H]
        f = s[:, 1 * H:2 * H]
        o = s[:, 2 * H:3 * H]
        g = jnp.tanh(gates[:, H3:H4])
        c_new = f * c + i * g
        h_new = o * jnp.tanh(c_new)
        return h_new, c_new

    zeros = jnp.zeros((Bp, H), jnp.float32)

    # ---- Layer-0 step 0 (h0 = c0 = 0 -> gates are just the precomputed xg0 row). ----
    h0, c0 = gates_to_hc(xg0_scr[pl.ds(0, Bp), :], zeros)
    h1, c1 = zeros, zeros

    # ---- Skewed recurrence: iteration t does layer-0 step t and layer-1 step t-1.
    #      All matmuls depend only on the carry -> no intra-iteration serialization. ----
    def step(t, carry):
        h0, c0, h1, c1 = carry
        row = pl.multiple_of(t * Bp, 8)
        h0b = h0.astype(jnp.bfloat16)
        h1b = h1.astype(jnp.bfloat16)
        # Shared-LHS fused weight push: h0 @ [W_hh0 | W_ih1].
        ga = jnp.dot(h0b, wa_ref[...], preferred_element_type=jnp.float32)   # (Bp, 8H)
        gb = jnp.dot(h1b, wb_ref[...], preferred_element_type=jnp.float32)   # (Bp, 4H)
        g0 = xg0_scr[pl.ds(row, Bp), :] + ga[:, :H4]
        g1 = ga[:, H4:] + gb + b1b
        h0n, c0n = gates_to_hc(g0, c0)
        h1n, c1n = gates_to_hc(g1, c1)
        return h0n, c0n, h1n, c1n

    h0, c0, h1, c1 = jax.lax.fori_loop(1, T, step, (h0, c0, h1, c1), unroll=True)

    # ---- Flush: layer-1 step T-1 (consumes the final layer-0 hidden state). ----
    ga = jnp.dot(h0.astype(jnp.bfloat16), wa_ref[...],
                 preferred_element_type=jnp.float32)
    gb = jnp.dot(h1.astype(jnp.bfloat16), wb_ref[...],
                 preferred_element_type=jnp.float32)
    g1 = ga[:, H4:] + gb + b1b
    h1_last, _ = gates_to_hc(g1, c1)

    # ---- Final Linear on the last timestep's layer-1 hidden state (lane-dense). ----
    out_ref[...] = (
        jnp.dot(h1_last, wfc_ref[...], preferred_element_type=jnp.float32)
        + bfc_ref[...]
    )


@jax.jit
def lstm_forward(x, params):
    """x: (B, T, I) float32, batch_first like the PyTorch module. Returns (B, O)."""
    B, T, I = x.shape
    H = params["whh0_t"].shape[0]
    O = params["wfc_t"].shape[1]
    OP = 128  # lane-dense padded output width

    # Pad batch to the f32 sublane multiple so (B, .) tiles are unmasked.
    Bp = max(8, ((B + 7) // 8) * 8)
    if Bp != B:
        x = jnp.pad(x, ((0, Bp - B), (0, 0), (0, 0)))

    # Time-major and flattened: the layer-0 input projection becomes one matmul.
    x2d = jnp.transpose(x, (1, 0, 2)).reshape(T * Bp, I)

    def reorder(w):
        # PyTorch gate order [i, f, g, o] -> kernel order [i, f, o, g] so the
        # three sigmoid gates form one contiguous (., 3H) slice.
        return jnp.concatenate(
            [w[..., :2 * H], w[..., 3 * H:4 * H], w[..., 2 * H:3 * H]], axis=-1)

    wih0 = reorder(params["wih0_t"])
    b0 = reorder(params["b0"])
    whh0 = reorder(params["whh0_t"])
    wih1 = reorder(params["wih1_t"])
    whh1 = reorder(params["whh1_t"])
    b1 = reorder(params["b1"])

    # Per-step weights: fuse the two shared-LHS operands and store bf16
    # (same numerics as the default-precision MXU path, half the vld bytes).
    wa = jnp.concatenate([whh0, wih1], axis=1).astype(jnp.bfloat16)   # (H, 8H)
    wb = whh1.astype(jnp.bfloat16)                                    # (H, 4H)

    # Lane-dense output: zero-pad the FC to 128 output columns (O=1 would force vst.msk).
    wfc = jnp.pad(params["wfc_t"], ((0, 0), (0, OP - O)))
    bfc = jnp.pad(params["bfc"], ((0, 0), (0, OP - O)))

    vmem = pl.BlockSpec(memory_space=pltpu.MemorySpace.VMEM)

    out = pl.pallas_call(
        _lstm_kernel,
        out_shape=jax.ShapeDtypeStruct((Bp, OP), jnp.float32),
        in_specs=[vmem] * 8,
        out_specs=vmem,
        scratch_shapes=[pltpu.VMEM((T * Bp, 4 * H), jnp.float32)],
    )(x2d, wih0, b0, wa, wb, b1, wfc, bfc)

    return out[:B, :O]


def init_params(key, input_size, hidden_size, output_size):
    """Deterministic init mirroring PyTorch's uniform(-1/sqrt(H), 1/sqrt(H))."""
    ks = jax.random.split(key, 12)
    k_lstm = 1.0 / np.sqrt(hidden_size)
    k_fc = 1.0 / np.sqrt(hidden_size)

    def u(k, shape, scale):
        return jax.random.uniform(k, shape, jnp.float32, -scale, scale)

    H, I, O = hidden_size, input_size, output_size
    return {
        # layer 0
        "wih0_t": u(ks[0], (I, 4 * H), k_lstm),
        "whh0_t": u(ks[1], (H, 4 * H), k_lstm),
        "b0": u(ks[2], (1, 4 * H), k_lstm) + u(ks[3], (1, 4 * H), k_lstm),
        # layer 1 (input is h of layer 0 -> width H)
        "wih1_t": u(ks[4], (H, 4 * H), k_lstm),
        "whh1_t": u(ks[5], (H, 4 * H), k_lstm),
        "b1": u(ks[6], (1, 4 * H), k_lstm) + u(ks[7], (1, 4 * H), k_lstm),
        # fc
        "wfc_t": u(ks[8], (H, O), k_fc),
        "bfc": u(ks[9], (1, O), k_fc),
    }


def lstm_reference(x, params):
    """Pure-JAX reference (lax.scan, HIGHEST precision, PyTorch gate order)."""
    B, T, I = x.shape
    H = params["whh0_t"].shape[0]

    def layer(inputs, wih_t, whh_t, b):
        def step(carry, x_t):
            h, c = carry
            gates = x_t @ wih_t + h @ whh_t + b
            i = jax.nn.sigmoid(gates[:, 0 * H:1 * H])
            f = jax.nn.sigmoid(gates[:, 1 * H:2 * H])
            g = jnp.tanh(gates[:, 2 * H:3 * H])
            o = jax.nn.sigmoid(gates[:, 3 * H:4 * H])
            c_new = f * c + i * g
            h_new = o * jnp.tanh(c_new)
            return (h_new, c_new), h_new

        h0 = jnp.zeros((B, H), jnp.float32)
        c0 = jnp.zeros((B, H), jnp.float32)
        _, hs = jax.lax.scan(step, (h0, c0), jnp.transpose(inputs, (1, 0, 2)))
        return jnp.transpose(hs, (1, 0, 2))

    with jax.default_matmul_precision("highest"):
        h1 = layer(x, params["wih0_t"], params["whh0_t"], params["b0"])
        h2 = layer(h1, params["wih1_t"], params["whh1_t"], params["b1"])
        return h2[:, -1, :] @ params["wfc_t"] + params["bfc"]


if __name__ == "__main__":
    batch, seq, input_size = 4, 8, 16
    hidden_size, output_size = 128, 1       # module defaults: hidden=128, out=1

    key = jax.random.PRNGKey(0)
    k_x, k_p = jax.random.split(key)
    x = jax.random.normal(k_x, (batch, seq, input_size), jnp.float32)
    params = init_params(k_p, input_size, hidden_size, output_size)

    out = jax.block_until_ready(lstm_forward(x, params))
    ref = jax.block_until_ready(lstm_reference(x, params))

    assert out.shape == (batch, output_size), out.shape
    # bf16 recurrent weights + f32 accumulate (numerically ~ default MXU precision)
    # vs. a HIGHEST-precision reference -> documented, slightly loose tolerance.
    np.testing.assert_allclose(np.asarray(out), np.asarray(ref),
                               rtol=2e-2, atol=2e-2)
    print("KERNEL_OK")
</pallas_src>

<mosaic_0001>
module attributes {stable_mosaic.version = 11 : i64} {
  func.func @_lstm_kernel(%arg0: memref<64x16xf32, #tpu.memory_space<vmem>>, %arg1: memref<16x512xf32, #tpu.memory_space<vmem>>, %arg2: memref<1x512xf32, #tpu.memory_space<vmem>>, %arg3: memref<128x1024xbf16, #tpu.memory_space<vmem>>, %arg4: memref<128x512xbf16, #tpu.memory_space<vmem>>, %arg5: memref<1x512xf32, #tpu.memory_space<vmem>>, %arg6: memref<128x128xf32, #tpu.memory_space<vmem>>, %arg7: memref<1x128xf32, #tpu.memory_space<vmem>>, %arg8: memref<8x128xf32, #tpu.memory_space<vmem>>, %arg9: memref<64x512xf32, #tpu.memory_space<vmem>>) attributes {dimension_semantics = [], scalar_prefetch = 0 : i64, scratch_operands = 1 : i64, tpu.core_type = #tpu.core_type<tc>} {
    %c0 = arith.constant 0 : index
    %c0_0 = arith.constant 0 : index
    %0 = vector.load %arg0[%c0, %c0_0] : memref<64x16xf32, #tpu.memory_space<vmem>>, vector<64x16xf32>
    %c0_1 = arith.constant 0 : index
    %c0_2 = arith.constant 0 : index
    %1 = vector.load %arg1[%c0_1, %c0_2] : memref<16x512xf32, #tpu.memory_space<vmem>>, vector<16x512xf32>
    %cst = arith.constant dense<0.000000e+00> : vector<64x512xf32>
    %2 = tpu.matmul %0, %1, %cst {dimension_numbers = #tpu.dot_dimension_numbers<[1], [0], [0], [1], [0, 0, 1, 1], [], []>} : vector<64x16xf32>, vector<16x512xf32>, vector<64x512xf32> -> vector<64x512xf32>
    %c0_3 = arith.constant 0 : index
    %c0_4 = arith.constant 0 : index
    %3 = vector.load %arg2[%c0_3, %c0_4] : memref<1x512xf32, #tpu.memory_space<vmem>>, vector<1x512xf32>
    %4 = vector.broadcast %3 : vector<1x512xf32> to vector<64x512xf32>
    %5 = arith.addf %2, %4 : vector<64x512xf32>
    %c0_5 = arith.constant 0 : index
    %c0_6 = arith.constant 0 : index
    %6 = vector.load %arg9[%c0_5, %c0_6] : memref<64x512xf32, #tpu.memory_space<vmem>>, vector<64x512xf32>
    tpu.vector_store %arg9[%c0_5, %c0_6], %5 {strides = array<i32>} : memref<64x512xf32, #tpu.memory_space<vmem>>, vector<64x512xf32>,
    %c0_7 = arith.constant 0 : index
    %c0_8 = arith.constant 0 : index
    %7 = vector.load %arg5[%c0_7, %c0_8] : memref<1x512xf32, #tpu.memory_space<vmem>>, vector<1x512xf32>
    %8 = vector.shape_cast %7 : vector<1x512xf32> to vector<1x512xf32>
    %9 = vector.broadcast %8 : vector<1x512xf32> to vector<8x512xf32>
    %cst_9 = arith.constant 0.000000e+00 : f32
    %10 = vector.broadcast %cst_9 : f32 to vector<8x128xf32>
    %c0_10 = arith.constant 0 : index
    %c0_11 = arith.constant 0 : index
    %11 = vector.load %arg9[%c0_10, %c0_11] : memref<64x512xf32, #tpu.memory_space<vmem>>, vector<8x512xf32>
    %12 = vector.extract_strided_slice %11 {offsets = [0, 0], sizes = [8, 384], strides = [1, 1]} : vector<8x512xf32> to vector<8x384xf32>
    %cst_12 = arith.constant 5.000000e-01 : f32
    %13 = vector.broadcast %cst_12 : f32 to vector<8x384xf32>
    %14 = arith.mulf %13, %12 : vector<8x384xf32>
    %15 = math.tanh %14 : vector<8x384xf32>
    %cst_13 = arith.constant 5.000000e-01 : f32
    %16 = vector.broadcast %cst_13 : f32 to vector<8x384xf32>
    %17 = arith.mulf %16, %15 : vector<8x384xf32>
    %cst_14 = arith.constant 5.000000e-01 : f32
    %18 = vector.broadcast %cst_14 : f32 to vector<8x384xf32>
    %19 = arith.addf %17, %18 : vector<8x384xf32>
    %20 = vector.extract_strided_slice %19 {offsets = [0, 0], sizes = [8, 128], strides = [1, 1]} : vector<8x384xf32> to vector<8x128xf32>
    %21 = vector.extract_strided_slice %19 {offsets = [0, 128], sizes = [8, 128], strides = [1, 1]} : vector<8x384xf32> to vector<8x128xf32>
    %22 = vector.extract_strided_slice %19 {offsets = [0, 256], sizes = [8, 128], strides = [1, 1]} : vector<8x384xf32> to vector<8x128xf32>
    %23 = vector.extract_strided_slice %11 {offsets = [0, 384], sizes = [8, 128], strides = [1, 1]} : vector<8x512xf32> to vector<8x128xf32>
    %24 = math.tanh %23 : vector<8x128xf32>
    %25 = arith.mulf %21, %10 : vector<8x128xf32>
    %26 = arith.mulf %20, %24 : vector<8x128xf32>
    %27 = arith.addf %25, %26 : vector<8x128xf32>
    %28 = math.tanh %27 : vector<8x128xf32>
    %29 = arith.mulf %22, %28 : vector<8x128xf32>
    %c1_i32 = arith.constant 1 : i32
    %c8_i32 = arith.constant 8 : i32
    %30 = arith.muli %c1_i32, %c8_i32 : i32
    %31 = tpu.assume_multiple %30, 8 : i32
    %32 = arith.truncf %29 : vector<8x128xf32> to vector<8x128xbf16>
    %33 = arith.truncf %10 : vector<8x128xf32> to vector<8x128xbf16>
    %c0_15 = arith.constant 0 : index
    %c0_16 = arith.constant 0 : index
    %34 = vector.load %arg3[%c0_15, %c0_16] : memref<128x1024xbf16, #tpu.memory_space<vmem>>, vector<128x1024xbf16>
    %cst_17 = arith.constant dense<0.000000e+00> : vector<8x1024xf32>
    %35 = tpu.matmul %32, %34, %cst_17 {dimension_numbers = #tpu.dot_dimension_numbers<[1], [0], [0], [1], [0, 0, 1, 1], [], []>} : vector<8x128xbf16>, vector<128x1024xbf16>, vector<8x1024xf32> -> vector<8x1024xf32>
    %c0_18 = arith.constant 0 : index
    %c0_19 = arith.constant 0 : index
    %36 = vector.load %arg4[%c0_18, %c0_19] : memref<128x512xbf16, #tpu.memory_space<vmem>>, vector<128x512xbf16>
    %cst_20 = arith.constant dense<0.000000e+00> : vector<8x512xf32>
    %37 = tpu.matmul %33, %36, %cst_20 {dimension_numbers = #tpu.dot_dimension_numbers<[1], [0], [0], [1], [0, 0, 1, 1], [], []>} : vector<8x128xbf16>, vector<128x512xbf16>, vector<8x512xf32> -> vector<8x512xf32>
    %38 = arith.index_cast %31 : i32 to index
    %c0_21 = arith.constant 0 : index
    %39 = vector.load %arg9[%38, %c0_21] : memref<64x512xf32, #tpu.memory_space<vmem>>, vector<8x512xf32>
    %40 = vector.extract_strided_slice %35 {offsets = [0, 0], sizes = [8, 512], strides = [1, 1]} : vector<8x1024xf32> to vector<8x512xf32>
    %41 = arith.addf %39, %40 : vector<8x512xf32>
    %42 = vector.extract_strided_slice %35 {offsets = [0, 512], sizes = [8, 512], strides = [1, 1]} : vector<8x1024xf32> to vector<8x512xf32>
    %43 = arith.addf %42, %37 : vector<8x512xf32>
    %44 = arith.addf %43, %9 : vector<8x512xf32>
    %45 = vector.extract_strided_slice %41 {offsets = [0, 0], sizes = [8, 384], strides = [1, 1]} : vector<8x512xf32> to vector<8x384xf32>
    %cst_22 = arith.constant 5.000000e-01 : f32
    %46 = vector.broadcast %cst_22 : f32 to vector<8x384xf32>
    %47 = arith.mulf %46, %45 : vector<8x384xf32>
    %48 = math.tanh %47 : vector<8x384xf32>
    %cst_23 = arith.constant 5.000000e-01 : f32
    %49 = vector.broadcast %cst_23 : f32 to vector<8x384xf32>
    %50 = arith.mulf %49, %48 : vector<8x384xf32>
    %cst_24 = arith.constant 5.000000e-01 : f32
    %51 = vector.broadcast %cst_24 : f32 to vector<8x384xf32>
    %52 = arith.addf %50, %51 : vector<8x384xf32>
    %53 = vector.extract_strided_slice %52 {offsets = [0, 0], sizes = [8, 128], strides = [1, 1]} : vector<8x384xf32> to vector<8x128xf32>
    %54 = vector.extract_strided_slice %52 {offsets = [0, 128], sizes = [8, 128], strides = [1, 1]} : vector<8x384xf32> to vector<8x128xf32>
    %55 = vector.extract_strided_slice %52 {offsets = [0, 256], sizes = [8, 128], strides = [1, 1]} : vector<8x384xf32> to vector<8x128xf32>
    %56 = vector.extract_strided_slice %41 {offsets = [0, 384], sizes = [8, 128], strides = [1, 1]} : vector<8x512xf32> to vector<8x128xf32>
    %57 = math.tanh %56 : vector<8x128xf32>
    %58 = arith.mulf %54, %27 : vector<8x128xf32>
    %59 = arith.mulf %53, %57 : vector<8x128xf32>
    %60 = arith.addf %58, %59 : vector<8x128xf32>
    %61 = math.tanh %60 : vector<8x128xf32>
    %62 = arith.mulf %55, %61 : vector<8x128xf32>
    %63 = vector.extract_strided_slice %44 {offsets = [0, 0], sizes = [8, 384], strides = [1, 1]} : vector<8x512xf32> to vector<8x384xf32>
    %cst_25 = arith.constant 5.000000e-01 : f32
    %64 = vector.broadcast %cst_25 : f32 to vector<8x384xf32>
    %65 = arith.mulf %64, %63 : vector<8x384xf32>
    %66 = math.tanh %65 : vector<8x384xf32>
    %cst_26 = arith.constant 5.000000e-01 : f32
    %67 = vector.broadcast %cst_26 : f32 to vector<8x384xf32>
    %68 = arith.mulf %67, %66 : vector<8x384xf32>
    %cst_27 = arith.constant 5.000000e-01 : f32
    %69 = vector.broadcast %cst_27 : f32 to vector<8x384xf32>
    %70 = arith.addf %68, %69 : vector<8x384xf32>
    %71 = vector.extract_strided_slice %70 {offsets = [0, 0], sizes = [8, 128], strides = [1, 1]} : vector<8x384xf32> to vector<8x128xf32>
    %72 = vector.extract_strided_slice %70 {offsets = [0, 128], sizes = [8, 128], strides = [1, 1]} : vector<8x384xf32> to vector<8x128xf32>
    %73 = vector.extract_strided_slice %70 {offsets = [0, 256], sizes = [8, 128], strides = [1, 1]} : vector<8x384xf32> to vector<8x128xf32>
    %74 = vector.extract_strided_slice %44 {offsets = [0, 384], sizes = [8, 128], strides = [1, 1]} : vector<8x512xf32> to vector<8x128xf32>
    %75 = math.tanh %74 : vector<8x128xf32>
    %76 = arith.mulf %72, %10 : vector<8x128xf32>
    %77 = arith.mulf %71, %75 : vector<8x128xf32>
    %78 = arith.addf %76, %77 : vector<8x128xf32>
    %79 = math.tanh %78 : vector<8x128xf32>
    %80 = arith.mulf %73, %79 : vector<8x128xf32>
    %c2_i32 = arith.constant 2 : i32
    %c8_i32_28 = arith.constant 8 : i32
    %81 = arith.muli %c2_i32, %c8_i32_28 : i32
    %82 = tpu.assume_multiple %81, 8 : i32
    %83 = arith.truncf %62 : vector<8x128xf32> to vector<8x128xbf16>
    %84 = arith.truncf %80 : vector<8x128xf32> to vector<8x128xbf16>
    %c0_29 = arith.constant 0 : index
    %c0_30 = arith.constant 0 : index
    %85 = vector.load %arg3[%c0_29, %c0_30] : memref<128x1024xbf16, #tpu.memory_space<vmem>>, vector<128x1024xbf16>
    %cst_31 = arith.constant dense<0.000000e+00> : vector<8x1024xf32>
    %86 = tpu.matmul %83, %85, %cst_31 {dimension_numbers = #tpu.dot_dimension_numbers<[1], [0], [0], [1], [0, 0, 1, 1], [], []>} : vector<8x128xbf16>, vector<128x1024xbf16>, vector<8x1024xf32> -> vector<8x1024xf32>
    %c0_32 = arith.constant 0 : index
    %c0_33 = arith.constant 0 : index
    %87 = vector.load %arg4[%c0_32, %c0_33] : memref<128x512xbf16, #tpu.memory_space<vmem>>, vector<128x512xbf16>
    %cst_34 = arith.constant dense<0.000000e+00> : vector<8x512xf32>
    %88 = tpu.matmul %84, %87, %cst_34 {dimension_numbers = #tpu.dot_dimension_numbers<[1], [0], [0], [1], [0, 0, 1, 1], [], []>} : vector<8x128xbf16>, vector<128x512xbf16>, vector<8x512xf32> -> vector<8x512xf32>
    %89 = arith.index_cast %82 : i32 to index
    %c0_35 = arith.constant 0 : index
    %90 = vector.load %arg9[%89, %c0_35] : memref<64x512xf32, #tpu.memory_space<vmem>>, vector<8x512xf32>
    %91 = vector.extract_strided_slice %86 {offsets = [0, 0], sizes = [8, 512], strides = [1, 1]} : vector<8x1024xf32> to vector<8x512xf32>
    %92 = arith.addf %90, %91 : vector<8x512xf32>
    %93 = vector.extract_strided_slice %86 {offsets = [0, 512], sizes = [8, 512], strides = [1, 1]} : vector<8x1024xf32> to vector<8x512xf32>
    %94 = arith.addf %93, %88 : vector<8x512xf32>
    %95 = arith.addf %94, %9 : vector<8x512xf32>
    %96 = vector.extract_strided_slice %92 {offsets = [0, 0], sizes = [8, 384], strides = [1, 1]} : vector<8x512xf32> to vector<8x384xf32>
    %cst_36 = arith.constant 5.000000e-01 : f32
    %97 = vector.broadcast %cst_36 : f32 to vector<8x384xf32>
    %98 = arith.mulf %97, %96 : vector<8x384xf32>
    %99 = math.tanh %98 : vector<8x384xf32>
    %cst_37 = arith.constant 5.000000e-01 : f32
    %100 = vector.broadcast %cst_37 : f32 to vector<8x384xf32>
    %101 = arith.mulf %100, %99 : vector<8x384xf32>
    %cst_38 = arith.constant 5.000000e-01 : f32
    %102 = vector.broadcast %cst_38 : f32 to vector<8x384xf32>
    %103 = arith.addf %101, %102 : vector<8x384xf32>
    %104 = vector.extract_strided_slice %103 {offsets = [0, 0], sizes = [8, 128], strides = [1, 1]} : vector<8x384xf32> to vector<8x128xf32>
    %105 = vector.extract_strided_slice %103 {offsets = [0, 128], sizes = [8, 128], strides = [1, 1]} : vector<8x384xf32> to vector<8x128xf32>
    %106 = vector.extract_strided_slice %103 {offsets = [0, 256], sizes = [8, 128], strides = [1, 1]} : vector<8x384xf32> to vector<8x128xf32>
    %107 = vector.extract_strided_slice %92 {offsets = [0, 384], sizes = [8, 128], strides = [1, 1]} : vector<8x512xf32> to vector<8x128xf32>
    %108 = math.tanh %107 : vector<8x128xf32>
    %109 = arith.mulf %105, %60 : vector<8x128xf32>
    %110 = arith.mulf %104, %108 : vector<8x128xf32>
    %111 = arith.addf %109, %110 : vector<8x128xf32>
    %112 = math.tanh %111 : vector<8x128xf32>
    %113 = arith.mulf %106, %112 : vector<8x128xf32>
    %114 = vector.extract_strided_slice %95 {offsets = [0, 0], sizes = [8, 384], strides = [1, 1]} : vector<8x512xf32> to vector<8x384xf32>
    %cst_39 = arith.constant 5.000000e-01 : f32
    %115 = vector.broadcast %cst_39 : f32 to vector<8x384xf32>
    %116 = arith.mulf %115, %114 : vector<8x384xf32>
    %117 = math.tanh %116 : vector<8x384xf32>
    %cst_40 = arith.constant 5.000000e-01 : f32
    %118 = vector.broadcast %cst_40 : f32 to vector<8x384xf32>
    %119 = arith.mulf %118, %117 : vector<8x384xf32>
    %cst_41 = arith.constant 5.000000e-01 : f32
    %120 = vector.broadcast %cst_41 : f32 to vector<8x384xf32>
    %121 = arith.addf %119, %120 : vector<8x384xf32>
    %122 = vector.extract_strided_slice %121 {offsets = [0, 0], sizes = [8, 128], strides = [1, 1]} : vector<8x384xf32> to vector<8x128xf32>
    %123 = vector.extract_strided_slice %121 {offsets = [0, 128], sizes = [8, 128], strides = [1, 1]} : vector<8x384xf32> to vector<8x128xf32>
    %124 = vector.extract_strided_slice %121 {offsets = [0, 256], sizes = [8, 128], strides = [1, 1]} : vector<8x384xf32> to vector<8x128xf32>
    %125 = vector.extract_strided_slice %95 {offsets = [0, 384], sizes = [8, 128], strides = [1, 1]} : vector<8x512xf32> to vector<8x128xf32>
    %126 = math.tanh %125 : vector<8x128xf32>
    %127 = arith.mulf %123, %78 : vector<8x128xf32>
    %128 = arith.mulf %122, %126 : vector<8x128xf32>
    %129 = arith.addf %127, %128 : vector<8x128xf32>
    %130 = math.tanh %129 : vector<8x128xf32>
    %131 = arith.mulf %124, %130 : vector<8x128xf32>
    %c3_i32 = arith.constant 3 : i32
    %c8_i32_42 = arith.constant 8 : i32
    %132 = arith.muli %c3_i32, %c8_i32_42 : i32
    %133 = tpu.assume_multiple %132, 8 : i32
    %134 = arith.truncf %113 : vector<8x128xf32> to vector<8x128xbf16>
    %135 = arith.truncf %131 : vector<8x128xf32> to vector<8x128xbf16>
    %c0_43 = arith.constant 0 : index
    %c0_44 = arith.constant 0 : index
    %136 = vector.load %arg3[%c0_43, %c0_44] : memref<128x1024xbf16, #tpu.memory_space<vmem>>, vector<128x1024xbf16>
    %cst_45 = arith.constant dense<0.000000e+00> : vector<8x1024xf32>
    %137 = tpu.matmul %134, %136, %cst_45 {dimension_numbers = #tpu.dot_dimension_numbers<[1], [0], [0], [1], [0, 0, 1, 1], [], []>} : vector<8x128xbf16>, vector<128x1024xbf16>, vector<8x1024xf32> -> vector<8x1024xf32>
    %c0_46 = arith.constant 0 : index
    %c0_47 = arith.constant 0 : index
    %138 = vector.load %arg4[%c0_46, %c0_47] : memref<128x512xbf16, #tpu.memory_space<vmem>>, vector<128x512xbf16>
    %cst_48 = arith.constant dense<0.000000e+00> : vector<8x512xf32>
    %139 = tpu.matmul %135, %138, %cst_48 {dimension_numbers = #tpu.dot_dimension_numbers<[1], [0], [0], [1], [0, 0, 1, 1], [], []>} : vector<8x128xbf16>, vector<128x512xbf16>, vector<8x512xf32> -> vector<8x512xf32>
    %140 = arith.index_cast %133 : i32 to index
    %c0_49 = arith.constant 0 : index
    %141 = vector.load %arg9[%140, %c0_49] : memref<64x512xf32, #tpu.memory_space<vmem>>, vector<8x512xf32>
    %142 = vector.extract_strided_slice %137 {offsets = [0, 0], sizes = [8, 512], strides = [1, 1]} : vector<8x1024xf32> to vector<8x512xf32>
    %143 = arith.addf %141, %142 : vector<8x512xf32>
    %144 = vector.extract_strided_slice %137 {offsets = [0, 512], sizes = [8, 512], strides = [1, 1]} : vector<8x1024xf32> to vector<8x512xf32>
    %145 = arith.addf %144, %139 : vector<8x512xf32>
    %146 = arith.addf %145, %9 : vector<8x512xf32>
    %147 = vector.extract_strided_slice %143 {offsets = [0, 0], sizes = [8, 384], strides = [1, 1]} : vector<8x512xf32> to vector<8x384xf32>
    %cst_50 = arith.constant 5.000000e-01 : f32
    %148 = vector.broadcast %cst_50 : f32 to vector<8x384xf32>
    %149 = arith.mulf %148, %147 : vector<8x384xf32>
    %150 = math.tanh %149 : vector<8x384xf32>
    %cst_51 = arith.constant 5.000000e-01 : f32
    %151 = vector.broadcast %cst_51 : f32 to vector<8x384xf32>
    %152 = arith.mulf %151, %150 : vector<8x384xf32>
    %cst_52 = arith.constant 5.000000e-01 : f32
    %153 = vector.broadcast %cst_52 : f32 to vector<8x384xf32>
    %154 = arith.addf %152, %153 : vector<8x384xf32>
    %155 = vector.extract_strided_slice %154 {offsets = [0, 0], sizes = [8, 128], strides = [1, 1]} : vector<8x384xf32> to vector<8x128xf32>
    %156 = vector.extract_strided_slice %154 {offsets = [0, 128], sizes = [8, 128], strides = [1, 1]} : vector<8x384xf32> to vector<8x128xf32>
    %157 = vector.extract_strided_slice %154 {offsets = [0, 256], sizes = [8, 128], strides = [1, 1]} : vector<8x384xf32> to vector<8x128xf32>
    %158 = vector.extract_strided_slice %143 {offsets = [0, 384], sizes = [8, 128], strides = [1, 1]} : vector<8x512xf32> to vector<8x128xf32>
    %159 = math.tanh %158 : vector<8x128xf32>
    %160 = arith.mulf %156, %111 : vector<8x128xf32>
    %161 = arith.mulf %155, %159 : vector<8x128xf32>
    %162 = arith.addf %160, %161 : vector<8x128xf32>
    %163 = math.tanh %162 : vector<8x128xf32>
    %164 = arith.mulf %157, %163 : vector<8x128xf32>
    %165 = vector.extract_strided_slice %146 {offsets = [0, 0], sizes = [8, 384], strides = [1, 1]} : vector<8x512xf32> to vector<8x384xf32>
    %cst_53 = arith.constant 5.000000e-01 : f32
    %166 = vector.broadcast %cst_53 : f32 to vector<8x384xf32>
    %167 = arith.mulf %166, %165 : vector<8x384xf32>
    %168 = math.tanh %167 : vector<8x384xf32>
    %cst_54 = arith.constant 5.000000e-01 : f32
    %169 = vector.broadcast %cst_54 : f32 to vector<8x384xf32>
    %170 = arith.mulf %169, %168 : vector<8x384xf32>
    %cst_55 = arith.constant 5.000000e-01 : f32
    %171 = vector.broadcast %cst_55 : f32 to vector<8x384xf32>
    %172 = arith.addf %170, %171 : vector<8x384xf32>
    %173 = vector.extract_strided_slice %172 {offsets = [0, 0], sizes = [8, 128], strides = [1, 1]} : vector<8x384xf32> to vector<8x128xf32>
    %174 = vector.extract_strided_slice %172 {offsets = [0, 128], sizes = [8, 128], strides = [1, 1]} : vector<8x384xf32> to vector<8x128xf32>
    %175 = vector.extract_strided_slice %172 {offsets = [0, 256], sizes = [8, 128], strides = [1, 1]} : vector<8x384xf32> to vector<8x128xf32>
    %176 = vector.extract_strided_slice %146 {offsets = [0, 384], sizes = [8, 128], strides = [1, 1]} : vector<8x512xf32> to vector<8x128xf32>
    %177 = math.tanh %176 : vector<8x128xf32>
    %178 = arith.mulf %174, %129 : vector<8x128xf32>
    %179 = arith.mulf %173, %177 : vector<8x128xf32>
    %180 = arith.addf %178, %179 : vector<8x128xf32>
    %181 = math.tanh %180 : vector<8x128xf32>
    %182 = arith.mulf %175, %181 : vector<8x128xf32>
    %c4_i32 = arith.constant 4 : i32
    %c8_i32_56 = arith.constant 8 : i32
    %183 = arith.muli %c4_i32, %c8_i32_56 : i32
    %184 = tpu.assume_multiple %183, 8 : i32
    %185 = arith.truncf %164 : vector<8x128xf32> to vector<8x128xbf16>
    %186 = arith.truncf %182 : vector<8x128xf32> to vector<8x128xbf16>
    %c0_57 = arith.constant 0 : index
    %c0_58 = arith.constant 0 : index
    %187 = vector.load %arg3[%c0_57, %c0_58] : memref<128x1024xbf16, #tpu.memory_space<vmem>>, vector<128x1024xbf16>
    %cst_59 = arith.constant dense<0.000000e+00> : vector<8x1024xf32>
    %188 = tpu.matmul %185, %187, %cst_59 {dimension_numbers = #tpu.dot_dimension_numbers<[1], [0], [0], [1], [0, 0, 1, 1], [], []>} : vector<8x128xbf16>, vector<128x1024xbf16>, vector<8x1024xf32> -> vector<8x1024xf32>
    %c0_60 = arith.constant 0 : index
    %c0_61 = arith.constant 0 : index
    %189 = vector.load %arg4[%c0_60, %c0_61] : memref<128x512xbf16, #tpu.memory_space<vmem>>, vector<128x512xbf16>
    %cst_62 = arith.constant dense<0.000000e+00> : vector<8x512xf32>
    %190 = tpu.matmul %186, %189, %cst_62 {dimension_numbers = #tpu.dot_dimension_numbers<[1], [0], [0], [1], [0, 0, 1, 1], [], []>} : vector<8x128xbf16>, vector<128x512xbf16>, vector<8x512xf32> -> vector<8x512xf32>
    %191 = arith.index_cast %184 : i32 to index
    %c0_63 = arith.constant 0 : index
    %192 = vector.load %arg9[%191, %c0_63] : memref<64x512xf32, #tpu.memory_space<vmem>>, vector<8x512xf32>
    %193 = vector.extract_strided_slice %188 {offsets = [0, 0], sizes = [8, 512], strides = [1, 1]} : vector<8x1024xf32> to vector<8x512xf32>
    %194 = arith.addf %192, %193 : vector<8x512xf32>
    %195 = vector.extract_strided_slice %188 {offsets = [0, 512], sizes = [8, 512], strides = [1, 1]} : vector<8x1024xf32> to vector<8x512xf32>
    %196 = arith.addf %195, %190 : vector<8x512xf32>
    %197 = arith.addf %196, %9 : vector<8x512xf32>
    %198 = vector.extract_strided_slice %194 {offsets = [0, 0], sizes = [8, 384], strides = [1, 1]} : vector<8x512xf32> to vector<8x384xf32>
    %cst_64 = arith.constant 5.000000e-01 : f32
    %199 = vector.broadcast %cst_64 : f32 to vector<8x384xf32>
    %200 = arith.mulf %199, %198 : vector<8x384xf32>
    %201 = math.tanh %200 : vector<8x384xf32>
    %cst_65 = arith.constant 5.000000e-01 : f32
    %202 = vector.broadcast %cst_65 : f32 to vector<8x384xf32>
    %203 = arith.mulf %202, %201 : vector<8x384xf32>
    %cst_66 = arith.constant 5.000000e-01 : f32
    %204 = vector.broadcast %cst_66 : f32 to vector<8x384xf32>
    %205 = arith.addf %203, %204 : vector<8x384xf32>
    %206 = vector.extract_strided_slice %205 {offsets = [0, 0], sizes = [8, 128], strides = [1, 1]} : vector<8x384xf32> to vector<8x128xf32>
    %207 = vector.extract_strided_slice %205 {offsets = [0, 128], sizes = [8, 128], strides = [1, 1]} : vector<8x384xf32> to vector<8x128xf32>
    %208 = vector.extract_strided_slice %205 {offsets = [0, 256], sizes = [8, 128], strides = [1, 1]} : vector<8x384xf32> to vector<8x128xf32>
    %209 = vector.extract_strided_slice %194 {offsets = [0, 384], sizes = [8, 128], strides = [1, 1]} : vector<8x512xf32> to vector<8x128xf32>
    %210 = math.tanh %209 : vector<8x128xf32>
    %211 = arith.mulf %207, %162 : vector<8x128xf32>
    %212 = arith.mulf %206, %210 : vector<8x128xf32>
    %213 = arith.addf %211, %212 : vector<8x128xf32>
    %214 = math.tanh %213 : vector<8x128xf32>
    %215 = arith.mulf %208, %214 : vector<8x128xf32>
    %216 = vector.extract_strided_slice %197 {offsets = [0, 0], sizes = [8, 384], strides = [1, 1]} : vector<8x512xf32> to vector<8x384xf32>
    %cst_67 = arith.constant 5.000000e-01 : f32
    %217 = vector.broadcast %cst_67 : f32 to vector<8x384xf32>
    %218 = arith.mulf %217, %216 : vector<8x384xf32>
    %219 = math.tanh %218 : vector<8x384xf32>
    %cst_68 = arith.constant 5.000000e-01 : f32
    %220 = vector.broadcast %cst_68 : f32 to vector<8x384xf32>
    %221 = arith.mulf %220, %219 : vector<8x384xf32>
    %cst_69 = arith.constant 5.000000e-01 : f32
    %222 = vector.broadcast %cst_69 : f32 to vector<8x384xf32>
    %223 = arith.addf %221, %222 : vector<8x384xf32>
    %224 = vector.extract_strided_slice %223 {offsets = [0, 0], sizes = [8, 128], strides = [1, 1]} : vector<8x384xf32> to vector<8x128xf32>
    %225 = vector.extract_strided_slice %223 {offsets = [0, 128], sizes = [8, 128], strides = [1, 1]} : vector<8x384xf32> to vector<8x128xf32>
    %226 = vector.extract_strided_slice %223 {offsets = [0, 256], sizes = [8, 128], strides = [1, 1]} : vector<8x384xf32> to vector<8x128xf32>
    %227 = vector.extract_strided_slice %197 {offsets = [0, 384], sizes = [8, 128], strides = [1, 1]} : vector<8x512xf32> to vector<8x128xf32>
    %228 = math.tanh %227 : vector<8x128xf32>
    %229 = arith.mulf %225, %180 : vector<8x128xf32>
    %230 = arith.mulf %224, %228 : vector<8x128xf32>
    %231 = arith.addf %229, %230 : vector<8x128xf32>
    %232 = math.tanh %231 : vector<8x128xf32>
    %233 = arith.mulf %226, %232 : vector<8x128xf32>
    %c5_i32 = arith.constant 5 : i32
    %c8_i32_70 = arith.constant 8 : i32
    %234 = arith.muli %c5_i32, %c8_i32_70 : i32
    %235 = tpu.assume_multiple %234, 8 : i32
    %236 = arith.truncf %215 : vector<8x128xf32> to vector<8x128xbf16>
    %237 = arith.truncf %233 : vector<8x128xf32> to vector<8x128xbf16>
    %c0_71 = arith.constant 0 : index
    %c0_72 = arith.constant 0 : index
    %238 = vector.load %arg3[%c0_71, %c0_72] : memref<128x1024xbf16, #tpu.memory_space<vmem>>, vector<128x1024xbf16>
    %cst_73 = arith.constant dense<0.000000e+00> : vector<8x1024xf32>
    %239 = tpu.matmul %236, %238, %cst_73 {dimension_numbers = #tpu.dot_dimension_numbers<[1], [0], [0], [1], [0, 0, 1, 1], [], []>} : vector<8x128xbf16>, vector<128x1024xbf16>, vector<8x1024xf32> -> vector<8x1024xf32>
    %c0_74 = arith.constant 0 : index
    %c0_75 = arith.constant 0 : index
    %240 = vector.load %arg4[%c0_74, %c0_75] : memref<128x512xbf16, #tpu.memory_space<vmem>>, vector<128x512xbf16>
    %cst_76 = arith.constant dense<0.000000e+00> : vector<8x512xf32>
    %241 = tpu.matmul %237, %240, %cst_76 {dimension_numbers = #tpu.dot_dimension_numbers<[1], [0], [0], [1], [0, 0, 1, 1], [], []>} : vector<8x128xbf16>, vector<128x512xbf16>, vector<8x512xf32> -> vector<8x512xf32>
    %242 = arith.index_cast %235 : i32 to index
    %c0_77 = arith.constant 0 : index
    %243 = vector.load %arg9[%242, %c0_77] : memref<64x512xf32, #tpu.memory_space<vmem>>, vector<8x512xf32>
    %244 = vector.extract_strided_slice %239 {offsets = [0, 0], sizes = [8, 512], strides = [1, 1]} : vector<8x1024xf32> to vector<8x512xf32>
    %245 = arith.addf %243, %244 : vector<8x512xf32>
    %246 = vector.extract_strided_slice %239 {offsets = [0, 512], sizes = [8, 512], strides = [1, 1]} : vector<8x1024xf32> to vector<8x512xf32>
    %247 = arith.addf %246, %241 : vector<8x512xf32>
    %248 = arith.addf %247, %9 : vector<8x512xf32>
    %249 = vector.extract_strided_slice %245 {offsets = [0, 0], sizes = [8, 384], strides = [1, 1]} : vector<8x512xf32> to vector<8x384xf32>
    %cst_78 = arith.constant 5.000000e-01 : f32
    %250 = vector.broadcast %cst_78 : f32 to vector<8x384xf32>
    %251 = arith.mulf %250, %249 : vector<8x384xf32>
    %252 = math.tanh %251 : vector<8x384xf32>
    %cst_79 = arith.constant 5.000000e-01 : f32
    %253 = vector.broadcast %cst_79 : f32 to vector<8x384xf32>
    %254 = arith.mulf %253, %252 : vector<8x384xf32>
    %cst_80 = arith.constant 5.000000e-01 : f32
    %255 = vector.broadcast %cst_80 : f32 to vector<8x384xf32>
    %256 = arith.addf %254, %255 : vector<8x384xf32>
    %257 = vector.extract_strided_slice %256 {offsets = [0, 0], sizes = [8, 128], strides = [1, 1]} : vector<8x384xf32> to vector<8x128xf32>
    %258 = vector.extract_strided_slice %256 {offsets = [0, 128], sizes = [8, 128], strides = [1, 1]} : vector<8x384xf32> to vector<8x128xf32>
    %259 = vector.extract_strided_slice %256 {offsets = [0, 256], sizes = [8, 128], strides = [1, 1]} : vector<8x384xf32> to vector<8x128xf32>
    %260 = vector.extract_strided_slice %245 {offsets = [0, 384], sizes = [8, 128], strides = [1, 1]} : vector<8x512xf32> to vector<8x128xf32>
    %261 = math.tanh %260 : vector<8x128xf32>
    %262 = arith.mulf %258, %213 : vector<8x128xf32>
    %263 = arith.mulf %257, %261 : vector<8x128xf32>
    %264 = arith.addf %262, %263 : vector<8x128xf32>
    %265 = math.tanh %264 : vector<8x128xf32>
    %266 = arith.mulf %259, %265 : vector<8x128xf32>
    %267 = vector.extract_strided_slice %248 {offsets = [0, 0], sizes = [8, 384], strides = [1, 1]} : vector<8x512xf32> to vector<8x384xf32>
    %cst_81 = arith.constant 5.000000e-01 : f32
    %268 = vector.broadcast %cst_81 : f32 to vector<8x384xf32>
    %269 = arith.mulf %268, %267 : vector<8x384xf32>
    %270 = math.tanh %269 : vector<8x384xf32>
    %cst_82 = arith.constant 5.000000e-01 : f32
    %271 = vector.broadcast %cst_82 : f32 to vector<8x384xf32>
    %272 = arith.mulf %271, %270 : vector<8x384xf32>
    %cst_83 = arith.constant 5.000000e-01 : f32
    %273 = vector.broadcast %cst_83 : f32 to vector<8x384xf32>
    %274 = arith.addf %272, %273 : vector<8x384xf32>
    %275 = vector.extract_strided_slice %274 {offsets = [0, 0], sizes = [8, 128], strides = [1, 1]} : vector<8x384xf32> to vector<8x128xf32>
    %276 = vector.extract_strided_slice %274 {offsets = [0, 128], sizes = [8, 128], strides = [1, 1]} : vector<8x384xf32> to vector<8x128xf32>
    %277 = vector.extract_strided_slice %274 {offsets = [0, 256], sizes = [8, 128], strides = [1, 1]} : vector<8x384xf32> to vector<8x128xf32>
    %278 = vector.extract_strided_slice %248 {offsets = [0, 384], sizes = [8, 128], strides = [1, 1]} : vector<8x512xf32> to vector<8x128xf32>
    %279 = math.tanh %278 : vector<8x128xf32>
    %280 = arith.mulf %276, %231 : vector<8x128xf32>
    %281 = arith.mulf %275, %279 : vector<8x128xf32>
    %282 = arith.addf %280, %281 : vector<8x128xf32>
    %283 = math.tanh %282 : vector<8x128xf32>
    %284 = arith.mulf %277, %283 : vector<8x128xf32>
    %c6_i32 = arith.constant 6 : i32
    %c8_i32_84 = arith.constant 8 : i32
    %285 = arith.muli %c6_i32, %c8_i32_84 : i32
    %286 = tpu.assume_multiple %285, 8 : i32
    %287 = arith.truncf %266 : vector<8x128xf32> to vector<8x128xbf16>
    %288 = arith.truncf %284 : vector<8x128xf32> to vector<8x128xbf16>
    %c0_85 = arith.constant 0 : index
    %c0_86 = arith.constant 0 : index
    %289 = vector.load %arg3[%c0_85, %c0_86] : memref<128x1024xbf16, #tpu.memory_space<vmem>>, vector<128x1024xbf16>
    %cst_87 = arith.constant dense<0.000000e+00> : vector<8x1024xf32>
    %290 = tpu.matmul %287, %289, %cst_87 {dimension_numbers = #tpu.dot_dimension_numbers<[1], [0], [0], [1], [0, 0, 1, 1], [], []>} : vector<8x128xbf16>, vector<128x1024xbf16>, vector<8x1024xf32> -> vector<8x1024xf32>
    %c0_88 = arith.constant 0 : index
    %c0_89 = arith.constant 0 : index
    %291 = vector.load %arg4[%c0_88, %c0_89] : memref<128x512xbf16, #tpu.memory_space<vmem>>, vector<128x512xbf16>
    %cst_90 = arith.constant dense<0.000000e+00> : vector<8x512xf32>
    %292 = tpu.matmul %288, %291, %cst_90 {dimension_numbers = #tpu.dot_dimension_numbers<[1], [0], [0], [1], [0, 0, 1, 1], [], []>} : vector<8x128xbf16>, vector<128x512xbf16>, vector<8x512xf32> -> vector<8x512xf32>
    %293 = arith.index_cast %286 : i32 to index
    %c0_91 = arith.constant 0 : index
    %294 = vector.load %arg9[%293, %c0_91] : memref<64x512xf32, #tpu.memory_space<vmem>>, vector<8x512xf32>
    %295 = vector.extract_strided_slice %290 {offsets = [0, 0], sizes = [8, 512], strides = [1, 1]} : vector<8x1024xf32> to vector<8x512xf32>
    %296 = arith.addf %294, %295 : vector<8x512xf32>
    %297 = vector.extract_strided_slice %290 {offsets = [0, 512], sizes = [8, 512], strides = [1, 1]} : vector<8x1024xf32> to vector<8x512xf32>
    %298 = arith.addf %297, %292 : vector<8x512xf32>
    %299 = arith.addf %298, %9 : vector<8x512xf32>
    %300 = vector.extract_strided_slice %296 {offsets = [0, 0], sizes = [8, 384], strides = [1, 1]} : vector<8x512xf32> to vector<8x384xf32>
    %cst_92 = arith.constant 5.000000e-01 : f32
    %301 = vector.broadcast %cst_92 : f32 to vector<8x384xf32>
    %302 = arith.mulf %301, %300 : vector<8x384xf32>
    %303 = math.tanh %302 : vector<8x384xf32>
    %cst_93 = arith.constant 5.000000e-01 : f32
    %304 = vector.broadcast %cst_93 : f32 to vector<8x384xf32>
    %305 = arith.mulf %304, %303 : vector<8x384xf32>
    %cst_94 = arith.constant 5.000000e-01 : f32
    %306 = vector.broadcast %cst_94 : f32 to vector<8x384xf32>
    %307 = arith.addf %305, %306 : vector<8x384xf32>
    %308 = vector.extract_strided_slice %307 {offsets = [0, 0], sizes = [8, 128], strides = [1, 1]} : vector<8x384xf32> to vector<8x128xf32>
    %309 = vector.extract_strided_slice %307 {offsets = [0, 128], sizes = [8, 128], strides = [1, 1]} : vector<8x384xf32> to vector<8x128xf32>
    %310 = vector.extract_strided_slice %307 {offsets = [0, 256], sizes = [8, 128], strides = [1, 1]} : vector<8x384xf32> to vector<8x128xf32>
    %311 = vector.extract_strided_slice %296 {offsets = [0, 384], sizes = [8, 128], strides = [1, 1]} : vector<8x512xf32> to vector<8x128xf32>
    %312 = math.tanh %311 : vector<8x128xf32>
    %313 = arith.mulf %309, %264 : vector<8x128xf32>
    %314 = arith.mulf %308, %312 : vector<8x128xf32>
    %315 = arith.addf %313, %314 : vector<8x128xf32>
    %316 = math.tanh %315 : vector<8x128xf32>
    %317 = arith.mulf %310, %316 : vector<8x128xf32>
    %318 = vector.extract_strided_slice %299 {offsets = [0, 0], sizes = [8, 384], strides = [1, 1]} : vector<8x512xf32> to vector<8x384xf32>
    %cst_95 = arith.constant 5.000000e-01 : f32
    %319 = vector.broadcast %cst_95 : f32 to vector<8x384xf32>
    %320 = arith.mulf %319, %318 : vector<8x384xf32>
    %321 = math.tanh %320 : vector<8x384xf32>
    %cst_96 = arith.constant 5.000000e-01 : f32
    %322 = vector.broadcast %cst_96 : f32 to vector<8x384xf32>
    %323 = arith.mulf %322, %321 : vector<8x384xf32>
    %cst_97 = arith.constant 5.000000e-01 : f32
    %324 = vector.broadcast %cst_97 : f32 to vector<8x384xf32>
    %325 = arith.addf %323, %324 : vector<8x384xf32>
    %326 = vector.extract_strided_slice %325 {offsets = [0, 0], sizes = [8, 128], strides = [1, 1]} : vector<8x384xf32> to vector<8x128xf32>
    %327 = vector.extract_strided_slice %325 {offsets = [0, 128], sizes = [8, 128], strides = [1, 1]} : vector<8x384xf32> to vector<8x128xf32>
    %328 = vector.extract_strided_slice %325 {offsets = [0, 256], sizes = [8, 128], strides = [1, 1]} : vector<8x384xf32> to vector<8x128xf32>
    %329 = vector.extract_strided_slice %299 {offsets = [0, 384], sizes = [8, 128], strides = [1, 1]} : vector<8x512xf32> to vector<8x128xf32>
    %330 = math.tanh %329 : vector<8x128xf32>
    %331 = arith.mulf %327, %282 : vector<8x128xf32>
    %332 = arith.mulf %326, %330 : vector<8x128xf32>
    %333 = arith.addf %331, %332 : vector<8x128xf32>
    %334 = math.tanh %333 : vector<8x128xf32>
    %335 = arith.mulf %328, %334 : vector<8x128xf32>
    %c7_i32 = arith.constant 7 : i32
    %c8_i32_98 = arith.constant 8 : i32
    %336 = arith.muli %c7_i32, %c8_i32_98 : i32
    %337 = tpu.assume_multiple %336, 8 : i32
    %338 = arith.truncf %317 : vector<8x128xf32> to vector<8x128xbf16>
    %339 = arith.truncf %335 : vector<8x128xf32> to vector<8x128xbf16>
    %c0_99 = arith.constant 0 : index
    %c0_100 = arith.constant 0 : index
    %340 = vector.load %arg3[%c0_99, %c0_100] : memref<128x1024xbf16, #tpu.memory_space<vmem>>, vector<128x1024xbf16>
    %cst_101 = arith.constant dense<0.000000e+00> : vector<8x1024xf32>
    %341 = tpu.matmul %338, %340, %cst_101 {dimension_numbers = #tpu.dot_dimension_numbers<[1], [0], [0], [1], [0, 0, 1, 1], [], []>} : vector<8x128xbf16>, vector<128x1024xbf16>, vector<8x1024xf32> -> vector<8x1024xf32>
    %c0_102 = arith.constant 0 : index
    %c0_103 = arith.constant 0 : index
    %342 = vector.load %arg4[%c0_102, %c0_103] : memref<128x512xbf16, #tpu.memory_space<vmem>>, vector<128x512xbf16>
    %cst_104 = arith.constant dense<0.000000e+00> : vector<8x512xf32>
    %343 = tpu.matmul %339, %342, %cst_104 {dimension_numbers = #tpu.dot_dimension_numbers<[1], [0], [0], [1], [0, 0, 1, 1], [], []>} : vector<8x128xbf16>, vector<128x512xbf16>, vector<8x512xf32> -> vector<8x512xf32>
    %344 = arith.index_cast %337 : i32 to index
    %c0_105 = arith.constant 0 : index
    %345 = vector.load %arg9[%344, %c0_105] : memref<64x512xf32, #tpu.memory_space<vmem>>, vector<8x512xf32>
    %346 = vector.extract_strided_slice %341 {offsets = [0, 0], sizes = [8, 512], strides = [1, 1]} : vector<8x1024xf32> to vector<8x512xf32>
    %347 = arith.addf %345, %346 : vector<8x512xf32>
    %348 = vector.extract_strided_slice %341 {offsets = [0, 512], sizes = [8, 512], strides = [1, 1]} : vector<8x1024xf32> to vector<8x512xf32>
    %349 = arith.addf %348, %343 : vector<8x512xf32>
    %350 = arith.addf %349, %9 : vector<8x512xf32>
    %351 = vector.extract_strided_slice %347 {offsets = [0, 0], sizes = [8, 384], strides = [1, 1]} : vector<8x512xf32> to vector<8x384xf32>
    %cst_106 = arith.constant 5.000000e-01 : f32
    %352 = vector.broadcast %cst_106 : f32 to vector<8x384xf32>
    %353 = arith.mulf %352, %351 : vector<8x384xf32>
    %354 = math.tanh %353 : vector<8x384xf32>
    %cst_107 = arith.constant 5.000000e-01 : f32
    %355 = vector.broadcast %cst_107 : f32 to vector<8x384xf32>
    %356 = arith.mulf %355, %354 : vector<8x384xf32>
    %cst_108 = arith.constant 5.000000e-01 : f32
    %357 = vector.broadcast %cst_108 : f32 to vector<8x384xf32>
    %358 = arith.addf %356, %357 : vector<8x384xf32>
    %359 = vector.extract_strided_slice %358 {offsets = [0, 0], sizes = [8, 128], strides = [1, 1]} : vector<8x384xf32> to vector<8x128xf32>
    %360 = vector.extract_strided_slice %358 {offsets = [0, 128], sizes = [8, 128], strides = [1, 1]} : vector<8x384xf32> to vector<8x128xf32>
    %361 = vector.extract_strided_slice %358 {offsets = [0, 256], sizes = [8, 128], strides = [1, 1]} : vector<8x384xf32> to vector<8x128xf32>
    %362 = vector.extract_strided_slice %347 {offsets = [0, 384], sizes = [8, 128], strides = [1, 1]} : vector<8x512xf32> to vector<8x128xf32>
    %363 = math.tanh %362 : vector<8x128xf32>
    %364 = arith.mulf %360, %315 : vector<8x128xf32>
    %365 = arith.mulf %359, %363 : vector<8x128xf32>
    %366 = arith.addf %364, %365 : vector<8x128xf32>
    %367 = math.tanh %366 : vector<8x128xf32>
    %368 = arith.mulf %361, %367 : vector<8x128xf32>
    %369 = vector.extract_strided_slice %350 {offsets = [0, 0], sizes = [8, 384], strides = [1, 1]} : vector<8x512xf32> to vector<8x384xf32>
    %cst_109 = arith.constant 5.000000e-01 : f32
    %370 = vector.broadcast %cst_109 : f32 to vector<8x384xf32>
    %371 = arith.mulf %370, %369 : vector<8x384xf32>
    %372 = math.tanh %371 : vector<8x384xf32>
    %cst_110 = arith.constant 5.000000e-01 : f32
    %373 = vector.broadcast %cst_110 : f32 to vector<8x384xf32>
    %374 = arith.mulf %373, %372 : vector<8x384xf32>
    %cst_111 = arith.constant 5.000000e-01 : f32
    %375 = vector.broadcast %cst_111 : f32 to vector<8x384xf32>
    %376 = arith.addf %374, %375 : vector<8x384xf32>
    %377 = vector.extract_strided_slice %376 {offsets = [0, 0], sizes = [8, 128], strides = [1, 1]} : vector<8x384xf32> to vector<8x128xf32>
    %378 = vector.extract_strided_slice %376 {offsets = [0, 128], sizes = [8, 128], strides = [1, 1]} : vector<8x384xf32> to vector<8x128xf32>
    %379 = vector.extract_strided_slice %376 {offsets = [0, 256], sizes = [8, 128], strides = [1, 1]} : vector<8x384xf32> to vector<8x128xf32>
    %380 = vector.extract_strided_slice %350 {offsets = [0, 384], sizes = [8, 128], strides = [1, 1]} : vector<8x512xf32> to vector<8x128xf32>
    %381 = math.tanh %380 : vector<8x128xf32>
    %382 = arith.mulf %378, %333 : vector<8x128xf32>
    %383 = arith.mulf %377, %381 : vector<8x128xf32>
    %384 = arith.addf %382, %383 : vector<8x128xf32>
    %385 = math.tanh %384 : vector<8x128xf32>
    %386 = arith.mulf %379, %385 : vector<8x128xf32>
    %c7_i32_112 = arith.constant 7 : i32
    %387 = arith.truncf %368 : vector<8x128xf32> to vector<8x128xbf16>
    %c0_113 = arith.constant 0 : index
    %c0_114 = arith.constant 0 : index
    %388 = vector.load %arg3[%c0_113, %c0_114] : memref<128x1024xbf16, #tpu.memory_space<vmem>>, vector<128x1024xbf16>
    %cst_115 = arith.constant dense<0.000000e+00> : vector<8x1024xf32>
    %389 = tpu.matmul %387, %388, %cst_115 {dimension_numbers = #tpu.dot_dimension_numbers<[1], [0], [0], [1], [0, 0, 1, 1], [], []>} : vector<8x128xbf16>, vector<128x1024xbf16>, vector<8x1024xf32> -> vector<8x1024xf32>
    %390 = arith.truncf %386 : vector<8x128xf32> to vector<8x128xbf16>
    %c0_116 = arith.constant 0 : index
    %c0_117 = arith.constant 0 : index
    %391 = vector.load %arg4[%c0_116, %c0_117] : memref<128x512xbf16, #tpu.memory_space<vmem>>, vector<128x512xbf16>
    %cst_118 = arith.constant dense<0.000000e+00> : vector<8x512xf32>
    %392 = tpu.matmul %390, %391, %cst_118 {dimension_numbers = #tpu.dot_dimension_numbers<[1], [0], [0], [1], [0, 0, 1, 1], [], []>} : vector<8x128xbf16>, vector<128x512xbf16>, vector<8x512xf32> -> vector<8x512xf32>
    %393 = vector.extract_strided_slice %389 {offsets = [0, 512], sizes = [8, 512], strides = [1, 1]} : vector<8x1024xf32> to vector<8x512xf32>
    %394 = arith.addf %393, %392 : vector<8x512xf32>
    %395 = arith.addf %394, %9 : vector<8x512xf32>
    %396 = vector.extract_strided_slice %395 {offsets = [0, 0], sizes = [8, 384], strides = [1, 1]} : vector<8x512xf32> to vector<8x384xf32>
    %cst_119 = arith.constant 5.000000e-01 : f32
    %397 = vector.broadcast %cst_119 : f32 to vector<8x384xf32>
    %398 = arith.mulf %397, %396 : vector<8x384xf32>
    %399 = math.tanh %398 : vector<8x384xf32>
    %cst_120 = arith.constant 5.000000e-01 : f32
    %400 = vector.broadcast %cst_120 : f32 to vector<8x384xf32>
    %401 = arith.mulf %400, %399 : vector<8x384xf32>
    %cst_121 = arith.constant 5.000000e-01 : f32
    %402 = vector.broadcast %cst_121 : f32 to vector<8x384xf32>
    %403 = arith.addf %401, %402 : vector<8x384xf32>
    %404 = vector.extract_strided_slice %403 {offsets = [0, 0], sizes = [8, 128], strides = [1, 1]} : vector<8x384xf32> to vector<8x128xf32>
    %405 = vector.extract_strided_slice %403 {offsets = [0, 128], sizes = [8, 128], strides = [1, 1]} : vector<8x384xf32> to vector<8x128xf32>
    %406 = vector.extract_strided_slice %403 {offsets = [0, 256], sizes = [8, 128], strides = [1, 1]} : vector<8x384xf32> to vector<8x128xf32>
    %407 = vector.extract_strided_slice %395 {offsets = [0, 384], sizes = [8, 128], strides = [1, 1]} : vector<8x512xf32> to vector<8x128xf32>
    %408 = math.tanh %407 : vector<8x128xf32>
    %409 = arith.mulf %405, %384 : vector<8x128xf32>
    %410 = arith.mulf %404, %408 : vector<8x128xf32>
    %411 = arith.addf %409, %410 : vector<8x128xf32>
    %412 = math.tanh %411 : vector<8x128xf32>
    %413 = arith.mulf %406, %412 : vector<8x128xf32>
    %c0_122 = arith.constant 0 : index
    %c0_123 = arith.constant 0 : index
    %414 = vector.load %arg6[%c0_122, %c0_123] : memref<128x128xf32, #tpu.memory_space<vmem>>, vector<128x128xf32>
    %cst_124 = arith.constant dense<0.000000e+00> : vector<8x128xf32>
    %415 = tpu.matmul %413, %414, %cst_124 {dimension_numbers = #tpu.dot_dimension_numbers<[1], [0], [0], [1], [0, 0, 1, 1], [], []>} : vector<8x128xf32>, vector<128x128xf32>, vector<8x128xf32> -> vector<8x128xf32>
    %c0_125 = arith.constant 0 : index
    %c0_126 = arith.constant 0 : index
    %416 = vector.load %arg7[%c0_125, %c0_126] : memref<1x128xf32, #tpu.memory_space<vmem>>, vector<1x128xf32>
    %417 = vector.broadcast %416 : vector<1x128xf32> to vector<8x128xf32>
    %418 = arith.addf %415, %417 : vector<8x128xf32>
    %c0_127 = arith.constant 0 : index
    %c0_128 = arith.constant 0 : index
    %419 = vector.load %arg8[%c0_127, %c0_128] : memref<8x128xf32, #tpu.memory_space<vmem>>, vector<8x128xf32>
    tpu.vector_store %arg8[%c0_127, %c0_128], %418 {strides = array<i32>} : memref<8x128xf32, #tpu.memory_space<vmem>>, vector<8x128xf32>,
    return
  }
}

</mosaic_0001>

<bundles_post_ra>
// kernel: lstm_forward.1
= control target key start
LH: loop header
LB: loop body
LE: loop exit
PB: predicated region body
PF: predicated region fallthrough
CT: control target
= control target key end

     0   :  { %v5898_v3 = vmov 0.0   ;;  %vm68_vm0 = vcmask 130048   ;;  %vm3864_vm1 = vmmov 0   ;;  %s5889_s1 = inlined_call_operand.vmem [shape: f32[16,512], index: 1, kind: input, shape index: {}]   ;;  %s5890_s0 = inlined_call_operand.vmem [shape: f32[64,16], index: 0, kind: input, shape index: {}]   ;;  %s5891_s3 = inlined_call_operand.vmem [shape: bf16[128,1024], index: 3, kind: input, shape index: {}]   ;;  %s5892_s4 = inlined_call_operand.vmem [shape: bf16[128,512], index: 4, kind: input, shape index: {}]   ;;  %s5893_s2 = inlined_call_operand.vmem [shape: f32[1,512], index: 2, kind: input, shape index: {}]   ;;  %s5894_s5 = inlined_call_operand.vmem [shape: f32[1,512], index: 5, kind: input, shape index: {}]   ;;  %s5895_s6 = inlined_call_operand.vmem [shape: f32[128,128], index: 6, kind: input, shape index: {}]   ;;  %s5896_s7 = inlined_call_operand.vmem [shape: f32[1,128], index: 7, kind: input, shape index: {}]   ;;  %s5897_s8 = inlined_call_operand.vmem [shape: f32[8,128], index: 8, kind: output, shape index: {}]  }
   0x1   :  { %v39_v0 = vld [vmem:[%s5889_s1 + $0x8] sm:$0xff]  ;;  %v38_v2 = vld [vmem:[%s5889_s1] sm:$0xff]  ;;  %157 = vmatprep.mubr.f32.mxu0 %v5898_v3  ;;  %270 = vmatprep.mubr.f32.mxu1 %v5898_v3  ;;  %v41_v6 = vld [vmem:[%s5889_s1 + $0x18] sm:$0xff] }
   0x2   :  { %v43_v1 = vld [vmem:[%s5889_s1 + $0x28] sm:$0xff]  ;;  %v42_v5 = vld [vmem:[%s5889_s1 + $0x20] sm:$0xff]  ;;  %v45_v8 = vld [vmem:[%s5889_s1 + $0x38] sm:$0xff] }
   0x3   :  { %v3553_v4 = vpack.c.bf16 %v43_v1, %v39_v0  ;;  %v3555_v7 = vpack.c.bf16 %v42_v5, %v38_v2  ;;  %v40_v9 = vld [vmem:[%s5889_s1 + $0x10] sm:$0xff]  ;;  %v3557_v11 = vpack.c.bf16 %v45_v8, %v41_v6  ;;  %v30_v13 = vld [vmem:[%s5890_s0] sm:$0xff]  ;;  %v397_v16 = vld [vmem:[%s5891_s3 + $0x8] sm:$0xff] }
   0x4   :  { %v44_v10 = vld [vmem:[%s5889_s1 + $0x30] sm:$0xff]  ;;  %v396_v14 = vld [vmem:[%s5891_s3] sm:$0xff]  ;;  %v401_v18 = vld [vmem:[%s5891_s3 + $0x28] sm:$0xff] }
   0x5   :  { %3554 = vmatprep.subr.bf16.mxu0 %v3553_v4  ;;  %v3559_v12 = vpack.c.bf16 %v44_v10, %v40_v9  ;;  %3558 = vmatprep.subr.bf16.mxu1 %v3557_v11  ;;  %v400_v15 = vld [vmem:[%s5891_s3 + $0x20] sm:$0xff]  ;;  %v3957_v19 = vcombine.high %v397_v16, %v401_v18  ;;  %v3961_v21 = vcombine.low %v397_v16, %v401_v18  ;;  %v405_v24 = vld [vmem:[%s5891_s3 + $0x48] sm:$0xff]  ;;  %v32_v36 = vld [vmem:[%s5890_s0 + $0x10] sm:$0xff] }
   0x6   :  { %3556 = vmatpush1.bf16.msra.mxu0 %v3555_v7  ;;  %v3952_v17 = vcombine.high %v396_v14, %v400_v15  ;;  %v3959_v20 = vcombine.low %v396_v14, %v400_v15  ;;  %v404_v22 = vld [vmem:[%s5891_s3 + $0x40] sm:$0xff]  ;;  %v409_v26 = vld [vmem:[%s5891_s3 + $0x68] sm:$0xff]  ;;  %v33_v45 = vld [vmem:[%s5890_s0 + $0x18] sm:$0xff] }
   0x7   :  { %3560 = vmatpush1.bf16.msra.mxu1 %v3559_v12  ;;  %6169 = vst [vmem:[#allocation4_spill] sm:$0xff] %v3957_v19  ;;  %6171 = vst [vmem:[#allocation6_spill] sm:$0xff] %v3961_v21  ;;  %v408_v23 = vld [vmem:[%s5891_s3 + $0x60] sm:$0xff]  ;;  %v31_v27 = vld [vmem:[%s5890_s0 + $0x8] sm:$0xff]  ;;  %v3984_v28 = vcombine.high %v405_v24, %v409_v26  ;;  %v3988_v30 = vcombine.low %v405_v24, %v409_v26 }
   0x8   :  { %6168 = vst [vmem:[#allocation3_spill] sm:$0xff] %v3952_v17  ;;  %6170 = vst [vmem:[#allocation5_spill] sm:$0xff] %v3959_v20  ;;  %780 = vmatprep.subr.bf16.mxu0 %v3952_v17  ;;  %821 = vmatprep.subr.bf16.mxu1 %v3957_v19  ;;  %v3976_v25 = vcombine.high %v404_v22, %v408_v23  ;;  %v3986_v29 = vcombine.low %v404_v22, %v408_v23  ;;  %v412_v31 = vld [vmem:[%s5891_s3 + $0x80] sm:$0xff]  ;;  %v413_v33 = vld [vmem:[%s5891_s3 + $0x88] sm:$0xff] }
   0x9   :  { %3388 = vmatmul.mubr.msk.f32.vlgmr.msra.gmra.mrb[0].mxu0 %vm68_vm0, %v30_v13  ;;  %6173 = vst [vmem:[#allocation8_spill] sm:$0xff] %v3984_v28  ;;  %6175 = vst [vmem:[#allocation10_spill] sm:$0xff] %v3988_v30  ;;  %v416_v32 = vld [vmem:[%s5891_s3 + $0xa0] sm:$0xff]  ;;  %v417_v35 = vld [vmem:[%s5891_s3 + $0xa8] sm:$0xff] }
   0xa   :  { %163 = vmatprep.mubr.f32.mxu0 %v5898_v3  ;;  %3396 = vmatmul.mubr.msk.f32.vlgmr.msra.gmra.mrb[0].mxu1 %vm68_vm0, %v30_v13  ;;  %6172 = vst [vmem:[#allocation7_spill] sm:$0xff] %v3976_v25  ;;  %6174 = vst [vmem:[#allocation9_spill] sm:$0xff] %v3986_v29  ;;  %v4005_v34 = vcombine.high %v412_v31, %v416_v32  ;;  %v4015_v37 = vcombine.high %v413_v33, %v417_v35  ;;  %v420_v40 = vld [vmem:[%s5891_s3 + $0xc0] sm:$0xff]  ;;  %v421_v42 = vld [vmem:[%s5891_s3 + $0xc8] sm:$0xff] }
   0xb   :  { %276 = vmatprep.mubr.f32.mxu1 %v5898_v3  ;;  %781 = vmatpush1.bf16.msra.mxu0 %v3959_v20  ;;  %v4017_v38 = vcombine.low %v412_v31, %v416_v32  ;;  %v4019_v39 = vcombine.low %v413_v33, %v417_v35  ;;  %v424_v41 = vld [vmem:[%s5891_s3 + $0xe0] sm:$0xff]  ;;  %v425_v44 = vld [vmem:[%s5891_s3 + $0xe8] sm:$0xff]  ;;  %v36_v9 = vld [vmem:[%s5890_s0 + $0x30] sm:$0xff] }
   0xc   :  { %822 = vmatpush1.bf16.msra.mxu1 %v3961_v21  ;;  %782 = vmatprep.subr.bf16.mxu0 %v3976_v25  ;;  %6176 = vst [vmem:[#allocation11_spill] sm:$0xff] %v4005_v34  ;;  %6177 = vst [vmem:[#allocation12_spill] sm:$0xff] %v4015_v37  ;;  %v4036_v43 = vcombine.high %v420_v40, %v424_v41  ;;  %v4046_v46 = vcombine.high %v421_v42, %v425_v44  ;;  %v428_v49 = vld [vmem:[%s5891_s3 + $0x100] sm:$0xff]  ;;  %v429_v51 = vld [vmem:[%s5891_s3 + $0x108] sm:$0xff] }
   0xd   :  { %3389 = vmatmul.mubr.msk.f32.gmra.mrb[2].mxu0 %vm68_vm0, %v31_v27  ;;  %823 = vmatprep.subr.bf16.mxu1 %v3984_v28  ;;  %6178 = vst [vmem:[#allocation13_spill] sm:$0xff] %v4017_v38  ;;  %6179 = vst [vmem:[#allocation14_spill] sm:$0xff] %v4019_v39  ;;  %v4048_v47 = vcombine.low %v420_v40, %v424_v41  ;;  %v4050_v48 = vcombine.low %v421_v42, %v425_v44  ;;  %v432_v50 = vld [vmem:[%s5891_s3 + $0x120] sm:$0xff]  ;;  %v433_v53 = vld [vmem:[%s5891_s3 + $0x128] sm:$0xff]  ;;  %v5903_v40 = vmov 0   ;;  %v48_v44 = vlaneseq }
   0xe   :  { %3397 = vmatmul.mubr.msk.f32.gmra.mrb[2].mxu1 %vm68_vm0, %v31_v27  ;;  %169 = vmatprep.mubr.f32.mxu0 %v5898_v3  ;;  %6180 = vst [vmem:[#allocation15_spill] sm:$0xff] %v4036_v43  ;;  %6181 = vst [vmem:[#allocation16_spill] sm:$0xff] %v4046_v46  ;;  %v4067_v52 = vcombine.high %v428_v49, %v432_v50  ;;  %v34_v54 = vld [vmem:[%s5890_s0 + $0x20] sm:$0xff]  ;;  %v4077_v55 = vcombine.high %v429_v51, %v433_v53  ;;  %v437_v60 = vld [vmem:[%s5891_s3 + $0x148] sm:$0xff] }
   0xf   :  { %783 = vmatpush1.bf16.msra.mxu0 %v3986_v29  ;;  %282 = vmatprep.mubr.f32.mxu1 %v5898_v3  ;;  %6182 = vst [vmem:[#allocation17_spill] sm:$0xff] %v4048_v47  ;;  %6183 = vst [vmem:[#allocation18_spill] sm:$0xff] %v4050_v48  ;;  %v4079_v56 = vcombine.low %v428_v49, %v432_v50  ;;  %v4081_v57 = vcombine.low %v429_v51, %v433_v53  ;;  %v436_v58 = vld [vmem:[%s5891_s3 + $0x140] sm:$0xff]  ;;  %v35_v61 = vld [vmem:[%s5890_s0 + $0x28] sm:$0xff] }
  0x10   :  { %824 = vmatpush1.bf16.msra.mxu1 %v3988_v30  ;;  %784 = vmatprep.subr.bf16.mxu0 %v4005_v34  ;;  %6184 = vst [vmem:[#allocation19_spill] sm:$0xff] %v4067_v52  ;;  %6185 = vst [vmem:[#allocation20_spill] sm:$0xff] %v4077_v55  ;;  %v440_v59 = vld [vmem:[%s5891_s3 + $0x160] sm:$0xff]  ;;  %v441_v63 = vld [vmem:[%s5891_s3 + $0x168] sm:$0xff] }
  0x11   :  { %3390 = vmatmul.mubr.msk.f32.gmra.mrb[4].mxu0 %vm68_vm0, %v32_v36  ;;  %825 = vmatprep.subr.bf16.mxu1 %v4015_v37  ;;  %6186 = vst [vmem:[#allocation21_spill] sm:$0xff] %v4079_v56  ;;  %6187 = vst [vmem:[#allocation22_spill] sm:$0xff] %v4081_v57  ;;  %v4101_v62 = vcombine.high %v436_v58, %v440_v59  ;;  %v4106_v0 = vcombine.low %v436_v58, %v440_v59  ;;  %v444_v4 = vld [vmem:[%s5891_s3 + $0x180] sm:$0xff]  ;;  %v445_v6 = vld [vmem:[%s5891_s3 + $0x188] sm:$0xff] }
  0x12   :  { %3398 = vmatmul.mubr.msk.f32.gmra.mrb[4].mxu1 %vm68_vm0, %v32_v36  ;;  %175 = vmatprep.mubr.f32.mxu0 %v5898_v3  ;;  %v4110_v1 = vcombine.high %v437_v60, %v441_v63  ;;  %v4112_v2 = vcombine.low %v437_v60, %v441_v63  ;;  %v448_v5 = vld [vmem:[%s5891_s3 + $0x1a0] sm:$0xff]  ;;  %v449_v8 = vld [vmem:[%s5891_s3 + $0x1a8] sm:$0xff]  ;;  %v37_v18 = vld [vmem:[%s5890_s0 + $0x38] sm:$0xff] }
  0x13   :  { %785 = vmatpush1.bf16.msra.mxu0 %v4017_v38  ;;  %288 = vmatprep.mubr.f32.mxu1 %v5898_v3  ;;  %6188 = vst [vmem:[#allocation23_spill] sm:$0xff] %v4101_v62  ;;  %6189 = vst [vmem:[#allocation24_spill] sm:$0xff] %v4106_v0  ;;  %v4125_v7 = vcombine.high %v444_v4, %v448_v5  ;;  %v4135_v10 = vcombine.high %v445_v6, %v449_v8  ;;  %v452_v11 = vld [vmem:[%s5891_s3 + $0x1c0] sm:$0xff]  ;;  %v453_v15 = vld [vmem:[%s5891_s3 + $0x1c8] sm:$0xff] }
  0x14   :  { %826 = vmatpush1.bf16.msra.mxu1 %v4019_v39  ;;  %786 = vmatprep.subr.bf16.mxu0 %v4036_v43  ;;  %6190 = vst [vmem:[#allocation25_spill] sm:$0xff] %v4110_v1  ;;  %6191 = vst [vmem:[#allocation26_spill] sm:$0xff] %v4112_v2  ;;  %v456_v12 = vld [vmem:[%s5891_s3 + $0x1e0] sm:$0xff]  ;;  %v4145_v13 = vcombine.low %v444_v4, %v448_v5  ;;  %v4147_v14 = vcombine.low %v445_v6, %v449_v8  ;;  %v457_v16 = vld [vmem:[%s5891_s3 + $0x1e8] sm:$0xff] }
  0x15   :  { %3391 = vmatmul.mubr.msk.f32.gmra.mrb[6].mxu0 %vm68_vm0, %v33_v45  ;;  %827 = vmatprep.subr.bf16.mxu1 %v4046_v46  ;;  %6192 = vst [vmem:[#allocation27_spill] sm:$0xff] %v4125_v7  ;;  %6193 = vst [vmem:[#allocation28_spill] sm:$0xff] %v4135_v10  ;;  %v4162_v22 = vcombine.high %v452_v11, %v456_v12  ;;  %v398_v23 = vld [vmem:[%s5891_s3 + $0x10] sm:$0xff]  ;;  %v4169_v24 = vcombine.high %v453_v15, %v457_v16  ;;  %v399_v27 = vld [vmem:[%s5891_s3 + $0x18] sm:$0xff] }
  0x16   :  { %3399 = vmatmul.mubr.msk.f32.gmra.mrb[6].mxu1 %vm68_vm0, %v33_v45  ;;  %181 = vmatprep.mubr.f32.mxu0 %v5898_v3  ;;  %6194 = vst [vmem:[#allocation29_spill] sm:$0xff] %v4145_v13  ;;  %6195 = vst [vmem:[#allocation30_spill] sm:$0xff] %v4147_v14  ;;  %v402_v26 = vld [vmem:[%s5891_s3 + $0x30] sm:$0xff]  ;;  %v403_v31 = vld [vmem:[%s5891_s3 + $0x38] sm:$0xff]  ;;  %v4182_v32 = vcombine.low %v452_v11, %v456_v12  ;;  %v4184_v33 = vcombine.low %v453_v15, %v457_v16  ;;  %v4206_v45 = vshrl.u32 %v48_v44, 7 }
  0x17   :  { %787 = vmatpush1.bf16.msra.mxu0 %v4048_v47  ;;  %294 = vmatprep.mubr.f32.mxu1 %v5898_v3  ;;  %6196 = vst [vmem:[#allocation31_spill] sm:$0xff] %v4162_v22  ;;  %6197 = vst [vmem:[#allocation32_spill] sm:$0xff] %v4169_v24  ;;  %v4190_v35 = vcombine.high %v398_v23, %v402_v26  ;;  %v4192_v36 = vcombine.high %v399_v27, %v403_v31  ;;  %v46_v50 = vld [vmem:[%s5893_s2] sm:$0xf] }
  0x18   :  { %828 = vmatpush1.bf16.msra.mxu1 %v4050_v48  ;;  %788 = vmatprep.subr.bf16.mxu0 %v4067_v52  ;;  %6198 = vst [vmem:[#allocation33_spill] sm:$0xff] %v4182_v32  ;;  %6199 = vst [vmem:[#allocation34_spill] sm:$0xff] %v4184_v33  ;;  %v4200_v41 = vcombine.low %v398_v23, %v402_v26  ;;  %v4204_v42 = vcombine.low %v399_v27, %v403_v31  ;;  %v5902_v49 = vsub.s32 0, %v4206_v45 }
  0x19   :  { %3392 = vmatmul.mubr.msk.f32.gmra.mrb[8].mxu0 %vm68_vm0, %v34_v54  ;;  %829 = vmatprep.subr.bf16.mxu1 %v4077_v55  ;;  %6200 = vst [vmem:[#allocation35_spill] sm:$0xff] %v4190_v35  ;;  %6201 = vst [vmem:[#allocation36_spill] sm:$0xff] %v4192_v36  ;;  %v5901_v51 = vsub.s32 1, %v4206_v45  ;;  %v5900_v53 = vsub.s32 3, %v4206_v45  ;;  %v5899_v4 = vsub.s32 2, %v4206_v45 }
  0x1a   :  { %3400 = vmatmul.mubr.msk.f32.gmra.mrb[8].mxu1 %vm68_vm0, %v34_v54  ;;  %187 = vmatprep.mubr.f32.mxu0 %v5898_v3  ;;  %6202 = vst [vmem:[#allocation37_spill] sm:$0xff] %v4206_v45  ;;  %v4216_v54 = vrot.slane %v46_v50, %v5902_v49  ;;  %v434_v49 = vld [vmem:[%s5891_s3 + $0x130] sm:$0xff] }
  0x1b   :  { %789 = vmatpush1.bf16.msra.mxu0 %v4079_v56  ;;  %300 = vmatprep.mubr.f32.mxu1 %v5898_v3  ;;  %v4220_v58 = vrot.slane %v46_v50, %v5901_v51  ;;  %v4224_v60 = vrot.slane %v46_v50, %v5900_v53  ;;  %v4232_v15 = vrot.slane %v46_v50, %v5899_v4  ;;  %v430_v51 = vld [vmem:[%s5891_s3 + $0x110] sm:$0xff] }
  0x1c   :  { %830 = vmatpush1.bf16.msra.mxu1 %v4081_v57  ;;  %790 = vmatprep.subr.bf16.mxu0 %v4101_v62  ;;  %6203 = vst [vmem:[#allocation38_spill] sm:$0xff] %v4216_v54 }
  0x1d   :  { %3393 = vmatmul.mubr.msk.f32.gmra.mrb[10].mxu0 %vm68_vm0, %v35_v61  ;;  %831 = vmatprep.subr.bf16.mxu1 %v4110_v1  ;;  %6204 = vst [vmem:[#allocation39_spill] sm:$0xff] %v4220_v58  ;;  %6205 = vst [vmem:[#allocation40_spill] sm:$0xff] %v4224_v60 }
  0x1e   :  { %3401 = vmatmul.mubr.msk.f32.gmra.mrb[10].mxu1 %vm68_vm0, %v35_v61  ;;  %193 = vmatprep.mubr.f32.mxu0 %v5898_v3  ;;  %6206 = vst [vmem:[#allocation41_spill] sm:$0xff] %v4232_v15 }
  0x1f   :  { %791 = vmatpush1.bf16.msra.mxu0 %v4106_v0  ;;  %306 = vmatprep.mubr.f32.mxu1 %v5898_v3 }
  0x20   :  { %832 = vmatpush1.bf16.msra.mxu1 %v4112_v2  ;;  %792 = vmatprep.subr.bf16.mxu0 %v4125_v7 }
  0x21   :  { %3394 = vmatmul.mubr.msk.f32.gmra.mrb[12].mxu0 %vm68_vm0, %v36_v9  ;;  %833 = vmatprep.subr.bf16.mxu1 %v4135_v10 }
  0x22   :  { %3402 = vmatmul.mubr.msk.f32.gmra.mrb[12].mxu1 %vm68_vm0, %v36_v9  ;;  %199 = vmatprep.mubr.f32.mxu0 %v5898_v3 }
  0x23   :  { %793 = vmatpush1.bf16.msra.mxu0 %v4145_v13  ;;  %312 = vmatprep.mubr.f32.mxu1 %v5898_v3  ;;  %v426_v3 = vld [vmem:[%s5891_s3 + $0xf0] sm:$0xff] }
  0x24   :  { %834 = vmatpush1.bf16.msra.mxu1 %v4147_v14  ;;  %794 = vmatprep.subr.bf16.mxu0 %v4162_v22 }
  0x25   :  { %3395 = vmatmul.mubr.msk.f32.gmra.mrb[14].mxu0 %vm68_vm0, %v37_v18  ;;  %835 = vmatprep.subr.bf16.mxu1 %v4169_v24 }
  0x26   :  { %3403 = vmatmul.mubr.msk.f32.gmra.mrb[14].mxu1 %vm68_vm0, %v37_v18  ;;  %812 = vmatprep.mubr.bf16.mxu0 %v5903_v40 }
  0x27   :  { %795 = vmatpush1.bf16.msra.mxu0 %v4182_v32  ;;  %853 = vmatprep.mubr.bf16.mxu1 %v5903_v40 }
  0x28   :  { %836 = vmatpush1.bf16.msra.mxu1 %v4184_v33  ;;  %862 = vmatprep.subr.bf16.mxu0 %v4190_v35 }
  0x29   :  { %903 = vmatprep.subr.bf16.mxu1 %v4192_v36 }
  0xdc   :  { %v159_v59 = vpop.f32.mrb[0].mxu0 }
  0xdd   :  { %v160_v61 = vadd.f32 %v159_v59, %v4216_v54  ;;  %v161_v63 = vpop.f32.mrb[1].mxu0  ;;  %v272_v6 = vpop.f32.mrb[0].mxu1 }
  0xde   :  { %v162_v5 = vadd.f32 %v161_v63, %v4220_v58  ;;  %v274_v9 = vpop.f32.mrb[1].mxu1  ;;  %v273_v16 = vadd.f32 %v272_v6, %v4232_v15  ;;  %v406_v6 = vld [vmem:[%s5891_s3 + $0x50] sm:$0xff] }
  0xdf   :  { %v377_v8 = vmul.f32 0.5, %v160_v61  ;;  %v275_v12 = vadd.f32 %v274_v9, %v4224_v60 }
  0xe0   :  { %v378_v11 = vmul.f32 0.5, %v162_v5  ;;  %v379_v18 = vmul.f32 0.5, %v273_v16  ;;  %v410_v16 = vld [vmem:[%s5891_s3 + $0x70] sm:$0xff] }
  0xe1   :  { %3637 = vtanh.f32 %v377_v8 }
  0xe2   :  { %3639 = vtanh.f32 %v378_v11 }
  0xe3   :  { %3641 = vtanh.f32 %v275_v12 }
  0xe4   :  { %3643 = vtanh.f32 %v379_v18  ;;  %v407_v18 = vld [vmem:[%s5891_s3 + $0x58] sm:$0xff] }
  0xeb   :  { %v3638_v23 = vpop.eup %3637 }
  0xec   :  { %v3640_v26 = vpop.eup %3639  ;;  %v383_v27 = vmul.f32 0.5, %v3638_v23  ;;  %v411_v23 = vld [vmem:[%s5891_s3 + $0x78] sm:$0xff] }
  0xed   :  { %v384_v31 = vmul.f32 0.5, %v3640_v26  ;;  %v3642_v44 = vpop.eup %3641 }
  0xee   :  { %v386_v59 = vadd.f32 0.5, %v383_v27  ;;  %v3644_v50 = vpop.eup %3643 }
  0xef   :  { %v387_v61 = vadd.f32 0.5, %v384_v31  ;;  %v385_v9 = vmul.f32 0.5, %v3644_v50  ;;  %v4252_v31 = vcombine.high %v406_v6, %v410_v16  ;;  %v4272_v50 = vcombine.low %v406_v6, %v410_v16  ;;  %v423_v6 = vld [vmem:[%s5891_s3 + $0xd8] sm:$0xff] }
  0xf0   :  { %v391_v63 = vmul.f32 %v3642_v44, %v386_v59  ;;  %v4254_v44 = vcombine.high %v407_v18, %v411_v23  ;;  %v414_v59 = vld [vmem:[%s5891_s3 + $0x90] sm:$0xff]  ;;  %v427_v16 = vld [vmem:[%s5891_s3 + $0xf8] sm:$0xff] }
  0xf1   :  { %v390_v5 = vmul.f32 0.0, %v387_v61  ;;  %v388_v11 = vadd.f32 0.5, %v385_v9  ;;  %v418_v61 = vld [vmem:[%s5891_s3 + $0xb0] sm:$0xff]  ;;  %v4274_v9 = vcombine.low %v407_v18, %v411_v23  ;;  %v4306_v53 = vcombine.high %v423_v6, %v427_v16 }
  0xf2   :  { %v4298_v18 = vcombine.low %v414_v59, %v418_v61 }
  0xf3   :  { %v4235_v8 = vadd.f32 %v391_v63, %v390_v5  ;;  %v415_v63 = vld [vmem:[%s5891_s3 + $0x98] sm:$0xff]  ;;  %6211 = vst [vmem:[#allocation46_spill] sm:$0xff] %v4306_v53 }
  0xf4   :  { %v419_v5 = vld [vmem:[%s5891_s3 + $0xb8] sm:$0xff]  ;;  %6208 = vst [vmem:[#allocation43_spill] sm:$0xff] %v4298_v18 }
  0xf5   :  { %3645 = vtanh.f32 %v4235_v8  ;;  %v4300_v23 = vcombine.low %v415_v63, %v419_v5 }
  0xf7   :  { %6209 = vst [vmem:[#allocation44_spill] sm:$0xff] %v4300_v23 }
  0xff   :  { %v3646_v12 = vpop.eup %3645 }
 0x100   :  { %v394_v26 = vmul.f32 %v3646_v12, %v388_v11  ;;  %v4278_v11 = vcombine.high %v414_v59, %v418_v61  ;;  %v4280_v12 = vcombine.high %v415_v63, %v419_v5  ;;  %v431_v59 = vld [vmem:[%s5891_s3 + $0x118] sm:$0xff]  ;;  %v4324_v5 = vcombine.low %v423_v6, %v427_v16 }
 0x101   :  { %v435_v61 = vld [vmem:[%s5891_s3 + $0x138] sm:$0xff]  ;;  %v4346_v6 = vcombine.low %v430_v51, %v434_v49 }
 0x102   :  { %v4250_v27 = vpack.c.bf16 %v394_v26, %v394_v26  ;;  %6207 = vst [vmem:[#allocation42_spill] sm:$0xff] %v4280_v12  ;;  %v422_v26 = vld [vmem:[%s5891_s3 + $0xd0] sm:$0xff]  ;;  %6213 = vst [vmem:[#allocation48_spill] sm:$0xff] %v4324_v5  ;;  %v4330_v45 = vcombine.high %v431_v59, %v435_v61  ;;  %v4348_v16 = vcombine.low %v431_v59, %v435_v61 }
 0x103   :  { %v4304_v4 = vcombine.high %v422_v26, %v426_v3  ;;  %v4322_v63 = vcombine.low %v422_v26, %v426_v3  ;;  %v439_v3 = vld [vmem:[%s5891_s3 + $0x158] sm:$0xff]  ;;  %6216 = vst [vmem:[#allocation51_spill] sm:$0xff] %v4346_v6 }
 0x104   :  { %813 = vmatmul.mubr.bf16.vlgmr.msra.gmra.mrb[16].mxu0 %v4250_v27  ;;  %854 = vmatmul.mubr.bf16.vlgmr.msra.gmra.mrb[16].mxu1 %v4250_v27  ;;  %6215 = vst [vmem:[#allocation50_spill] sm:$0xff] %v4330_v45  ;;  %v443_v26 = vld [vmem:[%s5891_s3 + $0x178] sm:$0xff]  ;;  %6217 = vst [vmem:[#allocation52_spill] sm:$0xff] %v4348_v16 }
 0x105   :  { %863 = vmatpush1.bf16.msra.mxu0 %v4200_v41  ;;  %904 = vmatpush1.bf16.msra.mxu1 %v4204_v42  ;;  %6210 = vst [vmem:[#allocation45_spill] sm:$0xff] %v4304_v4  ;;  %6212 = vst [vmem:[#allocation47_spill] sm:$0xff] %v4322_v63  ;;  %v4372_v61 = vcombine.low %v439_v3, %v443_v26 }
 0x106   :  { %864 = vmatprep.subr.bf16.mxu0 %v4252_v31  ;;  %905 = vmatprep.subr.bf16.mxu1 %v4254_v44 }
 0x107   :  { %894 = vmatprep.mubr.bf16.mxu0 %v5903_v40  ;;  %935 = vmatprep.mubr.bf16.mxu1 %v5903_v40  ;;  %v4328_v40 = vcombine.high %v430_v51, %v434_v49  ;;  %v447_v49 = vld [vmem:[%s5891_s3 + $0x198] sm:$0xff]  ;;  %6221 = vst [vmem:[#allocation56_spill] sm:$0xff] %v4372_v61 }
 0x108   :  { %v451_v51 = vld [vmem:[%s5891_s3 + $0x1b8] sm:$0xff] }
 0x109   :  { %865 = vmatpush1.bf16.msra.mxu0 %v4272_v50  ;;  %906 = vmatpush1.bf16.msra.mxu1 %v4274_v9  ;;  %6214 = vst [vmem:[#allocation49_spill] sm:$0xff] %v4328_v40 }
 0x10a   :  { %866 = vmatprep.subr.bf16.mxu0 %v4278_v11  ;;  %907 = vmatprep.subr.bf16.mxu1 %v4280_v12  ;;  %v438_v12 = vld [vmem:[%s5891_s3 + $0x150] sm:$0xff] }
 0x10d   :  { %867 = vmatpush1.bf16.msra.mxu0 %v4298_v18  ;;  %908 = vmatpush1.bf16.msra.mxu1 %v4300_v23  ;;  %v442_v23 = vld [vmem:[%s5891_s3 + $0x170] sm:$0xff] }
 0x10e   :  { %868 = vmatprep.subr.bf16.mxu0 %v4304_v4  ;;  %909 = vmatprep.subr.bf16.mxu1 %v4306_v53  ;;  %v4352_v53 = vcombine.high %v438_v12, %v442_v23  ;;  %v4354_v4 = vcombine.high %v439_v3, %v443_v26  ;;  %v446_v18 = vld [vmem:[%s5891_s3 + $0x190] sm:$0xff]  ;;  %v4370_v59 = vcombine.low %v438_v12, %v442_v23  ;;  %v455_v12 = vld [vmem:[%s5891_s3 + $0x1d8] sm:$0xff] }
 0x10f   :  { %v459_v23 = vld [vmem:[%s5891_s3 + $0x1f8] sm:$0xff]  ;;  %v4396_v26 = vcombine.low %v447_v49, %v451_v51 }
 0x110   :  { %6218 = vst [vmem:[#allocation53_spill] sm:$0xff] %v4352_v53  ;;  %6219 = vst [vmem:[#allocation54_spill] sm:$0xff] %v4354_v4 }
 0x111   :  { %869 = vmatpush1.bf16.msra.mxu0 %v4322_v63  ;;  %910 = vmatpush1.bf16.msra.mxu1 %v4324_v5  ;;  %v450_v5 = vld [vmem:[%s5891_s3 + $0x1b0] sm:$0xff]  ;;  %6220 = vst [vmem:[#allocation55_spill] sm:$0xff] %v4370_v59  ;;  %6225 = vst [vmem:[#allocation60_spill] sm:$0xff] %v4396_v26 }
 0x112   :  { %870 = vmatprep.subr.bf16.mxu0 %v4328_v40  ;;  %911 = vmatprep.subr.bf16.mxu1 %v4330_v45  ;;  %v4376_v45 = vcombine.high %v446_v18, %v450_v5  ;;  %v4378_v40 = vcombine.high %v447_v49, %v451_v51  ;;  %v454_v63 = vld [vmem:[%s5891_s3 + $0x1d0] sm:$0xff]  ;;  %v4394_v3 = vcombine.low %v446_v18, %v450_v5  ;;  %v4420_v5 = vld [vmem:[%s5892_s4 + $0xc] ss:$16 sps:$4 sm:$0xff]  }
 0x113   :  { %v4415_v18 = vld [vmem:[%s5892_s4 + $0x4] ss:$16 sps:$4 sm:$0xff]   ;;  %6231 = vst [vmem:[#allocation66_spill] sm:$0xff] %v4420_v5  ;;  %v4444_v51 = vld [vmem:[%s5892_s4 + $0x2c] ss:$16 sps:$4 sm:$0xff]  }
 0x114   :  { %6222 = vst [vmem:[#allocation57_spill] sm:$0xff] %v4376_v45  ;;  %6223 = vst [vmem:[#allocation58_spill] sm:$0xff] %v4378_v40  ;;  %v4439_v49 = vld [vmem:[%s5892_s4 + $0x24] ss:$16 sps:$4 sm:$0xff]  }
 0x115   :  { %871 = vmatpush1.bf16.msra.mxu0 %v4346_v6  ;;  %912 = vmatpush1.bf16.msra.mxu1 %v4348_v16  ;;  %v458_v16 = vld [vmem:[%s5891_s3 + $0x1f0] sm:$0xff]  ;;  %6224 = vst [vmem:[#allocation59_spill] sm:$0xff] %v4394_v3  ;;  %6230 = vst [vmem:[#allocation65_spill] sm:$0xff] %v4415_v18 }
 0x116   :  { %872 = vmatprep.subr.bf16.mxu0 %v4352_v53  ;;  %913 = vmatprep.subr.bf16.mxu1 %v4354_v4  ;;  %v4400_v4 = vcombine.high %v454_v63, %v458_v16  ;;  %v4402_v53 = vcombine.high %v455_v12, %v459_v23  ;;  %v4406_v6 = vcombine.low %v454_v63, %v458_v16  ;;  %v4427_v63 = vld [vmem:[%s5892_s4] ss:$16 sps:$4 sm:$0xff]   ;;  %v4432_v16 = vld [vmem:[%s5892_s4 + $0x8] ss:$16 sps:$4 sm:$0xff]  }
 0x117   :  { %6232 = vst [vmem:[#allocation67_spill] sm:$0xff] %v4427_v63  ;;  %6233 = vst [vmem:[#allocation68_spill] sm:$0xff] %v4432_v16 }
 0x118   :  { %6226 = vst [vmem:[#allocation61_spill] sm:$0xff] %v4400_v4  ;;  %6227 = vst [vmem:[#allocation62_spill] sm:$0xff] %v4402_v53 }
 0x119   :  { %873 = vmatpush1.bf16.msra.mxu0 %v4370_v59  ;;  %914 = vmatpush1.bf16.msra.mxu1 %v4372_v61  ;;  %6228 = vst [vmem:[#allocation63_spill] sm:$0xff] %v4406_v6  ;;  %v4408_v59 = vcombine.low %v455_v12, %v459_v23  ;;  %6234 = vst [vmem:[#allocation69_spill] sm:$0xff] %v4439_v49  ;;  %v4453_v12 = vld [vmem:[%s5892_s4 + $0x20] ss:$16 sps:$4 sm:$0xff]   ;;  %v4458_v23 = vld [vmem:[%s5892_s4 + $0x28] ss:$16 sps:$4 sm:$0xff]  }
 0x11a   :  { %874 = vmatprep.subr.bf16.mxu0 %v4376_v45  ;;  %915 = vmatprep.subr.bf16.mxu1 %v4378_v40  ;;  %6235 = vst [vmem:[#allocation70_spill] sm:$0xff] %v4444_v51  ;;  %6236 = vst [vmem:[#allocation71_spill] sm:$0xff] %v4453_v12 }
 0x11b   :  { %6229 = vst [vmem:[#allocation64_spill] sm:$0xff] %v4408_v59  ;;  %6237 = vst [vmem:[#allocation72_spill] sm:$0xff] %v4458_v23 }
 0x11d   :  { %875 = vmatpush1.bf16.msra.mxu0 %v4394_v3  ;;  %916 = vmatpush1.bf16.msra.mxu1 %v4396_v26 }
 0x11e   :  { %876 = vmatprep.subr.bf16.mxu0 %v4400_v4  ;;  %917 = vmatprep.subr.bf16.mxu1 %v4402_v53 }
 0x121   :  { %877 = vmatpush1.bf16.msra.mxu0 %v4406_v6  ;;  %918 = vmatpush1.bf16.msra.mxu1 %v4408_v59  ;;  %v4598_v59 = vpop.f32.mrb[2].mxu1 }
 0x122   :  { %1136 = vmatprep.subr.bf16.mxu0 %v4415_v18  ;;  %1177 = vmatprep.subr.bf16.mxu1 %v4420_v5  ;;  %v4594_v5 = vpop.f32.mrb[2].mxu0  ;;  %v4600_v6 = vpop.f32.mrb[3].mxu1 }
 0x123   :  { %v4596_v18 = vpop.f32.mrb[3].mxu0 }
 0x124   :  { %895 = vmatmul.mubr.bf16.vlgmr.msra.gmra.mrb[20].mxu0 %v4250_v27  ;;  %936 = vmatmul.mubr.bf16.vlgmr.msra.gmra.mrb[20].mxu1 %v4250_v27  ;;  %v4465_v27 = vld [vmem:[%s5892_s4 + $0x44] ss:$16 sps:$4 sm:$0xff]   ;;  %v4616_v53 = vpop.f32.mrb[4].mxu0 }
 0x125   :  { %1137 = vmatpush1.bf16.msra.mxu0 %v4427_v63  ;;  %1178 = vmatpush1.bf16.msra.mxu1 %v4432_v16  ;;  %6238 = vst [vmem:[#allocation73_spill] sm:$0xff] %v4465_v27  ;;  %v4470_v16 = vld [vmem:[%s5892_s4 + $0x4c] ss:$16 sps:$4 sm:$0xff]   ;;  %v6240_v63 = vmov 0   ;;  %6261 = vst [vmem:[#allocation95_spill] sm:$0xff] %v4616_v53  ;;  %v4618_v4 = vpop.f32.mrb[5].mxu0 }
 0x126   :  { %1138 = vmatprep.subr.bf16.mxu0 %v4439_v49  ;;  %1179 = vmatprep.subr.bf16.mxu1 %v4444_v51  ;;  %6239 = vst [vmem:[#allocation74_spill] sm:$0xff] %v4470_v16  ;;  %v4479_v51 = vld [vmem:[%s5892_s4 + $0x40] ss:$16 sps:$4 sm:$0xff]   ;;  %v4484_v49 = vld [vmem:[%s5892_s4 + $0x48] ss:$16 sps:$4 sm:$0xff]   ;;  %6262 = vst [vmem:[#allocation96_spill] sm:$0xff] %v4618_v4 }
 0x127   :  { %1168 = vmatprep.mubr.bf16.mxu0 %v6240_v63  ;;  %1209 = vmatprep.mubr.bf16.mxu1 %v6240_v63  ;;  %6241 = vst [vmem:[#allocation75_spill] sm:$0xff] %v4479_v51  ;;  %6242 = vst [vmem:[#allocation76_spill] sm:$0xff] %v4484_v49  ;;  %v4626_v26 = vpop.f32.mrb[6].mxu0 }
 0x128   :  { %6265 = vst [vmem:[#allocation99_spill] sm:$0xff] %v4626_v26 }
 0x129   :  { %1139 = vmatpush1.bf16.msra.mxu0 %v4453_v12  ;;  %1180 = vmatpush1.bf16.msra.mxu1 %v4458_v23  ;;  %v4491_v12 = vld [vmem:[%s5892_s4 + $0x64] ss:$16 sps:$4 sm:$0xff]   ;;  %v4496_v23 = vld [vmem:[%s5892_s4 + $0x6c] ss:$16 sps:$4 sm:$0xff]  }
 0x12a   :  { %1140 = vmatprep.subr.bf16.mxu0 %v4465_v27  ;;  %1181 = vmatprep.subr.bf16.mxu1 %v4470_v16  ;;  %6243 = vst [vmem:[#allocation77_spill] sm:$0xff] %v4491_v12  ;;  %6244 = vst [vmem:[#allocation78_spill] sm:$0xff] %v4496_v23  ;;  %v4503_v27 = vld [vmem:[%s5892_s4 + $0x60] ss:$16 sps:$4 sm:$0xff]   ;;  %v4508_v16 = vld [vmem:[%s5892_s4 + $0x68] ss:$16 sps:$4 sm:$0xff]  }
 0x12b   :  { %6245 = vst [vmem:[#allocation79_spill] sm:$0xff] %v4503_v27  ;;  %6246 = vst [vmem:[#allocation80_spill] sm:$0xff] %v4508_v16 }
 0x12d   :  { %1141 = vmatpush1.bf16.msra.mxu0 %v4479_v51  ;;  %1182 = vmatpush1.bf16.msra.mxu1 %v4484_v49  ;;  %v4515_v51 = vld [vmem:[%s5892_s4 + $0x84] ss:$16 sps:$4 sm:$0xff]   ;;  %v4520_v49 = vld [vmem:[%s5892_s4 + $0x8c] ss:$16 sps:$4 sm:$0xff]  }
 0x12e   :  { %1142 = vmatprep.subr.bf16.mxu0 %v4491_v12  ;;  %1183 = vmatprep.subr.bf16.mxu1 %v4496_v23  ;;  %6247 = vst [vmem:[#allocation81_spill] sm:$0xff] %v4515_v51  ;;  %6248 = vst [vmem:[#allocation82_spill] sm:$0xff] %v4520_v49  ;;  %v4527_v12 = vld [vmem:[%s5892_s4 + $0x80] ss:$16 sps:$4 sm:$0xff]   ;;  %v4532_v23 = vld [vmem:[%s5892_s4 + $0x88] ss:$16 sps:$4 sm:$0xff]  }
 0x12f   :  { %6249 = vst [vmem:[#allocation83_spill] sm:$0xff] %v4527_v12  ;;  %6250 = vst [vmem:[#allocation84_spill] sm:$0xff] %v4532_v23 }
 0x131   :  { %1143 = vmatpush1.bf16.msra.mxu0 %v4503_v27  ;;  %1184 = vmatpush1.bf16.msra.mxu1 %v4508_v16  ;;  %v4539_v27 = vld [vmem:[%s5892_s4 + $0xa4] ss:$16 sps:$4 sm:$0xff]   ;;  %v4544_v16 = vld [vmem:[%s5892_s4 + $0xac] ss:$16 sps:$4 sm:$0xff]  }
 0x132   :  { %1144 = vmatprep.subr.bf16.mxu0 %v4515_v51  ;;  %1185 = vmatprep.subr.bf16.mxu1 %v4520_v49  ;;  %6251 = vst [vmem:[#allocation85_spill] sm:$0xff] %v4539_v27  ;;  %6252 = vst [vmem:[#allocation86_spill] sm:$0xff] %v4544_v16  ;;  %v4551_v51 = vld [vmem:[%s5892_s4 + $0xa0] ss:$16 sps:$4 sm:$0xff]   ;;  %v4556_v49 = vld [vmem:[%s5892_s4 + $0xa8] ss:$16 sps:$4 sm:$0xff]  }
 0x133   :  { %6253 = vst [vmem:[#allocation87_spill] sm:$0xff] %v4551_v51  ;;  %6254 = vst [vmem:[#allocation88_spill] sm:$0xff] %v4556_v49 }
 0x135   :  { %1145 = vmatpush1.bf16.msra.mxu0 %v4527_v12  ;;  %1186 = vmatpush1.bf16.msra.mxu1 %v4532_v23  ;;  %v4563_v12 = vld [vmem:[%s5892_s4 + $0xc4] ss:$16 sps:$4 sm:$0xff]   ;;  %v4568_v23 = vld [vmem:[%s5892_s4 + $0xcc] ss:$16 sps:$4 sm:$0xff]  }
 0x136   :  { %1146 = vmatprep.subr.bf16.mxu0 %v4539_v27  ;;  %1187 = vmatprep.subr.bf16.mxu1 %v4544_v16  ;;  %6255 = vst [vmem:[#allocation89_spill] sm:$0xff] %v4563_v12  ;;  %6256 = vst [vmem:[#allocation90_spill] sm:$0xff] %v4568_v23  ;;  %v4575_v27 = vld [vmem:[%s5892_s4 + $0xc0] ss:$16 sps:$4 sm:$0xff]   ;;  %v4580_v16 = vld [vmem:[%s5892_s4 + $0xc8] ss:$16 sps:$4 sm:$0xff]  }
 0x137   :  { %6257 = vst [vmem:[#allocation91_spill] sm:$0xff] %v4575_v27  ;;  %6258 = vst [vmem:[#allocation92_spill] sm:$0xff] %v4580_v16 }
 0x139   :  { %1147 = vmatpush1.bf16.msra.mxu0 %v4551_v51  ;;  %1188 = vmatpush1.bf16.msra.mxu1 %v4556_v49  ;;  %v4587_v51 = vld [vmem:[%s5892_s4 + $0xe4] ss:$16 sps:$4 sm:$0xff]   ;;  %v4592_v49 = vld [vmem:[%s5892_s4 + $0xec] ss:$16 sps:$4 sm:$0xff]  }
 0x13a   :  { %1148 = vmatprep.subr.bf16.mxu0 %v4563_v12  ;;  %1189 = vmatprep.subr.bf16.mxu1 %v4568_v23  ;;  %6259 = vst [vmem:[#allocation93_spill] sm:$0xff] %v4587_v51  ;;  %6260 = vst [vmem:[#allocation94_spill] sm:$0xff] %v4592_v49  ;;  %v4607_v23 = vld [vmem:[%s5892_s4 + $0xe0] ss:$16 sps:$4 sm:$0xff]   ;;  %v4612_v12 = vld [vmem:[%s5892_s4 + $0xe8] ss:$16 sps:$4 sm:$0xff]  }
 0x13d   :  { %1149 = vmatpush1.bf16.msra.mxu0 %v4575_v27  ;;  %1190 = vmatpush1.bf16.msra.mxu1 %v4580_v16  ;;  %v4620_v27 = vpop.f32.mrb[4].mxu1 }
 0x13e   :  { %1150 = vmatprep.subr.bf16.mxu0 %v4587_v51  ;;  %1191 = vmatprep.subr.bf16.mxu1 %v4592_v49  ;;  %6263 = vst [vmem:[#allocation97_spill] sm:$0xff] %v4620_v27  ;;  %v4622_v16 = vpop.f32.mrb[5].mxu1  ;;  %v4630_v51 = vpop.f32.mrb[7].mxu0 }
 0x13f   :  { %6264 = vst [vmem:[#allocation98_spill] sm:$0xff] %v4622_v16  ;;  %6266 = vst [vmem:[#allocation100_spill] sm:$0xff] %v4630_v51  ;;  %v4632_v49 = vpop.f32.mrb[6].mxu1  ;;  %v4640_v16 = vpop.f32.mrb[8].mxu0 }
 0x140   :  { %6267 = vst [vmem:[#allocation101_spill] sm:$0xff] %v4632_v49  ;;  %v4636_v4 = vpop.f32.mrb[7].mxu1  ;;  %6269 = vst [vmem:[#allocation103_spill] sm:$0xff] %v4640_v16  ;;  %v4644_v26 = vpop.f32.mrb[9].mxu0 }
 0x141   :  { %1151 = vmatpush1.bf16.msra.mxu0 %v4607_v23  ;;  %1192 = vmatpush1.bf16.msra.mxu1 %v4612_v12  ;;  %6268 = vst [vmem:[#allocation102_spill] sm:$0xff] %v4636_v4  ;;  %6270 = vst [vmem:[#allocation104_spill] sm:$0xff] %v4644_v26  ;;  %v4646_v51 = vpop.f32.mrb[8].mxu1  ;;  %v4654_v4 = vpop.f32.mrb[10].mxu0 }
 0x142   :  { %1275 = vmatprep.subr.bf16.mxu0 %v3952_v17  ;;  %1316 = vmatprep.subr.bf16.mxu1 %v3957_v19  ;;  %6271 = vst [vmem:[#allocation105_spill] sm:$0xff] %v4646_v51  ;;  %v4650_v49 = vpop.f32.mrb[9].mxu1  ;;  %6273 = vst [vmem:[#allocation107_spill] sm:$0xff] %v4654_v4  ;;  %v4658_v16 = vpop.f32.mrb[11].mxu0 }
 0x143   :  { %6272 = vst [vmem:[#allocation106_spill] sm:$0xff] %v4650_v49  ;;  %6274 = vst [vmem:[#allocation108_spill] sm:$0xff] %v4658_v16  ;;  %v4660_v26 = vpop.f32.mrb[10].mxu1  ;;  %v4666_v49 = vpop.f32.mrb[12].mxu0 }
 0x144   :  { %1169 = vmatmul.mubr.bf16.vlgmr.msra.gmra.mrb[24].mxu0 %v6240_v63  ;;  %1210 = vmatmul.mubr.bf16.vlgmr.msra.gmra.mrb[24].mxu1 %v6240_v63  ;;  %6275 = vst [vmem:[#allocation109_spill] sm:$0xff] %v4660_v26  ;;  %v4662_v51 = vpop.f32.mrb[11].mxu1  ;;  %6277 = vst [vmem:[#allocation111_spill] sm:$0xff] %v4666_v49  ;;  %v4670_v4 = vpop.f32.mrb[13].mxu0 }
 0x145   :  { %1276 = vmatpush1.bf16.msra.mxu0 %v3959_v20  ;;  %1317 = vmatpush1.bf16.msra.mxu1 %v3961_v21  ;;  %6276 = vst [vmem:[#allocation110_spill] sm:$0xff] %v4662_v51  ;;  %6278 = vst [vmem:[#allocation112_spill] sm:$0xff] %v4670_v4  ;;  %v4672_v27 = vpop.f32.mrb[12].mxu1  ;;  %v4678_v51 = vpop.f32.mrb[14].mxu0 }
 0x146   :  { %1277 = vmatprep.subr.bf16.mxu0 %v3976_v25  ;;  %1318 = vmatprep.subr.bf16.mxu1 %v3984_v28  ;;  %6279 = vst [vmem:[#allocation113_spill] sm:$0xff] %v4672_v27  ;;  %v4674_v53 = vpop.f32.mrb[13].mxu1  ;;  %6281 = vst [vmem:[#allocation115_spill] sm:$0xff] %v4678_v51  ;;  %v4682_v49 = vpop.f32.mrb[15].mxu0  ;;  %v281_v51 = vadd.f32 %v4600_v6, %v4224_v60 }
 0x147   :  { %1307 = vmatprep.mubr.bf16.mxu0 %v6240_v63  ;;  %1348 = vmatprep.mubr.bf16.mxu1 %v6240_v63  ;;  %6280 = vst [vmem:[#allocation114_spill] sm:$0xff] %v4674_v53  ;;  %6282 = vst [vmem:[#allocation116_spill] sm:$0xff] %v4682_v49  ;;  %v4684_v16 = vpop.f32.mrb[14].mxu1  ;;  %v279_v49 = vadd.f32 %v4598_v59, %v4232_v15 }
 0x148   :  { %6283 = vst [vmem:[#allocation117_spill] sm:$0xff] %v4684_v16  ;;  %v4686_v26 = vpop.f32.mrb[15].mxu1  ;;  %v168_v16 = vadd.f32 %v4596_v18, %v4220_v58 }
 0x149   :  { %1278 = vmatpush1.bf16.msra.mxu0 %v3986_v29  ;;  %1319 = vmatpush1.bf16.msra.mxu1 %v3988_v30  ;;  %6284 = vst [vmem:[#allocation118_spill] sm:$0xff] %v4686_v26  ;;  %v166_v26 = vadd.f32 %v4594_v5, %v4216_v54 }
 0x14a   :  { %1279 = vmatprep.subr.bf16.mxu0 %v4005_v34  ;;  %1320 = vmatprep.subr.bf16.mxu1 %v4015_v37 }
 0x14d   :  { %1280 = vmatpush1.bf16.msra.mxu0 %v4017_v38  ;;  %1321 = vmatpush1.bf16.msra.mxu1 %v4019_v39 }
 0x14e   :  { %1281 = vmatprep.subr.bf16.mxu0 %v4036_v43  ;;  %1322 = vmatprep.subr.bf16.mxu1 %v4046_v46 }
 0x151   :  { %1282 = vmatpush1.bf16.msra.mxu0 %v4048_v47  ;;  %1323 = vmatpush1.bf16.msra.mxu1 %v4050_v48 }
 0x152   :  { %1283 = vmatprep.subr.bf16.mxu0 %v4067_v52  ;;  %1324 = vmatprep.subr.bf16.mxu1 %v4077_v55 }
 0x155   :  { %1284 = vmatpush1.bf16.msra.mxu0 %v4079_v56  ;;  %1325 = vmatpush1.bf16.msra.mxu1 %v4081_v57 }
 0x156   :  { %1285 = vmatprep.subr.bf16.mxu0 %v4101_v62  ;;  %1326 = vmatprep.subr.bf16.mxu1 %v4110_v1 }
 0x159   :  { %1286 = vmatpush1.bf16.msra.mxu0 %v4106_v0  ;;  %1327 = vmatpush1.bf16.msra.mxu1 %v4112_v2 }
 0x15a   :  { %1287 = vmatprep.subr.bf16.mxu0 %v4125_v7  ;;  %1328 = vmatprep.subr.bf16.mxu1 %v4135_v10 }
 0x15d   :  { %1288 = vmatpush1.bf16.msra.mxu0 %v4145_v13  ;;  %1329 = vmatpush1.bf16.msra.mxu1 %v4147_v14 }
 0x15e   :  { %1289 = vmatprep.subr.bf16.mxu0 %v4162_v22  ;;  %1330 = vmatprep.subr.bf16.mxu1 %v4169_v24 }
 0x161   :  { %1290 = vmatpush1.bf16.msra.mxu0 %v4182_v32  ;;  %1331 = vmatpush1.bf16.msra.mxu1 %v4184_v33 }
 0x162   :  { %1357 = vmatprep.subr.bf16.mxu0 %v4190_v35  ;;  %1398 = vmatprep.subr.bf16.mxu1 %v4192_v36 }
 0x1d7   :  { %v814_v53 = vpop.f32.mrb[16].mxu0  ;;  %v855_v4 = vpop.f32.mrb[16].mxu1 }
 0x1d8   :  { %v1225_v27 = vadd.f32 %v814_v53, %v166_v26  ;;  %v1227_v33 = vadd.f32 %v855_v4, %v279_v49  ;;  %v816_v32 = vpop.f32.mrb[17].mxu0  ;;  %v857_v35 = vpop.f32.mrb[17].mxu1 }
 0x1d9   :  { %v1226_v24 = vadd.f32 %v816_v32, %v168_v16  ;;  %v1228_v36 = vadd.f32 %v857_v35, %v281_v51  ;;  %v818_v22 = vpop.f32.mrb[18].mxu0  ;;  %v859_v14 = vpop.f32.mrb[18].mxu1 }
 0x1da   :  { %v1237_v5 = vmul.f32 0.5, %v1225_v27  ;;  %v819_v54 = vpop.f32.mrb[19].mxu0  ;;  %v860_v13 = vpop.f32.mrb[19].mxu1  ;;  %v1239_v18 = vmul.f32 0.5, %v1227_v33 }
 0x1db   :  { %v1238_v59 = vmul.f32 0.5, %v1226_v24 }
 0x1dc   :  { %3647 = vtanh.f32 %v1237_v5 }
 0x1dd   :  { %3649 = vtanh.f32 %v1238_v59  ;;  %v6286_v59 = vld [vmem:[#allocation43_spill] sm:$0xff] }
 0x1de   :  { %3651 = vtanh.f32 %v1228_v36 }
 0x1df   :  { %3653 = vtanh.f32 %v1239_v18  ;;  %v6287_v18 = vld [vmem:[#allocation44_spill] sm:$0xff] }
 0x1e6   :  { %v3648_v58 = vpop.eup %3647 }
 0x1e7   :  { %v1243_v6 = vmul.f32 0.5, %v3648_v58  ;;  %v3650_v60 = vpop.eup %3649 }
 0x1e8   :  { %v1244_v53 = vmul.f32 0.5, %v3650_v60  ;;  %v3652_v4 = vpop.eup %3651 }
 0x1e9   :  { %v1246_v15 = vadd.f32 0.5, %v1243_v6  ;;  %v3654_v13 = vpop.eup %3653  ;;  %v6288_v6 = vld [vmem:[#allocation45_spill] sm:$0xff] }
 0x1ea   :  { %v1247_v26 = vadd.f32 0.5, %v1244_v53  ;;  %v1245_v24 = vmul.f32 0.5, %v3654_v13  ;;  %v6289_v53 = vld [vmem:[#allocation46_spill] sm:$0xff]  ;;  %v6294_v13 = vld [vmem:[#allocation51_spill] sm:$0xff] }
 0x1eb   :  { %v1251_v32 = vmul.f32 %v3652_v4, %v1246_v15  ;;  %v6290_v4 = vld [vmem:[#allocation47_spill] sm:$0xff] }
 0x1ec   :  { %v1250_v22 = vmul.f32 %v1247_v26, %v4235_v8  ;;  %v1248_v49 = vadd.f32 0.5, %v1245_v24  ;;  %v6285_v8 = vld [vmem:[#allocation42_spill] sm:$0xff]  ;;  %v6291_v26 = vld [vmem:[#allocation48_spill] sm:$0xff] }
 0x1ed   :  { %v6295_v24 = vld [vmem:[#allocation52_spill] sm:$0xff] }
 0x1ee   :  { %v4713_v14 = vadd.f32 %v1251_v32, %v1250_v22  ;;  %v6292_v32 = vld [vmem:[#allocation49_spill] sm:$0xff]  ;;  %v6293_v22 = vld [vmem:[#allocation50_spill] sm:$0xff] }
 0x1f0   :  { %3655 = vtanh.f32 %v4713_v14 }
 0x1f7   :  { %v896_v35 = vpop.f32.mrb[20].mxu0  ;;  %v937_v36 = vpop.f32.mrb[20].mxu1 }
 0x1f8   :  { %v898_v33 = vpop.f32.mrb[21].mxu0  ;;  %v939_v54 = vpop.f32.mrb[21].mxu1 }
 0x1f9   :  { %v900_v58 = vpop.f32.mrb[22].mxu0  ;;  %v941_v16 = vpop.f32.mrb[22].mxu1 }
 0x1fa   :  { %v901_v51 = vpop.f32.mrb[23].mxu0  ;;  %v942_v60 = vpop.f32.mrb[23].mxu1  ;;  %v6296_v58 = vld [vmem:[#allocation53_spill] sm:$0xff]  ;;  %v6297_v16 = vld [vmem:[#allocation54_spill] sm:$0xff] }
 0x1fb   :  { %v3656_v27 = vpop.eup %3655  ;;  %v6298_v51 = vld [vmem:[#allocation55_spill] sm:$0xff]  ;;  %v6299_v60 = vld [vmem:[#allocation37_spill] sm:$0xff] }
 0x1fc   :  { %v1254_v5 = vmul.f32 %v3656_v27, %v1248_v49  ;;  %v351_v49 = vld [vmem:[%s5894_s5] sm:$0xf]  ;;  %v6300_v27 = vsub.s32 0, %v6299_v60 }
 0x1fe   :  { %v1273_v15 = vpack.c.bf16 %v1254_v5, %v1254_v5  ;;  %v4745_v5 = vrot.slane %v351_v49, %v6300_v27  ;;  %v6304_v27 = vld [vmem:[#allocation60_spill] sm:$0xff] }
 0x200   :  { %1308 = vmatmul.mubr.bf16.vlgmr.msra.gmra.mrb[28].mxu0 %v1273_v15  ;;  %1349 = vmatmul.mubr.bf16.vlgmr.msra.gmra.mrb[28].mxu1 %v1273_v15  ;;  %6301 = vst [vmem:[#allocation42_spill] sm:$0xff] %v4745_v5 }
 0x201   :  { %1358 = vmatpush1.bf16.msra.mxu0 %v4200_v41  ;;  %1399 = vmatpush1.bf16.msra.mxu1 %v4204_v42 }
 0x202   :  { %1359 = vmatprep.subr.bf16.mxu0 %v4252_v31  ;;  %1400 = vmatprep.subr.bf16.mxu1 %v4254_v44 }
 0x203   :  { %1389 = vmatprep.mubr.bf16.mxu0 %v6240_v63  ;;  %1430 = vmatprep.mubr.bf16.mxu1 %v6240_v63 }
 0x205   :  { %1360 = vmatpush1.bf16.msra.mxu0 %v4272_v50  ;;  %1401 = vmatpush1.bf16.msra.mxu1 %v4274_v9 }
 0x206   :  { %1361 = vmatprep.subr.bf16.mxu0 %v4278_v11  ;;  %1402 = vmatprep.subr.bf16.mxu1 %v6285_v8 }
 0x209   :  { %1362 = vmatpush1.bf16.msra.mxu0 %v6286_v59  ;;  %1403 = vmatpush1.bf16.msra.mxu1 %v6287_v18  ;;  %v6307_v59 = vld [vmem:[#allocation61_spill] sm:$0xff] }
 0x20a   :  { %1363 = vmatprep.subr.bf16.mxu0 %v6288_v6  ;;  %1404 = vmatprep.subr.bf16.mxu1 %v6289_v53  ;;  %v6305_v6 = vsub.s32 3, %v6299_v60 }
 0x20c   :  { %v4758_v18 = vrot.slane %v351_v49, %v6305_v6  ;;  %v6312_v6 = vld [vmem:[#allocation66_spill] sm:$0xff] }
 0x20d   :  { %1364 = vmatpush1.bf16.msra.mxu0 %v6290_v4  ;;  %1405 = vmatpush1.bf16.msra.mxu1 %v6291_v26 }
 0x20e   :  { %1365 = vmatprep.subr.bf16.mxu0 %v6292_v32  ;;  %1406 = vmatprep.subr.bf16.mxu1 %v6293_v22  ;;  %6306 = vst [vmem:[#allocation119_spill] sm:$0xff] %v4758_v18 }
 0x211   :  { %1366 = vmatpush1.bf16.msra.mxu0 %v6294_v13  ;;  %1407 = vmatpush1.bf16.msra.mxu1 %v6295_v24 }
 0x212   :  { %1367 = vmatprep.subr.bf16.mxu0 %v6296_v58  ;;  %1408 = vmatprep.subr.bf16.mxu1 %v6297_v16  ;;  %v6302_v16 = vsub.s32 1, %v6299_v60 }
 0x214   :  { %v4751_v13 = vrot.slane %v351_v49, %v6302_v16 }
 0x215   :  { %1368 = vmatpush1.bf16.msra.mxu0 %v6298_v51  ;;  %1409 = vmatpush1.bf16.msra.mxu1 %v4372_v61 }
 0x216   :  { %1369 = vmatprep.subr.bf16.mxu0 %v4376_v45  ;;  %1410 = vmatprep.subr.bf16.mxu1 %v4378_v40  ;;  %6303 = vst [vmem:[#allocation37_spill] sm:$0xff] %v4751_v13 }
 0x217   :  { %v1170_v24 = vpop.f32.mrb[24].mxu0  ;;  %v1211_v58 = vpop.f32.mrb[24].mxu1 }
 0x218   :  { %v1229_v22 = vadd.f32 %v1170_v24, %v896_v35  ;;  %v1231_v32 = vadd.f32 %v1211_v58, %v937_v36  ;;  %v1172_v26 = vpop.f32.mrb[25].mxu0  ;;  %v1213_v51 = vpop.f32.mrb[25].mxu1  ;;  %v6308_v35 = vld [vmem:[#allocation62_spill] sm:$0xff]  ;;  %v6309_v24 = vld [vmem:[#allocation63_spill] sm:$0xff]  ;;  %v6313_v58 = vsub.s32 2, %v6299_v60  ;;  %v6320_v60 = vld [vmem:[#allocation72_spill] sm:$0xff] }
 0x219   :  { %v1230_v4 = vadd.f32 %v1172_v26, %v898_v33  ;;  %v1232_v61 = vadd.f32 %v1213_v51, %v939_v54  ;;  %1370 = vmatpush1.bf16.msra.mxu0 %v4394_v3  ;;  %1411 = vmatpush1.bf16.msra.mxu1 %v6304_v27  ;;  %v1174_v53 = vpop.f32.mrb[26].mxu0  ;;  %v1215_v45 = vpop.f32.mrb[26].mxu1 }
 0x21a   :  { %v1233_v40 = vadd.f32 %v1229_v22, %v4745_v5  ;;  %v1175_v16 = vpop.f32.mrb[27].mxu0  ;;  %1371 = vmatprep.subr.bf16.mxu0 %v6307_v59  ;;  %1412 = vmatprep.subr.bf16.mxu1 %v6308_v35  ;;  %v1216_v36 = vpop.f32.mrb[27].mxu1  ;;  %v6310_v53 = vld [vmem:[#allocation64_spill] sm:$0xff]  ;;  %v6311_v22 = vld [vmem:[#allocation65_spill] sm:$0xff]  ;;  %v4770_v51 = vrot.slane %v351_v49, %v6313_v58  ;;  %v6319_v49 = vld [vmem:[#allocation71_spill] sm:$0xff] }
 0x21b   :  { %v1234_v33 = vadd.f32 %v1230_v4, %v4751_v13  ;;  %v1236_v45 = vadd.f32 %v1232_v61, %v4758_v18  ;;  %v6316_v4 = vld [vmem:[#allocation68_spill] sm:$0xff]  ;;  %v6317_v16 = vld [vmem:[#allocation69_spill] sm:$0xff]  ;;  %v6318_v36 = vld [vmem:[#allocation70_spill] sm:$0xff] }
 0x21c   :  { %v1255_v54 = vmul.f32 0.5, %v1233_v40  ;;  %6314 = vst [vmem:[#allocation65_spill] sm:$0xff] %v4770_v51  ;;  %v6315_v40 = vld [vmem:[#allocation67_spill] sm:$0xff]  ;;  %v1235_v61 = vadd.f32 %v1231_v32, %v4770_v51  ;;  %v6325_v51 = vld [vmem:[#allocation77_spill] sm:$0xff] }
 0x21d   :  { %v1256_v26 = vmul.f32 0.5, %v1234_v33  ;;  %1372 = vmatpush1.bf16.msra.mxu0 %v6309_v24  ;;  %1413 = vmatpush1.bf16.msra.mxu1 %v6310_v53  ;;  %v6322_v33 = vld [vmem:[#allocation74_spill] sm:$0xff]  ;;  %v6323_v58 = vld [vmem:[#allocation75_spill] sm:$0xff] }
 0x21e   :  { %3657 = vtanh.f32 %v1255_v54  ;;  %1439 = vmatprep.subr.bf16.mxu0 %v6311_v22  ;;  %1480 = vmatprep.subr.bf16.mxu1 %v6312_v6  ;;  %v1257_v54 = vmul.f32 0.5, %v1235_v61  ;;  %v6327_v18 = vld [vmem:[#allocation79_spill] sm:$0xff]  ;;  %v6328_v61 = vld [vmem:[#allocation80_spill] sm:$0xff] }
 0x21f   :  { %3659 = vtanh.f32 %v1256_v26 }
 0x220   :  { %1390 = vmatmul.mubr.bf16.vlgmr.msra.gmra.mrb[32].mxu0 %v1273_v15  ;;  %1431 = vmatmul.mubr.bf16.vlgmr.msra.gmra.mrb[32].mxu1 %v1273_v15  ;;  %3661 = vtanh.f32 %v1236_v45  ;;  %v6321_v15 = vld [vmem:[#allocation73_spill] sm:$0xff] }
 0x221   :  { %1440 = vmatpush1.bf16.msra.mxu0 %v6315_v40  ;;  %1481 = vmatpush1.bf16.msra.mxu1 %v6316_v4  ;;  %3663 = vtanh.f32 %v1257_v54  ;;  %v6334_v54 = vld [vmem:[#allocation85_spill] sm:$0xff] }
 0x222   :  { %1441 = vmatprep.subr.bf16.mxu0 %v6317_v16  ;;  %1482 = vmatprep.subr.bf16.mxu1 %v6318_v36  ;;  %v6324_v36 = vld [vmem:[#allocation76_spill] sm:$0xff]  ;;  %v6326_v16 = vld [vmem:[#allocation78_spill] sm:$0xff] }
 0x223   :  { %1471 = vmatprep.mubr.bf16.mxu0 %v6240_v63  ;;  %1512 = vmatprep.mubr.bf16.mxu1 %v6240_v63 }
 0x225   :  { %1442 = vmatpush1.bf16.msra.mxu0 %v6319_v49  ;;  %1483 = vmatpush1.bf16.msra.mxu1 %v6320_v60 }
 0x226   :  { %1443 = vmatprep.subr.bf16.mxu0 %v6321_v15  ;;  %1484 = vmatprep.subr.bf16.mxu1 %v6322_v33 }
 0x228   :  { %v3658_v26 = vpop.eup %3657 }
 0x229   :  { %v1261_v45 = vmul.f32 0.5, %v3658_v26  ;;  %1444 = vmatpush1.bf16.msra.mxu0 %v6323_v58  ;;  %1485 = vmatpush1.bf16.msra.mxu1 %v6324_v36  ;;  %v3660_v32 = vpop.eup %3659  ;;  %v6329_v26 = vld [vmem:[#allocation81_spill] sm:$0xff]  ;;  %v6330_v58 = vld [vmem:[#allocation82_spill] sm:$0xff] }
 0x22a   :  { %1445 = vmatprep.subr.bf16.mxu0 %v6325_v51  ;;  %1486 = vmatprep.subr.bf16.mxu1 %v6326_v16  ;;  %v1262_v49 = vmul.f32 0.5, %v3660_v32  ;;  %v3662_v60 = vpop.eup %3661  ;;  %v6332_v51 = vld [vmem:[#allocation83_spill] sm:$0xff]  ;;  %v6333_v16 = vld [vmem:[#allocation84_spill] sm:$0xff]  ;;  %v6338_v32 = vld [vmem:[#allocation89_spill] sm:$0xff] }
 0x22b   :  { %v1264_v4 = vadd.f32 0.5, %v1261_v45  ;;  %v6335_v45 = vld [vmem:[#allocation86_spill] sm:$0xff] }
 0x22c   :  { %v1265_v40 = vadd.f32 0.5, %v1262_v49  ;;  %v6336_v49 = vld [vmem:[#allocation87_spill] sm:$0xff] }
 0x22d   :  { %v1269_v15 = vmul.f32 %v3662_v60, %v1264_v4  ;;  %1446 = vmatpush1.bf16.msra.mxu0 %v6327_v18  ;;  %1487 = vmatpush1.bf16.msra.mxu1 %v6328_v61  ;;  %v3664_v4 = vpop.eup %3663  ;;  %v6337_v60 = vld [vmem:[#allocation88_spill] sm:$0xff] }
 0x22e   :  { %1447 = vmatprep.subr.bf16.mxu0 %v6329_v26  ;;  %1488 = vmatprep.subr.bf16.mxu1 %v6330_v58  ;;  %v1268_v36 = vmul.f32 0.0, %v1265_v40  ;;  %v6339_v40 = vld [vmem:[#allocation90_spill] sm:$0xff] }
 0x230   :  { %v4791_v33 = vadd.f32 %v1269_v15, %v1268_v36  ;;  %v1263_v36 = vmul.f32 0.5, %v3664_v4  ;;  %v6340_v15 = vld [vmem:[#allocation91_spill] sm:$0xff] }
 0x231   :  { %1448 = vmatpush1.bf16.msra.mxu0 %v6332_v51  ;;  %1489 = vmatpush1.bf16.msra.mxu1 %v6333_v16  ;;  %v6341_v51 = vld [vmem:[#allocation92_spill] sm:$0xff]  ;;  %v6342_v16 = vld [vmem:[#allocation93_spill] sm:$0xff] }
 0x232   :  { %6331 = vst [vmem:[#allocation66_spill] sm:$0xff] %v4791_v33  ;;  %1449 = vmatprep.subr.bf16.mxu0 %v6334_v54  ;;  %1490 = vmatprep.subr.bf16.mxu1 %v6335_v45  ;;  %3665 = vtanh.f32 %v4791_v33  ;;  %v6343_v54 = vld [vmem:[#allocation94_spill] sm:$0xff]  ;;  %v1266_v45 = vadd.f32 0.5, %v1263_v36  ;;  %v6347_v36 = vld [vmem:[#allocation32_spill] sm:$0xff] }
 0x235   :  { %1450 = vmatpush1.bf16.msra.mxu0 %v6336_v49  ;;  %1491 = vmatpush1.bf16.msra.mxu1 %v6337_v60 }
 0x236   :  { %1451 = vmatprep.subr.bf16.mxu0 %v6338_v32  ;;  %1492 = vmatprep.subr.bf16.mxu1 %v6339_v40 }
 0x239   :  { %1452 = vmatpush1.bf16.msra.mxu0 %v6340_v15  ;;  %1493 = vmatpush1.bf16.msra.mxu1 %v6341_v51 }
 0x23a   :  { %1453 = vmatprep.subr.bf16.mxu0 %v6342_v16  ;;  %1494 = vmatprep.subr.bf16.mxu1 %v6343_v54 }
 0x23c   :  { %v3666_v33 = vpop.eup %3665 }
 0x23d   :  { %1454 = vmatpush1.bf16.msra.mxu0 %v4607_v23  ;;  %1495 = vmatpush1.bf16.msra.mxu1 %v4612_v12  ;;  %v1272_v60 = vmul.f32 %v3666_v33, %v1266_v45  ;;  %v6344_v33 = vld [vmem:[#allocation29_spill] sm:$0xff]  ;;  %v6345_v45 = vld [vmem:[#allocation30_spill] sm:$0xff] }
 0x23e   :  { %1578 = vmatprep.subr.bf16.mxu0 %v3952_v17  ;;  %1619 = vmatprep.subr.bf16.mxu1 %v3957_v19 }
 0x23f   :  { %v1274_v4 = vpack.c.bf16 %v1272_v60, %v1272_v60  ;;  %v6346_v60 = vld [vmem:[#allocation31_spill] sm:$0xff] }
 0x241   :  { %1472 = vmatmul.mubr.bf16.vlgmr.msra.gmra.mrb[36].mxu0 %v1274_v4  ;;  %1513 = vmatmul.mubr.bf16.vlgmr.msra.gmra.mrb[36].mxu1 %v1274_v4  ;;  %v6348_v4 = vld [vmem:[#allocation33_spill] sm:$0xff] }
 0x242   :  { %1579 = vmatpush1.bf16.msra.mxu0 %v3959_v20  ;;  %1620 = vmatpush1.bf16.msra.mxu1 %v3961_v21 }
 0x243   :  { %1580 = vmatprep.subr.bf16.mxu0 %v3976_v25  ;;  %1621 = vmatprep.subr.bf16.mxu1 %v3984_v28 }
 0x244   :  { %1610 = vmatprep.mubr.bf16.mxu0 %v6240_v63  ;;  %1651 = vmatprep.mubr.bf16.mxu1 %v6240_v63 }
 0x246   :  { %1581 = vmatpush1.bf16.msra.mxu0 %v3986_v29  ;;  %1622 = vmatpush1.bf16.msra.mxu1 %v3988_v30 }
 0x247   :  { %1582 = vmatprep.subr.bf16.mxu0 %v4005_v34  ;;  %1623 = vmatprep.subr.bf16.mxu1 %v4015_v37 }
 0x24a   :  { %1583 = vmatpush1.bf16.msra.mxu0 %v4017_v38  ;;  %1624 = vmatpush1.bf16.msra.mxu1 %v4019_v39 }
 0x24b   :  { %1584 = vmatprep.subr.bf16.mxu0 %v4036_v43  ;;  %1625 = vmatprep.subr.bf16.mxu1 %v4046_v46 }
 0x24e   :  { %1585 = vmatpush1.bf16.msra.mxu0 %v4048_v47  ;;  %1626 = vmatpush1.bf16.msra.mxu1 %v4050_v48  ;;  %v6359_v48 = vld [vmem:[#allocation98_spill] sm:$0xff] }
 0x24f   :  { %1586 = vmatprep.subr.bf16.mxu0 %v4067_v52  ;;  %1627 = vmatprep.subr.bf16.mxu1 %v4077_v55  ;;  %v6356_v55 = vld [vmem:[#allocation39_spill] sm:$0xff] }
 0x252   :  { %1587 = vmatpush1.bf16.msra.mxu0 %v4079_v56  ;;  %1628 = vmatpush1.bf16.msra.mxu1 %v4081_v57  ;;  %v6355_v56 = vld [vmem:[#allocation97_spill] sm:$0xff] }
 0x253   :  { %1588 = vmatprep.subr.bf16.mxu0 %v4101_v62  ;;  %1629 = vmatprep.subr.bf16.mxu1 %v4110_v1  ;;  %v6349_v62 = vld [vmem:[#allocation34_spill] sm:$0xff]  ;;  %v6350_v1 = vld [vmem:[#allocation35_spill] sm:$0xff] }
 0x256   :  { %1589 = vmatpush1.bf16.msra.mxu0 %v4106_v0  ;;  %1630 = vmatpush1.bf16.msra.mxu1 %v4112_v2  ;;  %v6351_v0 = vld [vmem:[#allocation36_spill] sm:$0xff]  ;;  %v6352_v2 = vld [vmem:[#allocation38_spill] sm:$0xff] }
 0x257   :  { %1590 = vmatprep.subr.bf16.mxu0 %v4125_v7  ;;  %1631 = vmatprep.subr.bf16.mxu1 %v4135_v10  ;;  %v6353_v7 = vld [vmem:[#allocation95_spill] sm:$0xff]  ;;  %v6354_v10 = vld [vmem:[#allocation41_spill] sm:$0xff] }
 0x258   :  { %v172_v57 = vadd.f32 %v6353_v7, %v6352_v2 }
 0x25a   :  { %1591 = vmatpush1.bf16.msra.mxu0 %v6344_v33  ;;  %1632 = vmatpush1.bf16.msra.mxu1 %v6345_v45  ;;  %v285_v33 = vadd.f32 %v6355_v56, %v6354_v10  ;;  %v6357_v45 = vld [vmem:[#allocation96_spill] sm:$0xff] }
 0x25b   :  { %1592 = vmatprep.subr.bf16.mxu0 %v6346_v60  ;;  %1633 = vmatprep.subr.bf16.mxu1 %v6347_v36  ;;  %v174_v52 = vadd.f32 %v6357_v45, %v6356_v55  ;;  %v6358_v60 = vld [vmem:[#allocation40_spill] sm:$0xff] }
 0x25c   :  { %v287_v36 = vadd.f32 %v6359_v48, %v6358_v60 }
 0x25e   :  { %1593 = vmatpush1.bf16.msra.mxu0 %v6348_v4  ;;  %1634 = vmatpush1.bf16.msra.mxu1 %v6349_v62 }
 0x25f   :  { %1660 = vmatprep.subr.bf16.mxu0 %v6350_v1  ;;  %1701 = vmatprep.subr.bf16.mxu1 %v6351_v0 }
 0x2d3   :  { %v1309_v47 = vpop.f32.mrb[28].mxu0  ;;  %v1350_v4 = vpop.f32.mrb[28].mxu1 }
 0x2d4   :  { %v1528_v46 = vadd.f32 %v1309_v47, %v172_v57  ;;  %v1530_v62 = vadd.f32 %v1350_v4, %v285_v33  ;;  %v1311_v43 = vpop.f32.mrb[29].mxu0  ;;  %v1352_v1 = vpop.f32.mrb[29].mxu1 }
 0x2d5   :  { %v1529_v39 = vadd.f32 %v1311_v43, %v174_v52  ;;  %v1531_v0 = vadd.f32 %v1352_v1, %v287_v36  ;;  %v1313_v38 = vpop.f32.mrb[30].mxu0  ;;  %v1354_v37 = vpop.f32.mrb[30].mxu1 }
 0x2d6   :  { %v1540_v7 = vmul.f32 0.5, %v1528_v46  ;;  %v1314_v2 = vpop.f32.mrb[31].mxu0  ;;  %v1355_v34 = vpop.f32.mrb[31].mxu1  ;;  %v1542_v45 = vmul.f32 0.5, %v1530_v62 }
 0x2d7   :  { %v1541_v56 = vmul.f32 0.5, %v1529_v39 }
 0x2d8   :  { %3667 = vtanh.f32 %v1540_v7 }
 0x2d9   :  { %3669 = vtanh.f32 %v1541_v56  ;;  %v6361_v56 = vld [vmem:[#allocation44_spill] sm:$0xff] }
 0x2da   :  { %3671 = vtanh.f32 %v1531_v0 }
 0x2db   :  { %3673 = vtanh.f32 %v1542_v45  ;;  %v6362_v45 = vld [vmem:[#allocation45_spill] sm:$0xff] }
 0x2e2   :  { %v3668_v55 = vpop.eup %3667 }
 0x2e3   :  { %v1546_v48 = vmul.f32 0.5, %v3668_v55  ;;  %v3670_v60 = vpop.eup %3669 }
 0x2e4   :  { %v1547_v47 = vmul.f32 0.5, %v3670_v60  ;;  %v3672_v57 = vpop.eup %3671 }
 0x2e5   :  { %v1549_v10 = vadd.f32 0.5, %v1546_v48  ;;  %v3674_v34 = vpop.eup %3673  ;;  %v6363_v48 = vld [vmem:[#allocation46_spill] sm:$0xff] }
 0x2e6   :  { %v1550_v33 = vadd.f32 0.5, %v1547_v47  ;;  %v1548_v39 = vmul.f32 0.5, %v3674_v34  ;;  %v6364_v47 = vld [vmem:[#allocation47_spill] sm:$0xff]  ;;  %v6369_v34 = vld [vmem:[#allocation52_spill] sm:$0xff] }
 0x2e7   :  { %v1554_v43 = vmul.f32 %v3672_v57, %v1549_v10  ;;  %v6365_v57 = vld [vmem:[#allocation48_spill] sm:$0xff] }
 0x2e8   :  { %v1553_v38 = vmul.f32 %v1550_v33, %v4713_v14  ;;  %v1551_v2 = vadd.f32 0.5, %v1548_v39  ;;  %v6360_v14 = vld [vmem:[#allocation43_spill] sm:$0xff]  ;;  %v6366_v33 = vld [vmem:[#allocation49_spill] sm:$0xff] }
 0x2e9   :  { %v6370_v39 = vld [vmem:[#allocation53_spill] sm:$0xff] }
 0x2ea   :  { %v4853_v37 = vadd.f32 %v1554_v43, %v1553_v38  ;;  %v6367_v43 = vld [vmem:[#allocation50_spill] sm:$0xff]  ;;  %v6368_v38 = vld [vmem:[#allocation51_spill] sm:$0xff] }
 0x2ec   :  { %3675 = vtanh.f32 %v4853_v37 }
 0x2f3   :  { %v1391_v46 = vpop.f32.mrb[32].mxu0  ;;  %v1432_v52 = vpop.f32.mrb[32].mxu1 }
 0x2f4   :  { %v1393_v62 = vpop.f32.mrb[33].mxu0  ;;  %v1434_v0 = vpop.f32.mrb[33].mxu1 }
 0x2f5   :  { %v1395_v55 = vpop.f32.mrb[34].mxu0  ;;  %v1436_v1 = vpop.f32.mrb[34].mxu1 }
 0x2f6   :  { %v1396_v36 = vpop.f32.mrb[35].mxu0  ;;  %v1437_v60 = vpop.f32.mrb[35].mxu1  ;;  %v6371_v55 = vld [vmem:[#allocation54_spill] sm:$0xff]  ;;  %v6372_v1 = vld [vmem:[#allocation55_spill] sm:$0xff] }
 0x2f7   :  { %v3676_v4 = vpop.eup %3675  ;;  %v6374_v36 = vld [vmem:[#allocation57_spill] sm:$0xff]  ;;  %v6375_v60 = vld [vmem:[#allocation58_spill] sm:$0xff] }
 0x2f8   :  { %v1557_v7 = vmul.f32 %v3676_v4, %v1551_v2  ;;  %v6373_v2 = vld [vmem:[#allocation56_spill] sm:$0xff] }
 0x2fa   :  { %v1576_v10 = vpack.c.bf16 %v1557_v7, %v1557_v7 }
 0x2fc   :  { %1611 = vmatmul.mubr.bf16.vlgmr.msra.gmra.mrb[40].mxu0 %v1576_v10  ;;  %1652 = vmatmul.mubr.bf16.vlgmr.msra.gmra.mrb[40].mxu1 %v1576_v10 }
 0x2fd   :  { %1661 = vmatpush1.bf16.msra.mxu0 %v4200_v41  ;;  %1702 = vmatpush1.bf16.msra.mxu1 %v4204_v42 }
 0x2fe   :  { %1662 = vmatprep.subr.bf16.mxu0 %v4252_v31  ;;  %1703 = vmatprep.subr.bf16.mxu1 %v4254_v44 }
 0x2ff   :  { %1692 = vmatprep.mubr.bf16.mxu0 %v6240_v63  ;;  %1733 = vmatprep.mubr.bf16.mxu1 %v6240_v63 }
 0x301   :  { %1663 = vmatpush1.bf16.msra.mxu0 %v4272_v50  ;;  %1704 = vmatpush1.bf16.msra.mxu1 %v4274_v9 }
 0x302   :  { %1664 = vmatprep.subr.bf16.mxu0 %v4278_v11  ;;  %1705 = vmatprep.subr.bf16.mxu1 %v6285_v8 }
 0x305   :  { %1665 = vmatpush1.bf16.msra.mxu0 %v6360_v14  ;;  %1706 = vmatpush1.bf16.msra.mxu1 %v6361_v56 }
 0x306   :  { %1666 = vmatprep.subr.bf16.mxu0 %v6362_v45  ;;  %1707 = vmatprep.subr.bf16.mxu1 %v6363_v48 }
 0x309   :  { %1667 = vmatpush1.bf16.msra.mxu0 %v6364_v47  ;;  %1708 = vmatpush1.bf16.msra.mxu1 %v6365_v57 }
 0x30a   :  { %1668 = vmatprep.subr.bf16.mxu0 %v6366_v33  ;;  %1709 = vmatprep.subr.bf16.mxu1 %v6367_v43 }
 0x30d   :  { %1669 = vmatpush1.bf16.msra.mxu0 %v6368_v38  ;;  %1710 = vmatpush1.bf16.msra.mxu1 %v6369_v34 }
 0x30e   :  { %1670 = vmatprep.subr.bf16.mxu0 %v6370_v39  ;;  %1711 = vmatprep.subr.bf16.mxu1 %v6371_v55 }
 0x311   :  { %1671 = vmatpush1.bf16.msra.mxu0 %v6372_v1  ;;  %1712 = vmatpush1.bf16.msra.mxu1 %v6373_v2 }
 0x312   :  { %1672 = vmatprep.subr.bf16.mxu0 %v6374_v36  ;;  %1713 = vmatprep.subr.bf16.mxu1 %v6375_v60 }
 0x314   :  { %v1473_v4 = vpop.f32.mrb[36].mxu0  ;;  %v1514_v7 = vpop.f32.mrb[36].mxu1 }
 0x315   :  { %1673 = vmatpush1.bf16.msra.mxu0 %v4394_v3  ;;  %1714 = vmatpush1.bf16.msra.mxu1 %v6304_v27  ;;  %v1532_v38 = vadd.f32 %v1473_v4, %v1391_v46  ;;  %v1534_v34 = vadd.f32 %v1514_v7, %v1432_v52  ;;  %v1475_v43 = vpop.f32.mrb[37].mxu0  ;;  %v1516_v39 = vpop.f32.mrb[37].mxu1  ;;  %v6388_v4 = vld [vmem:[#allocation77_spill] sm:$0xff]  ;;  %v6389_v7 = vld [vmem:[#allocation78_spill] sm:$0xff] }
 0x316   :  { %1674 = vmatprep.subr.bf16.mxu0 %v6307_v59  ;;  %1715 = vmatprep.subr.bf16.mxu1 %v6308_v35  ;;  %v1533_v1 = vadd.f32 %v1475_v43, %v1393_v62  ;;  %v1535_v2 = vadd.f32 %v1516_v39, %v1434_v0  ;;  %v1477_v55 = vpop.f32.mrb[38].mxu0  ;;  %v1518_v36 = vpop.f32.mrb[38].mxu1  ;;  %v6376_v62 = vld [vmem:[#allocation119_spill] sm:$0xff]  ;;  %v6383_v39 = vld [vmem:[#allocation72_spill] sm:$0xff] }
 0x317   :  { %v1536_v60 = vadd.f32 %v1532_v38, %v4745_v5  ;;  %v1478_v33 = vpop.f32.mrb[39].mxu0  ;;  %v1519_v3 = vpop.f32.mrb[39].mxu1  ;;  %v6377_v43 = vld [vmem:[#allocation67_spill] sm:$0xff]  ;;  %v6380_v38 = vld [vmem:[#allocation70_spill] sm:$0xff]  ;;  %v6387_v36 = vld [vmem:[#allocation76_spill] sm:$0xff] }
 0x318   :  { %v1537_v27 = vadd.f32 %v1533_v1, %v4751_v13  ;;  %v1539_v0 = vadd.f32 %v1535_v2, %v6376_v62  ;;  %v6378_v3 = vld [vmem:[#allocation68_spill] sm:$0xff]  ;;  %v6379_v33 = vld [vmem:[#allocation69_spill] sm:$0xff]  ;;  %v6385_v55 = vld [vmem:[#allocation74_spill] sm:$0xff] }
 0x319   :  { %1675 = vmatpush1.bf16.msra.mxu0 %v6309_v24  ;;  %1716 = vmatpush1.bf16.msra.mxu1 %v6310_v53  ;;  %v1558_v46 = vmul.f32 0.5, %v1536_v60  ;;  %v6386_v2 = vld [vmem:[#allocation75_spill] sm:$0xff] }
 0x31a   :  { %1742 = vmatprep.subr.bf16.mxu0 %v6311_v22  ;;  %1783 = vmatprep.subr.bf16.mxu1 %v6312_v6  ;;  %v1559_v52 = vmul.f32 0.5, %v1537_v27  ;;  %v6381_v27 = vld [vmem:[#allocation65_spill] sm:$0xff]  ;;  %v6382_v6 = vld [vmem:[#allocation71_spill] sm:$0xff] }
 0x31b   :  { %3677 = vtanh.f32 %v1558_v46  ;;  %v1538_v22 = vadd.f32 %v1534_v34, %v6381_v27 }
 0x31c   :  { %1693 = vmatmul.mubr.bf16.vlgmr.msra.gmra.mrb[44].mxu0 %v1576_v10  ;;  %1734 = vmatmul.mubr.bf16.vlgmr.msra.gmra.mrb[44].mxu1 %v1576_v10  ;;  %3679 = vtanh.f32 %v1559_v52  ;;  %v6384_v10 = vld [vmem:[#allocation73_spill] sm:$0xff] }
 0x31d   :  { %1743 = vmatpush1.bf16.msra.mxu0 %v6377_v43  ;;  %1784 = vmatpush1.bf16.msra.mxu1 %v6378_v3  ;;  %3681 = vtanh.f32 %v1539_v0  ;;  %v1560_v1 = vmul.f32 0.5, %v1538_v22 }
 0x31e   :  { %1744 = vmatprep.subr.bf16.mxu0 %v6379_v33  ;;  %1785 = vmatprep.subr.bf16.mxu1 %v6380_v38  ;;  %v6390_v38 = vld [vmem:[#allocation66_spill] sm:$0xff] }
 0x31f   :  { %1774 = vmatprep.mubr.bf16.mxu0 %v6240_v63  ;;  %1815 = vmatprep.mubr.bf16.mxu1 %v6240_v63  ;;  %3683 = vtanh.f32 %v1560_v1 }
 0x321   :  { %1745 = vmatpush1.bf16.msra.mxu0 %v6382_v6  ;;  %1786 = vmatpush1.bf16.msra.mxu1 %v6383_v39  ;;  %v6391_v6 = vld [vmem:[#allocation83_spill] sm:$0xff]  ;;  %v6392_v39 = vld [vmem:[#allocation84_spill] sm:$0xff] }
 0x322   :  { %1746 = vmatprep.subr.bf16.mxu0 %v6384_v10  ;;  %1787 = vmatprep.subr.bf16.mxu1 %v6385_v55  ;;  %v6393_v10 = vld [vmem:[#allocation85_spill] sm:$0xff]  ;;  %v6394_v55 = vld [vmem:[#allocation86_spill] sm:$0xff] }
 0x325   :  { %1747 = vmatpush1.bf16.msra.mxu0 %v6386_v2  ;;  %1788 = vmatpush1.bf16.msra.mxu1 %v6387_v36  ;;  %v3678_v60 = vpop.eup %3677  ;;  %v6402_v2 = vld [vmem:[#allocation17_spill] sm:$0xff]  ;;  %v6403_v36 = vld [vmem:[#allocation18_spill] sm:$0xff] }
 0x326   :  { %1748 = vmatprep.subr.bf16.mxu0 %v6388_v4  ;;  %1789 = vmatprep.subr.bf16.mxu1 %v6389_v7  ;;  %v1564_v46 = vmul.f32 0.5, %v3678_v60  ;;  %v3680_v34 = vpop.eup %3679  ;;  %v6404_v60 = vld [vmem:[#allocation19_spill] sm:$0xff]  ;;  %v6405_v4 = vld [vmem:[#allocation20_spill] sm:$0xff]  ;;  %v6406_v7 = vld [vmem:[#allocation21_spill] sm:$0xff] }
 0x327   :  { %v1565_v0 = vmul.f32 0.5, %v3680_v34  ;;  %v3682_v43 = vpop.eup %3681  ;;  %v6408_v34 = vld [vmem:[#allocation23_spill] sm:$0xff] }
 0x328   :  { %v1567_v52 = vadd.f32 0.5, %v1564_v46  ;;  %v6407_v46 = vld [vmem:[#allocation22_spill] sm:$0xff] }
 0x329   :  { %1749 = vmatpush1.bf16.msra.mxu0 %v6327_v18  ;;  %1790 = vmatpush1.bf16.msra.mxu1 %v6328_v61  ;;  %v1568_v3 = vadd.f32 0.5, %v1565_v0  ;;  %v6395_v61 = vld [vmem:[#allocation88_spill] sm:$0xff] }
 0x32a   :  { %1750 = vmatprep.subr.bf16.mxu0 %v6329_v26  ;;  %1791 = vmatprep.subr.bf16.mxu1 %v6330_v58  ;;  %v1572_v33 = vmul.f32 %v3682_v43, %v1567_v52  ;;  %v3684_v58 = vpop.eup %3683  ;;  %v6409_v52 = vld [vmem:[#allocation25_spill] sm:$0xff]  ;;  %v6410_v0 = vld [vmem:[#allocation24_spill] sm:$0xff]  ;;  %v6411_v43 = vld [vmem:[#allocation26_spill] sm:$0xff] }
 0x32b   :  { %v1571_v22 = vmul.f32 %v1568_v3, %v6390_v38  ;;  %v1566_v26 = vmul.f32 0.5, %v3684_v58  ;;  %v6412_v3 = vld [vmem:[#allocation27_spill] sm:$0xff]  ;;  %v6414_v38 = vld [vmem:[#allocation29_spill] sm:$0xff]  ;;  %v6421_v58 = vld [vmem:[#allocation36_spill] sm:$0xff] }
 0x32d   :  { %1751 = vmatpush1.bf16.msra.mxu0 %v6391_v6  ;;  %1792 = vmatpush1.bf16.msra.mxu1 %v6392_v39  ;;  %v4917_v18 = vadd.f32 %v1572_v33, %v1571_v22  ;;  %v6413_v33 = vld [vmem:[#allocation28_spill] sm:$0xff]  ;;  %v6415_v22 = vld [vmem:[#allocation30_spill] sm:$0xff]  ;;  %v6416_v6 = vld [vmem:[#allocation31_spill] sm:$0xff] }
 0x32e   :  { %1752 = vmatprep.subr.bf16.mxu0 %v6393_v10  ;;  %1793 = vmatprep.subr.bf16.mxu1 %v6394_v55  ;;  %v6417_v39 = vld [vmem:[#allocation32_spill] sm:$0xff]  ;;  %v6418_v10 = vld [vmem:[#allocation33_spill] sm:$0xff]  ;;  %v6419_v55 = vld [vmem:[#allocation34_spill] sm:$0xff] }
 0x32f   :  { %3685 = vtanh.f32 %v4917_v18 }
 0x331   :  { %1753 = vmatpush1.bf16.msra.mxu0 %v6336_v49  ;;  %1794 = vmatpush1.bf16.msra.mxu1 %v6395_v61  ;;  %v1569_v49 = vadd.f32 0.5, %v1566_v26  ;;  %v6420_v61 = vld [vmem:[#allocation35_spill] sm:$0xff]  ;;  %v6422_v26 = vld [vmem:[#allocation38_spill] sm:$0xff] }
 0x332   :  { %1754 = vmatprep.subr.bf16.mxu0 %v6338_v32  ;;  %1795 = vmatprep.subr.bf16.mxu1 %v6339_v40 }
 0x335   :  { %1755 = vmatpush1.bf16.msra.mxu0 %v6340_v15  ;;  %1796 = vmatpush1.bf16.msra.mxu1 %v6341_v51  ;;  %v6398_v51 = vld [vmem:[#allocation13_spill] sm:$0xff]  ;;  %v6401_v15 = vld [vmem:[#allocation16_spill] sm:$0xff] }
 0x336   :  { %1756 = vmatprep.subr.bf16.mxu0 %v6342_v16  ;;  %1797 = vmatprep.subr.bf16.mxu1 %v6343_v54  ;;  %v6399_v16 = vld [vmem:[#allocation14_spill] sm:$0xff]  ;;  %v6400_v54 = vld [vmem:[#allocation15_spill] sm:$0xff] }
 0x339   :  { %1757 = vmatpush1.bf16.msra.mxu0 %v4607_v23  ;;  %1798 = vmatpush1.bf16.msra.mxu1 %v4612_v12  ;;  %v3686_v32 = vpop.eup %3685  ;;  %v6396_v12 = vld [vmem:[#allocation11_spill] sm:$0xff]  ;;  %v6397_v23 = vld [vmem:[#allocation12_spill] sm:$0xff] }
 0x33a   :  { %1881 = vmatprep.subr.bf16.mxu0 %v3952_v17  ;;  %1922 = vmatprep.subr.bf16.mxu1 %v3957_v19  ;;  %v1575_v40 = vmul.f32 %v3686_v32, %v1569_v49  ;;  %v6423_v49 = vld [vmem:[#allocation99_spill] sm:$0xff] }
 0x33b   :  { %v178_v32 = vadd.f32 %v6423_v49, %v6422_v26 }
 0x33c   :  { %v1577_v1 = vpack.c.bf16 %v1575_v40, %v1575_v40  ;;  %v6424_v40 = vld [vmem:[#allocation41_spill] sm:$0xff] }
 0x33e   :  { %1775 = vmatmul.mubr.bf16.vlgmr.msra.gmra.mrb[48].mxu0 %v1577_v1  ;;  %1816 = vmatmul.mubr.bf16.vlgmr.msra.gmra.mrb[48].mxu1 %v1577_v1  ;;  %v6425_v1 = vld [vmem:[#allocation101_spill] sm:$0xff] }
 0x33f   :  { %1882 = vmatpush1.bf16.msra.mxu0 %v3959_v20  ;;  %1923 = vmatpush1.bf16.msra.mxu1 %v3961_v21 }
 0x340   :  { %1883 = vmatprep.subr.bf16.mxu0 %v3976_v25  ;;  %1924 = vmatprep.subr.bf16.mxu1 %v3984_v28 }
 0x341   :  { %1913 = vmatprep.mubr.bf16.mxu0 %v6240_v63  ;;  %1954 = vmatprep.mubr.bf16.mxu1 %v6240_v63 }
 0x343   :  { %1884 = vmatpush1.bf16.msra.mxu0 %v3986_v29  ;;  %1925 = vmatpush1.bf16.msra.mxu1 %v3988_v30 }
 0x344   :  { %1885 = vmatprep.subr.bf16.mxu0 %v6396_v12  ;;  %1926 = vmatprep.subr.bf16.mxu1 %v6397_v23 }
 0x347   :  { %1886 = vmatpush1.bf16.msra.mxu0 %v6398_v51  ;;  %1927 = vmatpush1.bf16.msra.mxu1 %v6399_v16 }
 0x348   :  { %1887 = vmatprep.subr.bf16.mxu0 %v6400_v54  ;;  %1928 = vmatprep.subr.bf16.mxu1 %v6401_v15 }
 0x34b   :  { %1888 = vmatpush1.bf16.msra.mxu0 %v6402_v2  ;;  %1929 = vmatpush1.bf16.msra.mxu1 %v6403_v36 }
 0x34c   :  { %1889 = vmatprep.subr.bf16.mxu0 %v6404_v60  ;;  %1930 = vmatprep.subr.bf16.mxu1 %v6405_v4 }
 0x34f   :  { %1890 = vmatpush1.bf16.msra.mxu0 %v6406_v7  ;;  %1931 = vmatpush1.bf16.msra.mxu1 %v6407_v46 }
 0x350   :  { %1891 = vmatprep.subr.bf16.mxu0 %v6408_v34  ;;  %1932 = vmatprep.subr.bf16.mxu1 %v6409_v52 }
 0x353   :  { %1892 = vmatpush1.bf16.msra.mxu0 %v6410_v0  ;;  %1933 = vmatpush1.bf16.msra.mxu1 %v6411_v43  ;;  %v6429_v43 = vld [vmem:[#allocation102_spill] sm:$0xff] }
 0x354   :  { %1893 = vmatprep.subr.bf16.mxu0 %v6412_v3  ;;  %1934 = vmatprep.subr.bf16.mxu1 %v6413_v33  ;;  %v6426_v33 = vld [vmem:[#allocation39_spill] sm:$0xff] }
 0x357   :  { %1894 = vmatpush1.bf16.msra.mxu0 %v6414_v38  ;;  %1935 = vmatpush1.bf16.msra.mxu1 %v6415_v22  ;;  %v291_v38 = vadd.f32 %v6425_v1, %v6424_v40  ;;  %v6427_v22 = vld [vmem:[#allocation100_spill] sm:$0xff] }
 0x358   :  { %1895 = vmatprep.subr.bf16.mxu0 %v6416_v6  ;;  %1936 = vmatprep.subr.bf16.mxu1 %v6417_v39  ;;  %v180_v3 = vadd.f32 %v6427_v22, %v6426_v33  ;;  %v6428_v6 = vld [vmem:[#allocation40_spill] sm:$0xff] }
 0x359   :  { %v293_v39 = vadd.f32 %v6429_v43, %v6428_v6 }
 0x35b   :  { %1896 = vmatpush1.bf16.msra.mxu0 %v6418_v10  ;;  %1937 = vmatpush1.bf16.msra.mxu1 %v6419_v55 }
 0x35c   :  { %1963 = vmatprep.subr.bf16.mxu0 %v6420_v61  ;;  %2004 = vmatprep.subr.bf16.mxu1 %v6421_v58 }
 0x3cf   :  { %v1612_v0 = vpop.f32.mrb[40].mxu0  ;;  %v1653_v10 = vpop.f32.mrb[40].mxu1 }
 0x3d0   :  { %v1831_v52 = vadd.f32 %v1612_v0, %v178_v32  ;;  %v1833_v55 = vadd.f32 %v1653_v10, %v291_v38  ;;  %v1614_v34 = vpop.f32.mrb[41].mxu0  ;;  %v1655_v61 = vpop.f32.mrb[41].mxu1 }
 0x3d1   :  { %v1832_v46 = vadd.f32 %v1614_v34, %v180_v3  ;;  %v1834_v58 = vadd.f32 %v1655_v61, %v293_v39  ;;  %v1616_v7 = vpop.f32.mrb[42].mxu0  ;;  %v1657_v4 = vpop.f32.mrb[42].mxu1 }
 0x3d2   :  { %v1843_v49 = vmul.f32 0.5, %v1831_v52  ;;  %v1617_v26 = vpop.f32.mrb[43].mxu0  ;;  %v1658_v60 = vpop.f32.mrb[43].mxu1  ;;  %v1845_v22 = vmul.f32 0.5, %v1833_v55 }
 0x3d3   :  { %v1844_v1 = vmul.f32 0.5, %v1832_v46 }
 0x3d4   :  { %3687 = vtanh.f32 %v1843_v49 }
 0x3d5   :  { %3689 = vtanh.f32 %v1844_v1  ;;  %v6431_v1 = vld [vmem:[#allocation50_spill] sm:$0xff] }
 0x3d6   :  { %3691 = vtanh.f32 %v1834_v58 }
 0x3d7   :  { %3693 = vtanh.f32 %v1845_v22  ;;  %v6432_v22 = vld [vmem:[#allocation51_spill] sm:$0xff] }
 0x3de   :  { %v3688_v33 = vpop.eup %3687 }
 0x3df   :  { %v1849_v43 = vmul.f32 0.5, %v3688_v33  ;;  %v3690_v6 = vpop.eup %3689 }
 0x3e0   :  { %v1850_v0 = vmul.f32 0.5, %v3690_v6  ;;  %v3692_v38 = vpop.eup %3691 }
 0x3e1   :  { %v1852_v40 = vadd.f32 0.5, %v1849_v43  ;;  %v3694_v60 = vpop.eup %3693  ;;  %v6433_v43 = vld [vmem:[#allocation52_spill] sm:$0xff] }
 0x3e2   :  { %v1853_v10 = vadd.f32 0.5, %v1850_v0  ;;  %v1851_v46 = vmul.f32 0.5, %v3694_v60  ;;  %v6434_v0 = vld [vmem:[#allocation53_spill] sm:$0xff]  ;;  %v6439_v60 = vld [vmem:[#allocation58_spill] sm:$0xff] }
 0x3e3   :  { %v1857_v34 = vmul.f32 %v3692_v38, %v1852_v40  ;;  %v6435_v38 = vld [vmem:[#allocation54_spill] sm:$0xff] }
 0x3e4   :  { %v1856_v7 = vmul.f32 %v1853_v10, %v4853_v37  ;;  %v1854_v58 = vadd.f32 0.5, %v1851_v46  ;;  %v6430_v37 = vld [vmem:[#allocation49_spill] sm:$0xff]  ;;  %v6436_v10 = vld [vmem:[#allocation55_spill] sm:$0xff] }
 0x3e5   :  { %v6440_v46 = vld [vmem:[#allocation59_spill] sm:$0xff] }
 0x3e6   :  { %v4975_v4 = vadd.f32 %v1857_v34, %v1856_v7  ;;  %v6437_v34 = vld [vmem:[#allocation56_spill] sm:$0xff]  ;;  %v6438_v7 = vld [vmem:[#allocation57_spill] sm:$0xff] }
 0x3e8   :  { %3695 = vtanh.f32 %v4975_v4 }
 0x3ef   :  { %v1694_v52 = vpop.f32.mrb[44].mxu0  ;;  %v1735_v3 = vpop.f32.mrb[44].mxu1 }
 0x3f0   :  { %v1696_v39 = vpop.f32.mrb[45].mxu0  ;;  %v1737_v55 = vpop.f32.mrb[45].mxu1 }
 0x3f1   :  { %v1698_v33 = vpop.f32.mrb[46].mxu0  ;;  %v1739_v61 = vpop.f32.mrb[46].mxu1 }
 0x3f2   :  { %v1699_v26 = vpop.f32.mrb[47].mxu0  ;;  %v1740_v6 = vpop.f32.mrb[47].mxu1  ;;  %v6441_v33 = vld [vmem:[#allocation60_spill] sm:$0xff] }
 0x3f3   :  { %v3696_v32 = vpop.eup %3695 }
 0x3f4   :  { %v1860_v49 = vmul.f32 %v3696_v32, %v1854_v58 }
 0x3f6   :  { %v1879_v40 = vpack.c.bf16 %v1860_v49, %v1860_v49 }
 0x3f8   :  { %1914 = vmatmul.mubr.bf16.vlgmr.msra.gmra.mrb[52].mxu0 %v1879_v40  ;;  %1955 = vmatmul.mubr.bf16.vlgmr.msra.gmra.mrb[52].mxu1 %v1879_v40 }
 0x3f9   :  { %1964 = vmatpush1.bf16.msra.mxu0 %v4200_v41  ;;  %2005 = vmatpush1.bf16.msra.mxu1 %v4204_v42 }
 0x3fa   :  { %1965 = vmatprep.subr.bf16.mxu0 %v4252_v31  ;;  %2006 = vmatprep.subr.bf16.mxu1 %v4254_v44 }
 0x3fb   :  { %1995 = vmatprep.mubr.bf16.mxu0 %v6240_v63  ;;  %2036 = vmatprep.mubr.bf16.mxu1 %v6240_v63 }
 0x3fd   :  { %1966 = vmatpush1.bf16.msra.mxu0 %v4272_v50  ;;  %2007 = vmatpush1.bf16.msra.mxu1 %v4274_v9 }
 0x3fe   :  { %1967 = vmatprep.subr.bf16.mxu0 %v4278_v11  ;;  %2008 = vmatprep.subr.bf16.mxu1 %v6285_v8 }
 0x401   :  { %1968 = vmatpush1.bf16.msra.mxu0 %v6360_v14  ;;  %2009 = vmatpush1.bf16.msra.mxu1 %v6361_v56 }
 0x402   :  { %1969 = vmatprep.subr.bf16.mxu0 %v6362_v45  ;;  %2010 = vmatprep.subr.bf16.mxu1 %v6363_v48 }
 0x405   :  { %1970 = vmatpush1.bf16.msra.mxu0 %v6364_v47  ;;  %2011 = vmatpush1.bf16.msra.mxu1 %v6365_v57 }
 0x406   :  { %1971 = vmatprep.subr.bf16.mxu0 %v6430_v37  ;;  %2012 = vmatprep.subr.bf16.mxu1 %v6431_v1 }
 0x409   :  { %1972 = vmatpush1.bf16.msra.mxu0 %v6432_v22  ;;  %2013 = vmatpush1.bf16.msra.mxu1 %v6433_v43 }
 0x40a   :  { %1973 = vmatprep.subr.bf16.mxu0 %v6434_v0  ;;  %2014 = vmatprep.subr.bf16.mxu1 %v6435_v38 }
 0x40d   :  { %1974 = vmatpush1.bf16.msra.mxu0 %v6436_v10  ;;  %2015 = vmatpush1.bf16.msra.mxu1 %v6437_v34 }
 0x40e   :  { %1975 = vmatprep.subr.bf16.mxu0 %v6438_v7  ;;  %2016 = vmatprep.subr.bf16.mxu1 %v6439_v60 }
 0x411   :  { %1976 = vmatpush1.bf16.msra.mxu0 %v6440_v46  ;;  %2017 = vmatpush1.bf16.msra.mxu1 %v6441_v33  ;;  %v1776_v61 = vpop.f32.mrb[48].mxu0  ;;  %v1817_v58 = vpop.f32.mrb[48].mxu1 }
 0x412   :  { %1977 = vmatprep.subr.bf16.mxu0 %v6307_v59  ;;  %2018 = vmatprep.subr.bf16.mxu1 %v6308_v35  ;;  %v1835_v26 = vadd.f32 %v1776_v61, %v1694_v52  ;;  %v1837_v6 = vadd.f32 %v1817_v58, %v1735_v3  ;;  %v1778_v32 = vpop.f32.mrb[49].mxu0  ;;  %v1819_v49 = vpop.f32.mrb[49].mxu1  ;;  %v5014_v35 = vld [vmem:[%s5892_s4 + $0x4] ss:$16 sps:$4 sm:$0xff]   ;;  %v5020_v52 = vld [vmem:[%s5892_s4 + $0xc] ss:$16 sps:$4 sm:$0xff]  }
 0x413   :  { %v1836_v10 = vadd.f32 %v1778_v32, %v1696_v39  ;;  %v1838_v34 = vadd.f32 %v1819_v49, %v1737_v55  ;;  %v1780_v60 = vpop.f32.mrb[50].mxu0  ;;  %v1821_v46 = vpop.f32.mrb[50].mxu1  ;;  %v5027_v55 = vld [vmem:[%s5892_s4] ss:$16 sps:$4 sm:$0xff]   ;;  %v5072_v61 = vld [vmem:[%s5892_s4 + $0x4c] ss:$16 sps:$4 sm:$0xff]  }
 0x414   :  { %v1839_v33 = vadd.f32 %v1835_v26, %v4745_v5  ;;  %v1781_v7 = vpop.f32.mrb[51].mxu0  ;;  %v1822_v59 = vpop.f32.mrb[51].mxu1  ;;  %v5046_v60 = vld [vmem:[%s5892_s4 + $0x2c] ss:$16 sps:$4 sm:$0xff]   ;;  %v5060_v46 = vld [vmem:[%s5892_s4 + $0x28] ss:$16 sps:$4 sm:$0xff]   ;;  %v1841_v58 = vadd.f32 %v1837_v6, %v6381_v27 }
 0x415   :  { %1978 = vmatpush1.bf16.msra.mxu0 %v6309_v24  ;;  %2019 = vmatpush1.bf16.msra.mxu1 %v6310_v53  ;;  %v1840_v3 = vadd.f32 %v1836_v10, %v4751_v13  ;;  %v5033_v7 = vld [vmem:[%s5892_s4 + $0x8] ss:$16 sps:$4 sm:$0xff]   ;;  %v1842_v10 = vadd.f32 %v1838_v34, %v6376_v62  ;;  %v5054_v34 = vld [vmem:[%s5892_s4 + $0x20] ss:$16 sps:$4 sm:$0xff]   ;;  %6442 = vst [vmem:[#allocation79_spill] sm:$0xff] %v5072_v61 }
 0x416   :  { %2045 = vmatprep.subr.bf16.mxu0 %v5014_v35  ;;  %2086 = vmatprep.subr.bf16.mxu1 %v5020_v52  ;;  %v1861_v39 = vmul.f32 0.5, %v1839_v33  ;;  %v5066_v33 = vld [vmem:[%s5892_s4 + $0x44] ss:$16 sps:$4 sm:$0xff]   ;;  %v5079_v26 = vld [vmem:[%s5892_s4 + $0x40] ss:$16 sps:$4 sm:$0xff]  }
 0x417   :  { %v1862_v59 = vmul.f32 0.5, %v1840_v3  ;;  %6443 = vst [vmem:[#allocation80_spill] sm:$0xff] %v5079_v26  ;;  %v5085_v32 = vld [vmem:[%s5892_s4 + $0x48] ss:$16 sps:$4 sm:$0xff]   ;;  %v5091_v49 = vld [vmem:[%s5892_s4 + $0x64] ss:$16 sps:$4 sm:$0xff]  }
 0x418   :  { %1996 = vmatmul.mubr.bf16.vlgmr.msra.gmra.mrb[56].mxu0 %v1879_v40  ;;  %2037 = vmatmul.mubr.bf16.vlgmr.msra.gmra.mrb[56].mxu1 %v1879_v40  ;;  %3697 = vtanh.f32 %v1861_v39  ;;  %v5040_v40 = vld [vmem:[%s5892_s4 + $0x24] ss:$16 sps:$4 sm:$0xff]   ;;  %6444 = vst [vmem:[#allocation81_spill] sm:$0xff] %v5085_v32  ;;  %6445 = vst [vmem:[#allocation82_spill] sm:$0xff] %v5091_v49  ;;  %v5097_v6 = vld [vmem:[%s5892_s4 + $0x6c] ss:$16 sps:$4 sm:$0xff]  }
 0x419   :  { %2046 = vmatpush1.bf16.msra.mxu0 %v5027_v55  ;;  %2087 = vmatpush1.bf16.msra.mxu1 %v5033_v7  ;;  %3699 = vtanh.f32 %v1862_v59  ;;  %6446 = vst [vmem:[#allocation87_spill] sm:$0xff] %v5097_v6  ;;  %v1863_v3 = vmul.f32 0.5, %v1841_v58  ;;  %v5115_v58 = vld [vmem:[%s5892_s4 + $0x84] ss:$16 sps:$4 sm:$0xff]  }
 0x41a   :  { %2047 = vmatprep.subr.bf16.mxu0 %v5040_v40  ;;  %2088 = vmatprep.subr.bf16.mxu1 %v5046_v60  ;;  %3701 = vtanh.f32 %v1842_v10  ;;  %v5103_v10 = vld [vmem:[%s5892_s4 + $0x60] ss:$16 sps:$4 sm:$0xff]   ;;  %6449 = vst [vmem:[#allocation91_spill] sm:$0xff] %v5115_v58 }
 0x41b   :  { %2077 = vmatprep.mubr.bf16.mxu0 %v6240_v63  ;;  %2118 = vmatprep.mubr.bf16.mxu1 %v6240_v63  ;;  %6447 = vst [vmem:[#allocation89_spill] sm:$0xff] %v5103_v10  ;;  %3703 = vtanh.f32 %v1863_v3 }
 0x41d   :  { %2048 = vmatpush1.bf16.msra.mxu0 %v5054_v34  ;;  %2089 = vmatpush1.bf16.msra.mxu1 %v5060_v46 }
 0x41e   :  { %2049 = vmatprep.subr.bf16.mxu0 %v5066_v33  ;;  %2090 = vmatprep.subr.bf16.mxu1 %v5072_v61  ;;  %v5127_v61 = vld [vmem:[%s5892_s4 + $0x80] ss:$16 sps:$4 sm:$0xff]  }
 0x41f   :  { %6451 = vst [vmem:[#allocation93_spill] sm:$0xff] %v5127_v61 }
 0x421   :  { %2050 = vmatpush1.bf16.msra.mxu0 %v5079_v26  ;;  %2091 = vmatpush1.bf16.msra.mxu1 %v5085_v32 }
 0x422   :  { %2051 = vmatprep.subr.bf16.mxu0 %v5091_v49  ;;  %2092 = vmatprep.subr.bf16.mxu1 %v5097_v6  ;;  %v3698_v39 = vpop.eup %3697  ;;  %v5109_v49 = vld [vmem:[%s5892_s4 + $0x68] ss:$16 sps:$4 sm:$0xff]  }
 0x423   :  { %v1867_v59 = vmul.f32 0.5, %v3698_v39  ;;  %6448 = vst [vmem:[#allocation90_spill] sm:$0xff] %v5109_v49  ;;  %v3700_v32 = vpop.eup %3699  ;;  %v5121_v39 = vld [vmem:[%s5892_s4 + $0x8c] ss:$16 sps:$4 sm:$0xff]  }
 0x424   :  { %6450 = vst [vmem:[#allocation92_spill] sm:$0xff] %v5121_v39  ;;  %v1868_v6 = vmul.f32 0.5, %v3700_v32  ;;  %v3702_v26 = vpop.eup %3701  ;;  %v5139_v32 = vld [vmem:[%s5892_s4 + $0xa4] ss:$16 sps:$4 sm:$0xff]  }
 0x425   :  { %2052 = vmatpush1.bf16.msra.mxu0 %v5103_v10  ;;  %2093 = vmatpush1.bf16.msra.mxu1 %v5109_v49  ;;  %v1870_v10 = vadd.f32 0.5, %v1867_v59  ;;  %6453 = vst [vmem:[#allocation95_spill] sm:$0xff] %v5139_v32  ;;  %v5154_v59 = vld [vmem:[%s5892_s4 + $0xa0] ss:$16 sps:$4 sm:$0xff]  }
 0x426   :  { %2053 = vmatprep.subr.bf16.mxu0 %v5115_v58  ;;  %2094 = vmatprep.subr.bf16.mxu1 %v5121_v39  ;;  %v1871_v49 = vadd.f32 0.5, %v1868_v6  ;;  %v5133_v58 = vld [vmem:[%s5892_s4 + $0x88] ss:$16 sps:$4 sm:$0xff]   ;;  %6456 = vst [vmem:[#allocation98_spill] sm:$0xff] %v5154_v59 }
 0x427   :  { %v1875_v27 = vmul.f32 %v3702_v26, %v1870_v10  ;;  %6452 = vst [vmem:[#allocation94_spill] sm:$0xff] %v5133_v58  ;;  %v5145_v26 = vld [vmem:[%s5892_s4 + $0xac] ss:$16 sps:$4 sm:$0xff]   ;;  %v5160_v10 = vld [vmem:[%s5892_s4 + $0xa8] ss:$16 sps:$4 sm:$0xff]  }
 0x428   :  { %6454 = vst [vmem:[#allocation97_spill] sm:$0xff] %v5145_v26  ;;  %v1874_v6 = vmul.f32 %v1871_v49, %v4917_v18  ;;  %6457 = vst [vmem:[#allocation43_spill] sm:$0xff] %v5160_v10  ;;  %v5166_v18 = vld [vmem:[%s5892_s4 + $0xc4] ss:$16 sps:$4 sm:$0xff]   ;;  %v3704_v49 = vpop.eup %3703 }
 0x429   :  { %2054 = vmatpush1.bf16.msra.mxu0 %v5127_v61  ;;  %2095 = vmatpush1.bf16.msra.mxu1 %v5133_v58  ;;  %6458 = vst [vmem:[#allocation44_spill] sm:$0xff] %v5166_v18 }
 0x42a   :  { %2055 = vmatprep.subr.bf16.mxu0 %v5139_v32  ;;  %2096 = vmatprep.subr.bf16.mxu1 %v5145_v26  ;;  %v5149_v3 = vadd.f32 %v1875_v27, %v1874_v6  ;;  %v5172_v27 = vld [vmem:[%s5892_s4 + $0xcc] ss:$16 sps:$4 sm:$0xff]   ;;  %v5179_v6 = vld [vmem:[%s5892_s4 + $0xc0] ss:$16 sps:$4 sm:$0xff]  }
 0x42b   :  { %6459 = vst [vmem:[#allocation45_spill] sm:$0xff] %v5172_v27  ;;  %6460 = vst [vmem:[#allocation46_spill] sm:$0xff] %v5179_v6 }
 0x42c   :  { %6455 = vst [vmem:[#allocation96_spill] sm:$0xff] %v5149_v3  ;;  %3705 = vtanh.f32 %v5149_v3 }
 0x42d   :  { %2056 = vmatpush1.bf16.msra.mxu0 %v5154_v59  ;;  %2097 = vmatpush1.bf16.msra.mxu1 %v5160_v10  ;;  %v5197_v10 = vld [vmem:[%s5892_s4 + $0xec] ss:$16 sps:$4 sm:$0xff]   ;;  %v5203_v59 = vld [vmem:[%s5892_s4 + $0xe0] ss:$16 sps:$4 sm:$0xff]  }
 0x42e   :  { %2057 = vmatprep.subr.bf16.mxu0 %v5166_v18  ;;  %2098 = vmatprep.subr.bf16.mxu1 %v5172_v27  ;;  %v5185_v18 = vld [vmem:[%s5892_s4 + $0xc8] ss:$16 sps:$4 sm:$0xff]   ;;  %v5191_v27 = vld [vmem:[%s5892_s4 + $0xe4] ss:$16 sps:$4 sm:$0xff]   ;;  %6463 = vst [vmem:[#allocation67_spill] sm:$0xff] %v5197_v10  ;;  %6464 = vst [vmem:[#allocation68_spill] sm:$0xff] %v5203_v59 }
 0x42f   :  { %6461 = vst [vmem:[#allocation47_spill] sm:$0xff] %v5185_v18  ;;  %6462 = vst [vmem:[#allocation48_spill] sm:$0xff] %v5191_v27 }
 0x431   :  { %2058 = vmatpush1.bf16.msra.mxu0 %v5179_v6  ;;  %2099 = vmatpush1.bf16.msra.mxu1 %v5185_v18  ;;  %v1869_v6 = vmul.f32 0.5, %v3704_v49  ;;  %v5209_v18 = vld [vmem:[%s5892_s4 + $0xe8] ss:$16 sps:$4 sm:$0xff]  }
 0x432   :  { %2059 = vmatprep.subr.bf16.mxu0 %v5191_v27  ;;  %2100 = vmatprep.subr.bf16.mxu1 %v5197_v10  ;;  %6465 = vst [vmem:[#allocation69_spill] sm:$0xff] %v5209_v18 }
 0x433   :  { %v1872_v10 = vadd.f32 0.5, %v1869_v6  ;;  %v6469_v6 = vld [vmem:[#allocation22_spill] sm:$0xff] }
 0x435   :  { %2060 = vmatpush1.bf16.msra.mxu0 %v5203_v59  ;;  %2101 = vmatpush1.bf16.msra.mxu1 %v5209_v18 }
 0x436   :  { %2184 = vmatprep.subr.bf16.mxu0 %v3952_v17  ;;  %2225 = vmatprep.subr.bf16.mxu1 %v3957_v19  ;;  %v3706_v49 = vpop.eup %3705 }
 0x437   :  { %v1878_v27 = vmul.f32 %v3706_v49, %v1872_v10  ;;  %v6467_v10 = vld [vmem:[#allocation20_spill] sm:$0xff]  ;;  %v6470_v49 = vld [vmem:[#allocation23_spill] sm:$0xff] }
 0x439   :  { %v1880_v3 = vpack.c.bf16 %v1878_v27, %v1878_v27  ;;  %v6468_v27 = vld [vmem:[#allocation21_spill] sm:$0xff] }
 0x43b   :  { %2078 = vmatmul.mubr.bf16.vlgmr.msra.gmra.mrb[60].mxu0 %v1880_v3  ;;  %2119 = vmatmul.mubr.bf16.vlgmr.msra.gmra.mrb[60].mxu1 %v1880_v3  ;;  %v6466_v3 = vld [vmem:[#allocation19_spill] sm:$0xff] }
 0x43c   :  { %2185 = vmatpush1.bf16.msra.mxu0 %v3959_v20  ;;  %2226 = vmatpush1.bf16.msra.mxu1 %v3961_v21 }
 0x43d   :  { %2186 = vmatprep.subr.bf16.mxu0 %v3976_v25  ;;  %2227 = vmatprep.subr.bf16.mxu1 %v3984_v28  ;;  %v6491_v28 = vld [vmem:[#allocation106_spill] sm:$0xff] }
 0x43e   :  { %2216 = vmatprep.mubr.bf16.mxu0 %v6240_v63  ;;  %2257 = vmatprep.mubr.bf16.mxu1 %v6240_v63 }
 0x440   :  { %2187 = vmatpush1.bf16.msra.mxu0 %v3986_v29  ;;  %2228 = vmatpush1.bf16.msra.mxu1 %v3988_v30  ;;  %v6488_v30 = vld [vmem:[#allocation39_spill] sm:$0xff] }
 0x441   :  { %2188 = vmatprep.subr.bf16.mxu0 %v6396_v12  ;;  %2229 = vmatprep.subr.bf16.mxu1 %v6397_v23  ;;  %v6487_v12 = vld [vmem:[#allocation105_spill] sm:$0xff] }
 0x444   :  { %2189 = vmatpush1.bf16.msra.mxu0 %v6398_v51  ;;  %2230 = vmatpush1.bf16.msra.mxu1 %v6399_v16  ;;  %v6471_v51 = vld [vmem:[#allocation25_spill] sm:$0xff]  ;;  %v6472_v16 = vld [vmem:[#allocation24_spill] sm:$0xff] }
 0x445   :  { %2190 = vmatprep.subr.bf16.mxu0 %v6400_v54  ;;  %2231 = vmatprep.subr.bf16.mxu1 %v6401_v15  ;;  %v6473_v54 = vld [vmem:[#allocation26_spill] sm:$0xff]  ;;  %v6474_v15 = vld [vmem:[#allocation27_spill] sm:$0xff] }
 0x448   :  { %2191 = vmatpush1.bf16.msra.mxu0 %v6402_v2  ;;  %2232 = vmatpush1.bf16.msra.mxu1 %v6403_v36  ;;  %v6475_v2 = vld [vmem:[#allocation28_spill] sm:$0xff]  ;;  %v6476_v36 = vld [vmem:[#allocation29_spill] sm:$0xff] }
 0x449   :  { %2192 = vmatprep.subr.bf16.mxu0 %v6466_v3  ;;  %2233 = vmatprep.subr.bf16.mxu1 %v6467_v10  ;;  %v6477_v3 = vld [vmem:[#allocation30_spill] sm:$0xff]  ;;  %v6478_v10 = vld [vmem:[#allocation31_spill] sm:$0xff] }
 0x44c   :  { %2193 = vmatpush1.bf16.msra.mxu0 %v6468_v27  ;;  %2234 = vmatpush1.bf16.msra.mxu1 %v6469_v6  ;;  %v6479_v27 = vld [vmem:[#allocation32_spill] sm:$0xff]  ;;  %v6480_v6 = vld [vmem:[#allocation33_spill] sm:$0xff] }
 0x44d   :  { %2194 = vmatprep.subr.bf16.mxu0 %v6470_v49  ;;  %2235 = vmatprep.subr.bf16.mxu1 %v6471_v51  ;;  %v6481_v49 = vld [vmem:[#allocation34_spill] sm:$0xff]  ;;  %v6482_v51 = vld [vmem:[#allocation35_spill] sm:$0xff] }
 0x450   :  { %2195 = vmatpush1.bf16.msra.mxu0 %v6472_v16  ;;  %2236 = vmatpush1.bf16.msra.mxu1 %v6473_v54  ;;  %v6483_v16 = vld [vmem:[#allocation36_spill] sm:$0xff]  ;;  %v6484_v54 = vld [vmem:[#allocation38_spill] sm:$0xff] }
 0x451   :  { %2196 = vmatprep.subr.bf16.mxu0 %v6474_v15  ;;  %2237 = vmatprep.subr.bf16.mxu1 %v6475_v2  ;;  %v6485_v15 = vld [vmem:[#allocation103_spill] sm:$0xff]  ;;  %v6486_v2 = vld [vmem:[#allocation41_spill] sm:$0xff] }
 0x452   :  { %v184_v23 = vadd.f32 %v6485_v15, %v6484_v54 }
 0x454   :  { %2197 = vmatpush1.bf16.msra.mxu0 %v6476_v36  ;;  %2238 = vmatpush1.bf16.msra.mxu1 %v6477_v3  ;;  %v297_v36 = vadd.f32 %v6487_v12, %v6486_v2  ;;  %v6489_v3 = vld [vmem:[#allocation104_spill] sm:$0xff] }
 0x455   :  { %2198 = vmatprep.subr.bf16.mxu0 %v6478_v10  ;;  %2239 = vmatprep.subr.bf16.mxu1 %v6479_v27  ;;  %v186_v29 = vadd.f32 %v6489_v3, %v6488_v30  ;;  %v6490_v10 = vld [vmem:[#allocation40_spill] sm:$0xff] }
 0x456   :  { %v299_v27 = vadd.f32 %v6491_v28, %v6490_v10 }
 0x458   :  { %2199 = vmatpush1.bf16.msra.mxu0 %v6480_v6  ;;  %2240 = vmatpush1.bf16.msra.mxu1 %v6481_v49 }
 0x459   :  { %2266 = vmatprep.subr.bf16.mxu0 %v6482_v51  ;;  %2307 = vmatprep.subr.bf16.mxu1 %v6483_v16 }
 0x4cb   :  { %v1915_v25 = vpop.f32.mrb[52].mxu0  ;;  %v1956_v6 = vpop.f32.mrb[52].mxu1 }
 0x4cc   :  { %v2134_v21 = vadd.f32 %v1915_v25, %v184_v23  ;;  %v2136_v49 = vadd.f32 %v1956_v6, %v297_v36  ;;  %v1917_v20 = vpop.f32.mrb[53].mxu0  ;;  %v1958_v51 = vpop.f32.mrb[53].mxu1 }
 0x4cd   :  { %v2135_v19 = vadd.f32 %v1917_v20, %v186_v29  ;;  %v2137_v16 = vadd.f32 %v1958_v51, %v299_v27  ;;  %v1919_v17 = vpop.f32.mrb[54].mxu0  ;;  %v1960_v18 = vpop.f32.mrb[54].mxu1 }
 0x4ce   :  { %v2146_v15 = vmul.f32 0.5, %v2134_v21  ;;  %v1920_v54 = vpop.f32.mrb[55].mxu0  ;;  %v1961_v59 = vpop.f32.mrb[55].mxu1  ;;  %v2148_v3 = vmul.f32 0.5, %v2136_v49 }
 0x4cf   :  { %v2147_v12 = vmul.f32 0.5, %v2135_v19 }
 0x4d0   :  { %3707 = vtanh.f32 %v2146_v15 }
 0x4d1   :  { %3709 = vtanh.f32 %v2147_v12  ;;  %v6493_v12 = vld [vmem:[#allocation56_spill] sm:$0xff] }
 0x4d2   :  { %3711 = vtanh.f32 %v2137_v16 }
 0x4d3   :  { %3713 = vtanh.f32 %v2148_v3  ;;  %v6494_v3 = vld [vmem:[#allocation57_spill] sm:$0xff] }
 0x4da   :  { %v3708_v30 = vpop.eup %3707 }
 0x4db   :  { %v2152_v28 = vmul.f32 0.5, %v3708_v30  ;;  %v3710_v10 = vpop.eup %3709 }
 0x4dc   :  { %v2153_v25 = vmul.f32 0.5, %v3710_v10  ;;  %v3712_v23 = vpop.eup %3711 }
 0x4dd   :  { %v2155_v2 = vadd.f32 0.5, %v2152_v28  ;;  %v3714_v19 = vpop.eup %3713  ;;  %v6495_v28 = vld [vmem:[#allocation58_spill] sm:$0xff] }
 0x4de   :  { %v2156_v36 = vadd.f32 0.5, %v2153_v25  ;;  %v2154_v21 = vmul.f32 0.5, %v3714_v19  ;;  %v6496_v25 = vld [vmem:[#allocation59_spill] sm:$0xff] }
 0x4df   :  { %v2160_v20 = vmul.f32 %v3712_v23, %v2155_v2  ;;  %v6497_v23 = vld [vmem:[#allocation60_spill] sm:$0xff] }
 0x4e0   :  { %v2159_v17 = vmul.f32 %v2156_v36, %v4975_v4  ;;  %v2157_v27 = vadd.f32 0.5, %v2154_v21  ;;  %v6492_v4 = vld [vmem:[#allocation55_spill] sm:$0xff]  ;;  %v6498_v36 = vld [vmem:[#allocation61_spill] sm:$0xff] }
 0x4e2   :  { %v5257_v29 = vadd.f32 %v2160_v20, %v2159_v17  ;;  %v6499_v20 = vld [vmem:[#allocation62_spill] sm:$0xff] }
 0x4e4   :  { %3715 = vtanh.f32 %v5257_v29 }
 0x4eb   :  { %v1997_v51 = vpop.f32.mrb[56].mxu0  ;;  %v2038_v16 = vpop.f32.mrb[56].mxu1 }
 0x4ec   :  { %v1999_v54 = vpop.f32.mrb[57].mxu0  ;;  %v2040_v59 = vpop.f32.mrb[57].mxu1 }
 0x4ed   :  { %v2001_v30 = vpop.f32.mrb[58].mxu0  ;;  %v2042_v18 = vpop.f32.mrb[58].mxu1 }
 0x4ee   :  { %v2002_v6 = vpop.f32.mrb[59].mxu0  ;;  %v2043_v10 = vpop.f32.mrb[59].mxu1 }
 0x4ef   :  { %v3716_v49 = vpop.eup %3715 }
 0x4f0   :  { %v2163_v15 = vmul.f32 %v3716_v49, %v2157_v27 }
 0x4f2   :  { %v2182_v2 = vpack.c.bf16 %v2163_v15, %v2163_v15 }
 0x4f4   :  { %2217 = vmatmul.mubr.bf16.vlgmr.msra.gmra.mrb[64].mxu0 %v2182_v2  ;;  %2258 = vmatmul.mubr.bf16.vlgmr.msra.gmra.mrb[64].mxu1 %v2182_v2 }
 0x4f5   :  { %2267 = vmatpush1.bf16.msra.mxu0 %v4200_v41  ;;  %2308 = vmatpush1.bf16.msra.mxu1 %v4204_v42 }
 0x4f6   :  { %2268 = vmatprep.subr.bf16.mxu0 %v4252_v31  ;;  %2309 = vmatprep.subr.bf16.mxu1 %v4254_v44 }
 0x4f7   :  { %2298 = vmatprep.mubr.bf16.mxu0 %v6240_v63  ;;  %2339 = vmatprep.mubr.bf16.mxu1 %v6240_v63 }
 0x4f9   :  { %2269 = vmatpush1.bf16.msra.mxu0 %v4272_v50  ;;  %2310 = vmatpush1.bf16.msra.mxu1 %v4274_v9 }
 0x4fa   :  { %2270 = vmatprep.subr.bf16.mxu0 %v4278_v11  ;;  %2311 = vmatprep.subr.bf16.mxu1 %v6285_v8 }
 0x4fd   :  { %2271 = vmatpush1.bf16.msra.mxu0 %v6360_v14  ;;  %2312 = vmatpush1.bf16.msra.mxu1 %v6361_v56 }
 0x4fe   :  { %2272 = vmatprep.subr.bf16.mxu0 %v6362_v45  ;;  %2313 = vmatprep.subr.bf16.mxu1 %v6363_v48 }
 0x501   :  { %2273 = vmatpush1.bf16.msra.mxu0 %v6364_v47  ;;  %2314 = vmatpush1.bf16.msra.mxu1 %v6365_v57 }
 0x502   :  { %2274 = vmatprep.subr.bf16.mxu0 %v6430_v37  ;;  %2315 = vmatprep.subr.bf16.mxu1 %v6431_v1 }
 0x505   :  { %2275 = vmatpush1.bf16.msra.mxu0 %v6432_v22  ;;  %2316 = vmatpush1.bf16.msra.mxu1 %v6433_v43 }
 0x506   :  { %2276 = vmatprep.subr.bf16.mxu0 %v6434_v0  ;;  %2317 = vmatprep.subr.bf16.mxu1 %v6435_v38 }
 0x509   :  { %2277 = vmatpush1.bf16.msra.mxu0 %v6492_v4  ;;  %2318 = vmatpush1.bf16.msra.mxu1 %v6493_v12 }
 0x50a   :  { %2278 = vmatprep.subr.bf16.mxu0 %v6494_v3  ;;  %2319 = vmatprep.subr.bf16.mxu1 %v6495_v28 }
 0x50d   :  { %2279 = vmatpush1.bf16.msra.mxu0 %v6496_v25  ;;  %2320 = vmatpush1.bf16.msra.mxu1 %v6497_v23 }
 0x50e   :  { %2280 = vmatprep.subr.bf16.mxu0 %v6498_v36  ;;  %2321 = vmatprep.subr.bf16.mxu1 %v6499_v20  ;;  %v2079_v17 = vpop.f32.mrb[60].mxu0  ;;  %v2120_v19 = vpop.f32.mrb[60].mxu1 }
 0x50f   :  { %v2138_v21 = vadd.f32 %v2079_v17, %v1997_v51  ;;  %v2140_v30 = vadd.f32 %v2120_v19, %v2038_v16  ;;  %v2081_v18 = vpop.f32.mrb[61].mxu0  ;;  %v2122_v27 = vpop.f32.mrb[61].mxu1  ;;  %v6505_v17 = vld [vmem:[#allocation87_spill] sm:$0xff] }
 0x510   :  { %v2139_v6 = vadd.f32 %v2081_v18, %v1999_v54  ;;  %v2141_v10 = vadd.f32 %v2122_v27, %v2040_v59  ;;  %v2083_v49 = vpop.f32.mrb[62].mxu0  ;;  %v2124_v15 = vpop.f32.mrb[62].mxu1  ;;  %v6501_v54 = vld [vmem:[#allocation65_spill] sm:$0xff]  ;;  %v6507_v18 = vld [vmem:[#allocation90_spill] sm:$0xff] }
 0x511   :  { %2281 = vmatpush1.bf16.msra.mxu0 %v6309_v24  ;;  %2322 = vmatpush1.bf16.msra.mxu1 %v6310_v53  ;;  %v2142_v20 = vadd.f32 %v2138_v21, %v4745_v5  ;;  %v2084_v24 = vpop.f32.mrb[63].mxu0  ;;  %v2125_v53 = vpop.f32.mrb[63].mxu1  ;;  %v2144_v59 = vadd.f32 %v2140_v30, %v6501_v54  ;;  %v6506_v21 = vld [vmem:[#allocation89_spill] sm:$0xff] }
 0x512   :  { %2348 = vmatprep.subr.bf16.mxu0 %v5014_v35  ;;  %2389 = vmatprep.subr.bf16.mxu1 %v5020_v52  ;;  %v2143_v36 = vadd.f32 %v2139_v6, %v4751_v13  ;;  %v2145_v24 = vadd.f32 %v2141_v10, %v6376_v62  ;;  %v6500_v53 = vld [vmem:[#allocation79_spill] sm:$0xff] }
 0x513   :  { %v2164_v51 = vmul.f32 0.5, %v2142_v20  ;;  %v6504_v20 = vld [vmem:[#allocation82_spill] sm:$0xff]  ;;  %v2166_v19 = vmul.f32 0.5, %v2144_v59  ;;  %v6508_v6 = vld [vmem:[#allocation91_spill] sm:$0xff]  ;;  %v6509_v59 = vld [vmem:[#allocation96_spill] sm:$0xff] }
 0x514   :  { %2299 = vmatmul.mubr.bf16.vlgmr.msra.gmra.mrb[68].mxu0 %v2182_v2  ;;  %2340 = vmatmul.mubr.bf16.vlgmr.msra.gmra.mrb[68].mxu1 %v2182_v2  ;;  %v2165_v16 = vmul.f32 0.5, %v2143_v36  ;;  %v6502_v2 = vld [vmem:[#allocation80_spill] sm:$0xff]  ;;  %v6503_v36 = vld [vmem:[#allocation81_spill] sm:$0xff] }
 0x515   :  { %2349 = vmatpush1.bf16.msra.mxu0 %v5027_v55  ;;  %2390 = vmatpush1.bf16.msra.mxu1 %v5033_v7  ;;  %3717 = vtanh.f32 %v2164_v51 }
 0x516   :  { %2350 = vmatprep.subr.bf16.mxu0 %v5040_v40  ;;  %2391 = vmatprep.subr.bf16.mxu1 %v5046_v60  ;;  %3719 = vtanh.f32 %v2165_v16 }
 0x517   :  { %2380 = vmatprep.mubr.bf16.mxu0 %v6240_v63  ;;  %2421 = vmatprep.mubr.bf16.mxu1 %v6240_v63  ;;  %3721 = vtanh.f32 %v2145_v24 }
 0x518   :  { %3723 = vtanh.f32 %v2166_v19  ;;  %v6513_v19 = vld [vmem:[#allocation45_spill] sm:$0xff] }
 0x519   :  { %2351 = vmatpush1.bf16.msra.mxu0 %v5054_v34  ;;  %2392 = vmatpush1.bf16.msra.mxu1 %v5060_v46 }
 0x51a   :  { %2352 = vmatprep.subr.bf16.mxu0 %v5066_v33  ;;  %2393 = vmatprep.subr.bf16.mxu1 %v6500_v53 }
 0x51d   :  { %2353 = vmatpush1.bf16.msra.mxu0 %v6502_v2  ;;  %2394 = vmatpush1.bf16.msra.mxu1 %v6503_v36 }
 0x51e   :  { %2354 = vmatprep.subr.bf16.mxu0 %v6504_v20  ;;  %2395 = vmatprep.subr.bf16.mxu1 %v6505_v17 }
 0x51f   :  { %v3718_v27 = vpop.eup %3717 }
 0x520   :  { %v2170_v10 = vmul.f32 0.5, %v3718_v27  ;;  %v3720_v30 = vpop.eup %3719  ;;  %v6511_v27 = vld [vmem:[#allocation43_spill] sm:$0xff] }
 0x521   :  { %2355 = vmatpush1.bf16.msra.mxu0 %v6506_v21  ;;  %2396 = vmatpush1.bf16.msra.mxu1 %v6507_v18  ;;  %v2171_v15 = vmul.f32 0.5, %v3720_v30  ;;  %v3722_v51 = vpop.eup %3721  ;;  %v6510_v18 = vld [vmem:[#allocation98_spill] sm:$0xff] }
 0x522   :  { %2356 = vmatprep.subr.bf16.mxu0 %v6508_v6  ;;  %2397 = vmatprep.subr.bf16.mxu1 %v5121_v39  ;;  %v2173_v49 = vadd.f32 0.5, %v2170_v10  ;;  %v6512_v10 = vld [vmem:[#allocation44_spill] sm:$0xff] }
 0x523   :  { %v2174_v16 = vadd.f32 0.5, %v2171_v15  ;;  %v6517_v15 = vld [vmem:[#allocation48_spill] sm:$0xff] }
 0x524   :  { %v2178_v24 = vmul.f32 %v3722_v51, %v2173_v49  ;;  %v6518_v49 = vld [vmem:[#allocation67_spill] sm:$0xff]  ;;  %v3724_v51 = vpop.eup %3723 }
 0x525   :  { %2357 = vmatpush1.bf16.msra.mxu0 %v5127_v61  ;;  %2398 = vmatpush1.bf16.msra.mxu1 %v5133_v58  ;;  %v2177_v6 = vmul.f32 %v2174_v16, %v6509_v59  ;;  %v6515_v58 = vld [vmem:[#allocation46_spill] sm:$0xff]  ;;  %v6519_v16 = vld [vmem:[#allocation68_spill] sm:$0xff]  ;;  %v6520_v59 = vld [vmem:[#allocation69_spill] sm:$0xff] }
 0x526   :  { %2358 = vmatprep.subr.bf16.mxu0 %v5139_v32  ;;  %2399 = vmatprep.subr.bf16.mxu1 %v5145_v26  ;;  %v6516_v32 = vld [vmem:[#allocation47_spill] sm:$0xff]  ;;  %v6562_v61 = vld [vmem:[#allocation110_spill] sm:$0xff] }
 0x527   :  { %v5325_v30 = vadd.f32 %v2178_v24, %v2177_v6  ;;  %v6522_v6 = vld [vmem:[#allocation4_spill] sm:$0xff] }
 0x529   :  { %2359 = vmatpush1.bf16.msra.mxu0 %v6510_v18  ;;  %2400 = vmatpush1.bf16.msra.mxu1 %v6511_v27  ;;  %6514 = vst [vmem:[#allocation70_spill] sm:$0xff] %v5325_v30  ;;  %3725 = vtanh.f32 %v5325_v30  ;;  %v6521_v27 = vld [vmem:[#allocation3_spill] sm:$0xff] }
 0x52a   :  { %2360 = vmatprep.subr.bf16.mxu0 %v6512_v10  ;;  %2401 = vmatprep.subr.bf16.mxu1 %v6513_v19  ;;  %v2172_v10 = vmul.f32 0.5, %v3724_v51  ;;  %v6527_v51 = vld [vmem:[#allocation9_spill] sm:$0xff]  ;;  %v6559_v18 = vld [vmem:[#allocation39_spill] sm:$0xff] }
 0x52c   :  { %v2175_v24 = vadd.f32 0.5, %v2172_v10  ;;  %v6528_v10 = vld [vmem:[#allocation10_spill] sm:$0xff] }
 0x52d   :  { %2361 = vmatpush1.bf16.msra.mxu0 %v6515_v58  ;;  %2402 = vmatpush1.bf16.msra.mxu1 %v6516_v32  ;;  %v6523_v32 = vld [vmem:[#allocation5_spill] sm:$0xff] }
 0x52e   :  { %2362 = vmatprep.subr.bf16.mxu0 %v6517_v15  ;;  %2403 = vmatprep.subr.bf16.mxu1 %v6518_v49  ;;  %v6524_v15 = vld [vmem:[#allocation6_spill] sm:$0xff]  ;;  %v6525_v49 = vld [vmem:[#allocation7_spill] sm:$0xff] }
 0x531   :  { %2363 = vmatpush1.bf16.msra.mxu0 %v6519_v16  ;;  %2404 = vmatpush1.bf16.msra.mxu1 %v6520_v59  ;;  %v6526_v16 = vld [vmem:[#allocation8_spill] sm:$0xff]  ;;  %v6558_v59 = vld [vmem:[#allocation109_spill] sm:$0xff] }
 0x532   :  { %2487 = vmatprep.subr.bf16.mxu0 %v6521_v27  ;;  %2528 = vmatprep.subr.bf16.mxu1 %v6522_v6  ;;  %v6537_v6 = vld [vmem:[#allocation19_spill] sm:$0xff] }
 0x533   :  { %v3726_v30 = vpop.eup %3725 }
 0x534   :  { %v2181_v19 = vmul.f32 %v3726_v30, %v2175_v24  ;;  %v6529_v30 = vld [vmem:[#allocation11_spill] sm:$0xff]  ;;  %v6532_v24 = vld [vmem:[#allocation14_spill] sm:$0xff] }
 0x536   :  { %v2183_v58 = vpack.c.bf16 %v2181_v19, %v2181_v19  ;;  %v6530_v19 = vld [vmem:[#allocation12_spill] sm:$0xff] }
 0x538   :  { %2381 = vmatmul.mubr.bf16.vlgmr.msra.gmra.mrb[72].mxu0 %v2183_v58  ;;  %2422 = vmatmul.mubr.bf16.vlgmr.msra.gmra.mrb[72].mxu1 %v2183_v58  ;;  %v6531_v58 = vld [vmem:[#allocation13_spill] sm:$0xff] }
 0x539   :  { %2488 = vmatpush1.bf16.msra.mxu0 %v6523_v32  ;;  %2529 = vmatpush1.bf16.msra.mxu1 %v6524_v15  ;;  %v6533_v15 = vld [vmem:[#allocation15_spill] sm:$0xff]  ;;  %v6536_v32 = vld [vmem:[#allocation18_spill] sm:$0xff] }
 0x53a   :  { %2489 = vmatprep.subr.bf16.mxu0 %v6525_v49  ;;  %2530 = vmatprep.subr.bf16.mxu1 %v6526_v16  ;;  %v6534_v49 = vld [vmem:[#allocation16_spill] sm:$0xff]  ;;  %v6535_v16 = vld [vmem:[#allocation17_spill] sm:$0xff] }
 0x53b   :  { %2519 = vmatprep.mubr.bf16.mxu0 %v6240_v63  ;;  %2560 = vmatprep.mubr.bf16.mxu1 %v6240_v63 }
 0x53d   :  { %2490 = vmatpush1.bf16.msra.mxu0 %v6527_v51  ;;  %2531 = vmatpush1.bf16.msra.mxu1 %v6528_v10  ;;  %v6538_v51 = vld [vmem:[#allocation20_spill] sm:$0xff]  ;;  %v6539_v10 = vld [vmem:[#allocation21_spill] sm:$0xff] }
 0x53e   :  { %2491 = vmatprep.subr.bf16.mxu0 %v6529_v30  ;;  %2532 = vmatprep.subr.bf16.mxu1 %v6530_v19  ;;  %v6540_v30 = vld [vmem:[#allocation22_spill] sm:$0xff]  ;;  %v6541_v19 = vld [vmem:[#allocation23_spill] sm:$0xff] }
 0x541   :  { %2492 = vmatpush1.bf16.msra.mxu0 %v6531_v58  ;;  %2533 = vmatpush1.bf16.msra.mxu1 %v6532_v24  ;;  %v6542_v58 = vld [vmem:[#allocation25_spill] sm:$0xff]  ;;  %v6543_v24 = vld [vmem:[#allocation24_spill] sm:$0xff] }
 0x542   :  { %2493 = vmatprep.subr.bf16.mxu0 %v6533_v15  ;;  %2534 = vmatprep.subr.bf16.mxu1 %v6534_v49  ;;  %v6544_v15 = vld [vmem:[#allocation26_spill] sm:$0xff]  ;;  %v6545_v49 = vld [vmem:[#allocation27_spill] sm:$0xff] }
 0x545   :  { %2494 = vmatpush1.bf16.msra.mxu0 %v6535_v16  ;;  %2535 = vmatpush1.bf16.msra.mxu1 %v6536_v32  ;;  %v6546_v16 = vld [vmem:[#allocation28_spill] sm:$0xff]  ;;  %v6547_v32 = vld [vmem:[#allocation29_spill] sm:$0xff] }
 0x546   :  { %2495 = vmatprep.subr.bf16.mxu0 %v6537_v6  ;;  %2536 = vmatprep.subr.bf16.mxu1 %v6538_v51  ;;  %v6548_v6 = vld [vmem:[#allocation30_spill] sm:$0xff]  ;;  %v6549_v51 = vld [vmem:[#allocation31_spill] sm:$0xff] }
 0x549   :  { %2496 = vmatpush1.bf16.msra.mxu0 %v6539_v10  ;;  %2537 = vmatpush1.bf16.msra.mxu1 %v6540_v30  ;;  %v6550_v10 = vld [vmem:[#allocation32_spill] sm:$0xff]  ;;  %v6551_v30 = vld [vmem:[#allocation33_spill] sm:$0xff] }
 0x54a   :  { %2497 = vmatprep.subr.bf16.mxu0 %v6541_v19  ;;  %2538 = vmatprep.subr.bf16.mxu1 %v6542_v58  ;;  %v6552_v19 = vld [vmem:[#allocation34_spill] sm:$0xff]  ;;  %v6553_v58 = vld [vmem:[#allocation35_spill] sm:$0xff] }
 0x54d   :  { %2498 = vmatpush1.bf16.msra.mxu0 %v6543_v24  ;;  %2539 = vmatpush1.bf16.msra.mxu1 %v6544_v15  ;;  %v6554_v24 = vld [vmem:[#allocation36_spill] sm:$0xff]  ;;  %v6555_v15 = vld [vmem:[#allocation38_spill] sm:$0xff] }
 0x54e   :  { %2499 = vmatprep.subr.bf16.mxu0 %v6545_v49  ;;  %2540 = vmatprep.subr.bf16.mxu1 %v6546_v16  ;;  %v6556_v49 = vld [vmem:[#allocation107_spill] sm:$0xff]  ;;  %v6557_v16 = vld [vmem:[#allocation41_spill] sm:$0xff] }
 0x54f   :  { %v190_v27 = vadd.f32 %v6556_v49, %v6555_v15 }
 0x551   :  { %2500 = vmatpush1.bf16.msra.mxu0 %v6547_v32  ;;  %2541 = vmatpush1.bf16.msra.mxu1 %v6548_v6  ;;  %v303_v32 = vadd.f32 %v6558_v59, %v6557_v16  ;;  %v6560_v6 = vld [vmem:[#allocation108_spill] sm:$0xff] }
 0x552   :  { %2501 = vmatprep.subr.bf16.mxu0 %v6549_v51  ;;  %2542 = vmatprep.subr.bf16.mxu1 %v6550_v10  ;;  %v192_v26 = vadd.f32 %v6560_v6, %v6559_v18  ;;  %v6561_v51 = vld [vmem:[#allocation40_spill] sm:$0xff] }
 0x553   :  { %v305_v10 = vadd.f32 %v6562_v61, %v6561_v51 }
 0x555   :  { %2502 = vmatpush1.bf16.msra.mxu0 %v6551_v30  ;;  %2543 = vmatpush1.bf16.msra.mxu1 %v6552_v19 }
 0x556   :  { %2569 = vmatprep.subr.bf16.mxu0 %v6553_v58  ;;  %2610 = vmatprep.subr.bf16.mxu1 %v6554_v24 }
 0x5c7   :  { %v2218_v39 = vpop.f32.mrb[64].mxu0  ;;  %v2259_v30 = vpop.f32.mrb[64].mxu1 }
 0x5c8   :  { %v2437_v21 = vadd.f32 %v2218_v39, %v190_v27  ;;  %v2439_v19 = vadd.f32 %v2259_v30, %v303_v32  ;;  %v2220_v54 = vpop.f32.mrb[65].mxu0  ;;  %v2261_v58 = vpop.f32.mrb[65].mxu1 }
 0x5c9   :  { %v2438_v17 = vadd.f32 %v2220_v54, %v192_v26  ;;  %v2440_v24 = vadd.f32 %v2261_v58, %v305_v10  ;;  %v2222_v20 = vpop.f32.mrb[66].mxu0  ;;  %v2263_v36 = vpop.f32.mrb[66].mxu1 }
 0x5ca   :  { %v2449_v49 = vmul.f32 0.5, %v2437_v21  ;;  %v2223_v15 = vpop.f32.mrb[67].mxu0  ;;  %v2264_v2 = vpop.f32.mrb[67].mxu1  ;;  %v2451_v6 = vmul.f32 0.5, %v2439_v19 }
 0x5cb   :  { %v2450_v59 = vmul.f32 0.5, %v2438_v17 }
 0x5cc   :  { %3727 = vtanh.f32 %v2449_v49 }
 0x5cd   :  { %3729 = vtanh.f32 %v2450_v59  ;;  %v6564_v59 = vld [vmem:[#allocation62_spill] sm:$0xff] }
 0x5ce   :  { %3731 = vtanh.f32 %v2440_v24 }
 0x5cf   :  { %3733 = vtanh.f32 %v2451_v6  ;;  %v6565_v6 = vld [vmem:[#allocation63_spill] sm:$0xff] }
 0x5d6   :  { %v3728_v18 = vpop.eup %3727 }
 0x5d7   :  { %v2455_v61 = vmul.f32 0.5, %v3728_v18  ;;  %v3730_v51 = vpop.eup %3729 }
 0x5d8   :  { %v2456_v39 = vmul.f32 0.5, %v3730_v51  ;;  %v3732_v32 = vpop.eup %3731 }
 0x5d9   :  { %v2458_v16 = vadd.f32 0.5, %v2455_v61  ;;  %v3734_v2 = vpop.eup %3733  ;;  %v6566_v61 = vld [vmem:[#allocation64_spill] sm:$0xff] }
 0x5da   :  { %v2459_v27 = vadd.f32 0.5, %v2456_v39  ;;  %v2457_v20 = vmul.f32 0.5, %v3734_v2 }
 0x5db   :  { %v2463_v26 = vmul.f32 %v3732_v32, %v2458_v16 }
 0x5dc   :  { %v2462_v54 = vmul.f32 %v2459_v27, %v5257_v29  ;;  %v2460_v19 = vadd.f32 0.5, %v2457_v20  ;;  %v6563_v29 = vld [vmem:[#allocation61_spill] sm:$0xff] }
 0x5de   :  { %v5379_v36 = vadd.f32 %v2463_v26, %v2462_v54 }
 0x5e0   :  { %3735 = vtanh.f32 %v5379_v36 }
 0x5e7   :  { %v2300_v17 = vpop.f32.mrb[68].mxu0  ;;  %v2341_v21 = vpop.f32.mrb[68].mxu1 }
 0x5e8   :  { %v2302_v15 = vpop.f32.mrb[69].mxu0  ;;  %v2343_v10 = vpop.f32.mrb[69].mxu1 }
 0x5e9   :  { %v2304_v18 = vpop.f32.mrb[70].mxu0  ;;  %v2345_v30 = vpop.f32.mrb[70].mxu1 }
 0x5ea   :  { %v2305_v58 = vpop.f32.mrb[71].mxu0  ;;  %v2346_v51 = vpop.f32.mrb[71].mxu1 }
 0x5eb   :  { %v3736_v24 = vpop.eup %3735 }
 0x5ec   :  { %v2466_v49 = vmul.f32 %v3736_v24, %v2460_v19  ;;  %v6573_v24 = vld [vmem:[#allocation90_spill] sm:$0xff] }
 0x5ee   :  { %v2485_v16 = vpack.c.bf16 %v2466_v49, %v2466_v49  ;;  %v6574_v49 = vld [vmem:[#allocation91_spill] sm:$0xff] }
 0x5f0   :  { %2520 = vmatmul.mubr.bf16.vlgmr.msra.gmra.mrb[76].mxu0 %v2485_v16  ;;  %2561 = vmatmul.mubr.bf16.vlgmr.msra.gmra.mrb[76].mxu1 %v2485_v16 }
 0x5f1   :  { %2570 = vmatpush1.bf16.msra.mxu0 %v4200_v41  ;;  %2611 = vmatpush1.bf16.msra.mxu1 %v4204_v42 }
 0x5f2   :  { %2571 = vmatprep.subr.bf16.mxu0 %v4252_v31  ;;  %2612 = vmatprep.subr.bf16.mxu1 %v4254_v44 }
 0x5f3   :  { %2601 = vmatprep.mubr.bf16.mxu0 %v6240_v63  ;;  %2642 = vmatprep.mubr.bf16.mxu1 %v6240_v63 }
 0x5f5   :  { %2572 = vmatpush1.bf16.msra.mxu0 %v4272_v50  ;;  %2613 = vmatpush1.bf16.msra.mxu1 %v4274_v9 }
 0x5f6   :  { %2573 = vmatprep.subr.bf16.mxu0 %v4278_v11  ;;  %2614 = vmatprep.subr.bf16.mxu1 %v6285_v8 }
 0x5f9   :  { %2574 = vmatpush1.bf16.msra.mxu0 %v6360_v14  ;;  %2615 = vmatpush1.bf16.msra.mxu1 %v6361_v56 }
 0x5fa   :  { %2575 = vmatprep.subr.bf16.mxu0 %v6362_v45  ;;  %2616 = vmatprep.subr.bf16.mxu1 %v6363_v48 }
 0x5fd   :  { %2576 = vmatpush1.bf16.msra.mxu0 %v6364_v47  ;;  %2617 = vmatpush1.bf16.msra.mxu1 %v6365_v57 }
 0x5fe   :  { %2577 = vmatprep.subr.bf16.mxu0 %v6430_v37  ;;  %2618 = vmatprep.subr.bf16.mxu1 %v6431_v1 }
 0x601   :  { %2578 = vmatpush1.bf16.msra.mxu0 %v6432_v22  ;;  %2619 = vmatpush1.bf16.msra.mxu1 %v6433_v43 }
 0x602   :  { %2579 = vmatprep.subr.bf16.mxu0 %v6434_v0  ;;  %2620 = vmatprep.subr.bf16.mxu1 %v6435_v38 }
 0x605   :  { %2580 = vmatpush1.bf16.msra.mxu0 %v6492_v4  ;;  %2621 = vmatpush1.bf16.msra.mxu1 %v6493_v12 }
 0x606   :  { %2581 = vmatprep.subr.bf16.mxu0 %v6494_v3  ;;  %2622 = vmatprep.subr.bf16.mxu1 %v6495_v28 }
 0x609   :  { %2582 = vmatpush1.bf16.msra.mxu0 %v6496_v25  ;;  %2623 = vmatpush1.bf16.msra.mxu1 %v6497_v23 }
 0x60a   :  { %2583 = vmatprep.subr.bf16.mxu0 %v6563_v29  ;;  %2624 = vmatprep.subr.bf16.mxu1 %v6564_v59 }
 0x60b   :  { %v2382_v39 = vpop.f32.mrb[72].mxu0  ;;  %v2423_v32 = vpop.f32.mrb[72].mxu1 }
 0x60c   :  { %v2441_v27 = vadd.f32 %v2382_v39, %v2300_v17  ;;  %v2443_v26 = vadd.f32 %v2423_v32, %v2341_v21  ;;  %v2384_v54 = vpop.f32.mrb[73].mxu0  ;;  %v2425_v2 = vpop.f32.mrb[73].mxu1  ;;  %v6576_v32 = vld [vmem:[#allocation93_spill] sm:$0xff] }
 0x60d   :  { %2584 = vmatpush1.bf16.msra.mxu0 %v6565_v6  ;;  %2625 = vmatpush1.bf16.msra.mxu1 %v6566_v61  ;;  %v2442_v20 = vadd.f32 %v2384_v54, %v2302_v15  ;;  %v2444_v18 = vadd.f32 %v2425_v2, %v2343_v10  ;;  %v2386_v30 = vpop.f32.mrb[74].mxu0  ;;  %v2427_v19 = vpop.f32.mrb[74].mxu1  ;;  %v6570_v10 = vld [vmem:[#allocation87_spill] sm:$0xff] }
 0x60e   :  { %2651 = vmatprep.subr.bf16.mxu0 %v5014_v35  ;;  %2692 = vmatprep.subr.bf16.mxu1 %v5020_v52  ;;  %v2445_v35 = vadd.f32 %v2441_v27, %v4745_v5  ;;  %v2387_v58 = vpop.f32.mrb[75].mxu0  ;;  %v2428_v52 = vpop.f32.mrb[75].mxu1  ;;  %v6577_v27 = vld [vmem:[#allocation94_spill] sm:$0xff]  ;;  %v6578_v2 = vld [vmem:[#allocation95_spill] sm:$0xff] }
 0x60f   :  { %v2446_v17 = vadd.f32 %v2442_v20, %v4751_v13  ;;  %v6579_v20 = vld [vmem:[#allocation97_spill] sm:$0xff]  ;;  %v6580_v58 = vld [vmem:[#allocation98_spill] sm:$0xff]  ;;  %v6581_v52 = vld [vmem:[#allocation43_spill] sm:$0xff] }
 0x610   :  { %2602 = vmatmul.mubr.bf16.vlgmr.msra.gmra.mrb[80].mxu0 %v2485_v16  ;;  %2643 = vmatmul.mubr.bf16.vlgmr.msra.gmra.mrb[80].mxu1 %v2485_v16  ;;  %v2467_v21 = vmul.f32 0.5, %v2445_v35 }
 0x611   :  { %2652 = vmatpush1.bf16.msra.mxu0 %v5027_v55  ;;  %2693 = vmatpush1.bf16.msra.mxu1 %v5033_v7  ;;  %v2468_v15 = vmul.f32 0.5, %v2446_v17  ;;  %v2448_v55 = vadd.f32 %v2444_v18, %v6376_v62  ;;  %v6567_v7 = vld [vmem:[#allocation80_spill] sm:$0xff] }
 0x612   :  { %2653 = vmatprep.subr.bf16.mxu0 %v5040_v40  ;;  %2694 = vmatprep.subr.bf16.mxu1 %v5046_v60  ;;  %3737 = vtanh.f32 %v2467_v21  ;;  %v6568_v40 = vld [vmem:[#allocation81_spill] sm:$0xff]  ;;  %v6569_v60 = vld [vmem:[#allocation82_spill] sm:$0xff]  ;;  %v6582_v17 = vld [vmem:[#allocation44_spill] sm:$0xff] }
 0x613   :  { %2683 = vmatprep.mubr.bf16.mxu0 %v6240_v63  ;;  %2724 = vmatprep.mubr.bf16.mxu1 %v6240_v63  ;;  %3739 = vtanh.f32 %v2468_v15  ;;  %v6583_v21 = vld [vmem:[#allocation45_spill] sm:$0xff]  ;;  %v6584_v15 = vld [vmem:[#allocation70_spill] sm:$0xff] }
 0x614   :  { %3741 = vtanh.f32 %v2448_v55 }
 0x615   :  { %2654 = vmatpush1.bf16.msra.mxu0 %v5054_v34  ;;  %2695 = vmatpush1.bf16.msra.mxu1 %v5060_v46  ;;  %v6571_v34 = vld [vmem:[#allocation65_spill] sm:$0xff] }
 0x616   :  { %2655 = vmatprep.subr.bf16.mxu0 %v5066_v33  ;;  %2696 = vmatprep.subr.bf16.mxu1 %v6500_v53  ;;  %v2447_v51 = vadd.f32 %v2443_v26, %v6571_v34  ;;  %v6572_v46 = vld [vmem:[#allocation89_spill] sm:$0xff]  ;;  %v6575_v33 = vld [vmem:[#allocation92_spill] sm:$0xff] }
 0x618   :  { %v2469_v53 = vmul.f32 0.5, %v2447_v51  ;;  %v6588_v51 = vld [vmem:[#allocation67_spill] sm:$0xff] }
 0x619   :  { %2656 = vmatpush1.bf16.msra.mxu0 %v6567_v7  ;;  %2697 = vmatpush1.bf16.msra.mxu1 %v6568_v40  ;;  %v6585_v40 = vld [vmem:[#allocation46_spill] sm:$0xff] }
 0x61a   :  { %2657 = vmatprep.subr.bf16.mxu0 %v6569_v60  ;;  %2698 = vmatprep.subr.bf16.mxu1 %v6570_v10  ;;  %3743 = vtanh.f32 %v2469_v53  ;;  %v6586_v60 = vld [vmem:[#allocation47_spill] sm:$0xff]  ;;  %v6587_v10 = vld [vmem:[#allocation48_spill] sm:$0xff] }
 0x61b   :  { %v6592_v53 = vld [vmem:[#allocation4_spill] sm:$0xff] }
 0x61c   :  { %v3738_v16 = vpop.eup %3737 }
 0x61d   :  { %2658 = vmatpush1.bf16.msra.mxu0 %v6572_v46  ;;  %2699 = vmatpush1.bf16.msra.mxu1 %v6573_v24  ;;  %v2473_v39 = vmul.f32 0.5, %v3738_v16  ;;  %v3740_v54 = vpop.eup %3739  ;;  %v6589_v24 = vld [vmem:[#allocation68_spill] sm:$0xff] }
 0x61e   :  { %2659 = vmatprep.subr.bf16.mxu0 %v6574_v49  ;;  %2700 = vmatprep.subr.bf16.mxu1 %v6575_v33  ;;  %v2474_v18 = vmul.f32 0.5, %v3740_v54  ;;  %v3742_v30 = vpop.eup %3741  ;;  %v6590_v49 = vld [vmem:[#allocation69_spill] sm:$0xff]  ;;  %v6591_v33 = vld [vmem:[#allocation3_spill] sm:$0xff] }
 0x61f   :  { %v2476_v26 = vadd.f32 0.5, %v2473_v39 }
 0x620   :  { %v2477_v19 = vadd.f32 0.5, %v2474_v18  ;;  %v6596_v18 = vld [vmem:[#allocation8_spill] sm:$0xff] }
 0x621   :  { %2660 = vmatpush1.bf16.msra.mxu0 %v6576_v32  ;;  %2701 = vmatpush1.bf16.msra.mxu1 %v6577_v27  ;;  %v2481_v35 = vmul.f32 %v3742_v30, %v2476_v26  ;;  %v6595_v26 = vld [vmem:[#allocation7_spill] sm:$0xff]  ;;  %v6597_v30 = vld [vmem:[#allocation9_spill] sm:$0xff] }
 0x622   :  { %2661 = vmatprep.subr.bf16.mxu0 %v6578_v2  ;;  %2702 = vmatprep.subr.bf16.mxu1 %v6579_v20  ;;  %v2480_v55 = vmul.f32 %v2477_v19, %v6584_v15  ;;  %v6593_v2 = vld [vmem:[#allocation5_spill] sm:$0xff]  ;;  %v6594_v20 = vld [vmem:[#allocation6_spill] sm:$0xff]  ;;  %v6604_v15 = vld [vmem:[#allocation16_spill] sm:$0xff] }
 0x623   :  { %v6598_v19 = vld [vmem:[#allocation10_spill] sm:$0xff] }
 0x624   :  { %v5447_v7 = vadd.f32 %v2481_v35, %v2480_v55  ;;  %v3744_v46 = vpop.eup %3743  ;;  %v6599_v35 = vld [vmem:[#allocation11_spill] sm:$0xff]  ;;  %v6605_v55 = vld [vmem:[#allocation17_spill] sm:$0xff] }
 0x625   :  { %2662 = vmatpush1.bf16.msra.mxu0 %v6580_v58  ;;  %2703 = vmatpush1.bf16.msra.mxu1 %v6581_v52  ;;  %v2475_v16 = vmul.f32 0.5, %v3744_v46  ;;  %v6600_v58 = vld [vmem:[#allocation12_spill] sm:$0xff]  ;;  %v6601_v52 = vld [vmem:[#allocation13_spill] sm:$0xff]  ;;  %v6610_v46 = vld [vmem:[#allocation22_spill] sm:$0xff] }
 0x626   :  { %2663 = vmatprep.subr.bf16.mxu0 %v6582_v17  ;;  %2704 = vmatprep.subr.bf16.mxu1 %v6583_v21  ;;  %3745 = vtanh.f32 %v5447_v7  ;;  %v6602_v17 = vld [vmem:[#allocation14_spill] sm:$0xff]  ;;  %v6603_v21 = vld [vmem:[#allocation15_spill] sm:$0xff] }
 0x627   :  { %v2478_v39 = vadd.f32 0.5, %v2475_v16  ;;  %v6615_v16 = vld [vmem:[#allocation27_spill] sm:$0xff] }
 0x629   :  { %2664 = vmatpush1.bf16.msra.mxu0 %v6585_v40  ;;  %2705 = vmatpush1.bf16.msra.mxu1 %v6586_v60  ;;  %v6606_v40 = vld [vmem:[#allocation18_spill] sm:$0xff]  ;;  %v6607_v60 = vld [vmem:[#allocation19_spill] sm:$0xff] }
 0x62a   :  { %2665 = vmatprep.subr.bf16.mxu0 %v6587_v10  ;;  %2706 = vmatprep.subr.bf16.mxu1 %v6588_v51  ;;  %v6608_v10 = vld [vmem:[#allocation20_spill] sm:$0xff]  ;;  %v6609_v51 = vld [vmem:[#allocation21_spill] sm:$0xff] }
 0x62d   :  { %2666 = vmatpush1.bf16.msra.mxu0 %v6589_v24  ;;  %2707 = vmatpush1.bf16.msra.mxu1 %v6590_v49  ;;  %v6611_v24 = vld [vmem:[#allocation23_spill] sm:$0xff]  ;;  %v6612_v49 = vld [vmem:[#allocation25_spill] sm:$0xff] }
 0x62e   :  { %2790 = vmatprep.subr.bf16.mxu0 %v6591_v33  ;;  %2831 = vmatprep.subr.bf16.mxu1 %v6592_v53  ;;  %v6613_v33 = vld [vmem:[#allocation24_spill] sm:$0xff]  ;;  %v6614_v53 = vld [vmem:[#allocation26_spill] sm:$0xff] }
 0x630   :  { %v3746_v32 = vpop.eup %3745 }
 0x631   :  { %v2484_v27 = vmul.f32 %v3746_v32, %v2478_v39  ;;  %v6616_v39 = vld [vmem:[#allocation28_spill] sm:$0xff]  ;;  %v6617_v32 = vld [vmem:[#allocation29_spill] sm:$0xff] }
 0x633   :  { %v2486_v54 = vpack.c.bf16 %v2484_v27, %v2484_v27  ;;  %v6618_v27 = vld [vmem:[#allocation30_spill] sm:$0xff] }
 0x635   :  { %2684 = vmatmul.mubr.bf16.vlgmr.msra.gmra.mrb[84].mxu0 %v2486_v54  ;;  %2725 = vmatmul.mubr.bf16.vlgmr.msra.gmra.mrb[84].mxu1 %v2486_v54  ;;  %v6619_v54 = vld [vmem:[#allocation31_spill] sm:$0xff] }
 0x636   :  { %2791 = vmatpush1.bf16.msra.mxu0 %v6593_v2  ;;  %2832 = vmatpush1.bf16.msra.mxu1 %v6594_v20  ;;  %v6620_v2 = vld [vmem:[#allocation32_spill] sm:$0xff]  ;;  %v6621_v20 = vld [vmem:[#allocation33_spill] sm:$0xff] }
 0x637   :  { %2792 = vmatprep.subr.bf16.mxu0 %v6595_v26  ;;  %2833 = vmatprep.subr.bf16.mxu1 %v6596_v18  ;;  %v6622_v26 = vld [vmem:[#allocation34_spill] sm:$0xff]  ;;  %v6623_v18 = vld [vmem:[#allocation35_spill] sm:$0xff] }
 0x638   :  { %2822 = vmatprep.mubr.bf16.mxu0 %v6240_v63  ;;  %2863 = vmatprep.mubr.bf16.mxu1 %v6240_v63 }
 0x63a   :  { %2793 = vmatpush1.bf16.msra.mxu0 %v6597_v30  ;;  %2834 = vmatpush1.bf16.msra.mxu1 %v6598_v19  ;;  %v6624_v30 = vld [vmem:[#allocation36_spill] sm:$0xff]  ;;  %v6625_v19 = vld [vmem:[#allocation38_spill] sm:$0xff] }
 0x63b   :  { %2794 = vmatprep.subr.bf16.mxu0 %v6599_v35  ;;  %2835 = vmatprep.subr.bf16.mxu1 %v6600_v58  ;;  %v6626_v35 = vld [vmem:[#allocation111_spill] sm:$0xff] }
 0x63c   :  { %v196_v58 = vadd.f32 %v6626_v35, %v6625_v19 }
 0x63e   :  { %2795 = vmatpush1.bf16.msra.mxu0 %v6601_v52  ;;  %2836 = vmatpush1.bf16.msra.mxu1 %v6602_v17  ;;  %v6627_v52 = vld [vmem:[#allocation41_spill] sm:$0xff] }
 0x63f   :  { %2796 = vmatprep.subr.bf16.mxu0 %v6603_v21  ;;  %2837 = vmatprep.subr.bf16.mxu1 %v6604_v15  ;;  %v6628_v17 = vld [vmem:[#allocation113_spill] sm:$0xff]  ;;  %v6629_v15 = vld [vmem:[#allocation39_spill] sm:$0xff] }
 0x640   :  { %v309_v21 = vadd.f32 %v6628_v17, %v6627_v52 }
 0x642   :  { %2797 = vmatpush1.bf16.msra.mxu0 %v6605_v55  ;;  %2838 = vmatpush1.bf16.msra.mxu1 %v6606_v40  ;;  %v6630_v55 = vld [vmem:[#allocation112_spill] sm:$0xff] }
 0x643   :  { %2798 = vmatprep.subr.bf16.mxu0 %v6607_v60  ;;  %2839 = vmatprep.subr.bf16.mxu1 %v6608_v10  ;;  %v198_v40 = vadd.f32 %v6630_v55, %v6629_v15  ;;  %v6631_v60 = vld [vmem:[#allocation40_spill] sm:$0xff]  ;;  %v6632_v10 = vld [vmem:[#allocation114_spill] sm:$0xff] }
 0x646   :  { %2799 = vmatpush1.bf16.msra.mxu0 %v6609_v51  ;;  %2840 = vmatpush1.bf16.msra.mxu1 %v6610_v46  ;;  %v311_v51 = vadd.f32 %v6632_v10, %v6631_v60 }
 0x647   :  { %2800 = vmatprep.subr.bf16.mxu0 %v6611_v24  ;;  %2841 = vmatprep.subr.bf16.mxu1 %v6612_v49 }
 0x64a   :  { %2801 = vmatpush1.bf16.msra.mxu0 %v6613_v33  ;;  %2842 = vmatpush1.bf16.msra.mxu1 %v6614_v53 }
 0x64b   :  { %2802 = vmatprep.subr.bf16.mxu0 %v6615_v16  ;;  %2843 = vmatprep.subr.bf16.mxu1 %v6616_v39 }
 0x64e   :  { %2803 = vmatpush1.bf16.msra.mxu0 %v6617_v32  ;;  %2844 = vmatpush1.bf16.msra.mxu1 %v6618_v27 }
 0x64f   :  { %2804 = vmatprep.subr.bf16.mxu0 %v6619_v54  ;;  %2845 = vmatprep.subr.bf16.mxu1 %v6620_v2 }
 0x652   :  { %2805 = vmatpush1.bf16.msra.mxu0 %v6621_v20  ;;  %2846 = vmatpush1.bf16.msra.mxu1 %v6622_v26 }
 0x653   :  { %2872 = vmatprep.subr.bf16.mxu0 %v6623_v18  ;;  %2913 = vmatprep.subr.bf16.mxu1 %v6624_v30 }
 0x6c3   :  { %v2521_v46 = vpop.f32.mrb[76].mxu0  ;;  %v2562_v24 = vpop.f32.mrb[76].mxu1 }
 0x6c4   :  { %v2740_v49 = vadd.f32 %v2521_v46, %v196_v58  ;;  %v2742_v33 = vadd.f32 %v2562_v24, %v309_v21  ;;  %v2523_v53 = vpop.f32.mrb[77].mxu0  ;;  %v2564_v16 = vpop.f32.mrb[77].mxu1 }
 0x6c5   :  { %v2741_v39 = vadd.f32 %v2523_v53, %v198_v40  ;;  %v2743_v32 = vadd.f32 %v2564_v16, %v311_v51  ;;  %v2525_v27 = vpop.f32.mrb[78].mxu0  ;;  %v2566_v54 = vpop.f32.mrb[78].mxu1 }
 0x6c6   :  { %v2752_v2 = vmul.f32 0.5, %v2740_v49  ;;  %v2526_v20 = vpop.f32.mrb[79].mxu0  ;;  %v2567_v26 = vpop.f32.mrb[79].mxu1  ;;  %v2754_v17 = vmul.f32 0.5, %v2742_v33 }
 0x6c7   :  { %v2753_v35 = vmul.f32 0.5, %v2741_v39 }
 0x6c8   :  { %3747 = vtanh.f32 %v2752_v2 }
 0x6c9   :  { %3749 = vtanh.f32 %v2753_v35  ;;  %v5543_v35 = vld [vmem:[%s5892_s4 + $0x4] ss:$16 sps:$4 sm:$0xff]  }
 0x6ca   :  { %3751 = vtanh.f32 %v2743_v32 }
 0x6cb   :  { %3753 = vtanh.f32 %v2754_v17  ;;  %v5549_v17 = vld [vmem:[%s5892_s4 + $0xc] ss:$16 sps:$4 sm:$0xff]  }
 0x6d2   :  { %v3748_v55 = vpop.eup %3747 }
 0x6d3   :  { %v2758_v10 = vmul.f32 0.5, %v3748_v55  ;;  %v3750_v60 = vpop.eup %3749 }
 0x6d4   :  { %v2759_v58 = vmul.f32 0.5, %v3750_v60  ;;  %v3752_v21 = vpop.eup %3751 }
 0x6d5   :  { %v2761_v15 = vadd.f32 0.5, %v2758_v10  ;;  %v3754_v49 = vpop.eup %3753 }
 0x6d6   :  { %v2762_v46 = vadd.f32 0.5, %v2759_v58  ;;  %v2760_v53 = vmul.f32 0.5, %v3754_v49  ;;  %v5555_v58 = vld [vmem:[%s5892_s4] ss:$16 sps:$4 sm:$0xff]  }
 0x6d7   :  { %v2766_v40 = vmul.f32 %v3752_v21, %v2761_v15  ;;  %v5561_v21 = vld [vmem:[%s5892_s4 + $0x8] ss:$16 sps:$4 sm:$0xff]  }
 0x6d8   :  { %v2765_v51 = vmul.f32 %v2762_v46, %v5379_v36  ;;  %v2763_v60 = vadd.f32 0.5, %v2760_v53  ;;  %v5567_v53 = vld [vmem:[%s5892_s4 + $0x24] ss:$16 sps:$4 sm:$0xff]  }
 0x6da   :  { %v5501_v24 = vadd.f32 %v2766_v40, %v2765_v51 }
 0x6dc   :  { %3755 = vtanh.f32 %v5501_v24 }
 0x6e3   :  { %v2603_v16 = vpop.f32.mrb[80].mxu0  ;;  %v2644_v39 = vpop.f32.mrb[80].mxu1 }
 0x6e4   :  { %v5504_v33 = vpop.f32.mrb[81].mxu0  ;;  %v5506_v32 = vpop.f32.mrb[81].mxu1 }
 0x6e5   :  { %v2607_v27 = vpop.f32.mrb[82].mxu0  ;;  %v2648_v54 = vpop.f32.mrb[82].mxu1 }
 0x6e6   :  { %v2608_v2 = vpop.f32.mrb[83].mxu0  ;;  %v2649_v20 = vpop.f32.mrb[83].mxu1  ;;  %v5573_v27 = vld [vmem:[%s5892_s4 + $0x2c] ss:$16 sps:$4 sm:$0xff]  }
 0x6e7   :  { %v3756_v15 = vpop.eup %3755 }
 0x6e8   :  { %v2769_v26 = vmul.f32 %v3756_v15, %v2763_v60 }
 0x6ea   :  { %v2788_v36 = vpack.c.bf16 %v2769_v26, %v2769_v26 }
 0x6ec   :  { %2823 = vmatmul.mubr.bf16.vlgmr.msra.gmra.mrb[88].mxu0 %v2788_v36  ;;  %2864 = vmatmul.mubr.bf16.vlgmr.msra.gmra.mrb[88].mxu1 %v2788_v36 }
 0x6ed   :  { %2873 = vmatpush1.bf16.msra.mxu0 %v4200_v41  ;;  %2914 = vmatpush1.bf16.msra.mxu1 %v4204_v42 }
 0x6ee   :  { %2874 = vmatprep.subr.bf16.mxu0 %v4252_v31  ;;  %2915 = vmatprep.subr.bf16.mxu1 %v4254_v44 }
 0x6ef   :  { %2904 = vmatprep.mubr.bf16.mxu0 %v6240_v63  ;;  %2945 = vmatprep.mubr.bf16.mxu1 %v6240_v63 }
 0x6f1   :  { %2875 = vmatpush1.bf16.msra.mxu0 %v4272_v50  ;;  %2916 = vmatpush1.bf16.msra.mxu1 %v4274_v9 }
 0x6f2   :  { %2876 = vmatprep.subr.bf16.mxu0 %v4278_v11  ;;  %2917 = vmatprep.subr.bf16.mxu1 %v6285_v8 }
 0x6f5   :  { %2877 = vmatpush1.bf16.msra.mxu0 %v6360_v14  ;;  %2918 = vmatpush1.bf16.msra.mxu1 %v6361_v56 }
 0x6f6   :  { %2878 = vmatprep.subr.bf16.mxu0 %v6362_v45  ;;  %2919 = vmatprep.subr.bf16.mxu1 %v6363_v48 }
 0x6f9   :  { %2879 = vmatpush1.bf16.msra.mxu0 %v6364_v47  ;;  %2920 = vmatpush1.bf16.msra.mxu1 %v6365_v57 }
 0x6fa   :  { %2880 = vmatprep.subr.bf16.mxu0 %v6430_v37  ;;  %2921 = vmatprep.subr.bf16.mxu1 %v6431_v1 }
 0x6fd   :  { %2881 = vmatpush1.bf16.msra.mxu0 %v6432_v22  ;;  %2922 = vmatpush1.bf16.msra.mxu1 %v6433_v43 }
 0x6fe   :  { %2882 = vmatprep.subr.bf16.mxu0 %v6434_v0  ;;  %2923 = vmatprep.subr.bf16.mxu1 %v6435_v38 }
 0x701   :  { %2883 = vmatpush1.bf16.msra.mxu0 %v6492_v4  ;;  %2924 = vmatpush1.bf16.msra.mxu1 %v6493_v12 }
 0x702   :  { %2884 = vmatprep.subr.bf16.mxu0 %v6494_v3  ;;  %2925 = vmatprep.subr.bf16.mxu1 %v6495_v28 }
 0x705   :  { %2885 = vmatpush1.bf16.msra.mxu0 %v6496_v25  ;;  %2926 = vmatpush1.bf16.msra.mxu1 %v6497_v23 }
 0x706   :  { %2886 = vmatprep.subr.bf16.mxu0 %v6563_v29  ;;  %2927 = vmatprep.subr.bf16.mxu1 %v6564_v59 }
 0x708   :  { %v2685_v55 = vpop.f32.mrb[84].mxu0  ;;  %v2726_v10 = vpop.f32.mrb[84].mxu1 }
 0x709   :  { %2887 = vmatpush1.bf16.msra.mxu0 %v6565_v6  ;;  %2928 = vmatpush1.bf16.msra.mxu1 %v6566_v61  ;;  %v2744_v46 = vadd.f32 %v2685_v55, %v2603_v16  ;;  %v2746_v40 = vadd.f32 %v2726_v10, %v2644_v39  ;;  %v2687_v51 = vpop.f32.mrb[85].mxu0  ;;  %v2728_v49 = vpop.f32.mrb[85].mxu1  ;;  %v5597_v55 = vld [vmem:[%s5892_s4 + $0x44] ss:$16 sps:$4 sm:$0xff]   ;;  %v5603_v10 = vld [vmem:[%s5892_s4 + $0x4c] ss:$16 sps:$4 sm:$0xff]  }
 0x70a   :  { %2954 = vmatprep.subr.bf16.mxu0 %v5543_v35  ;;  %2995 = vmatprep.subr.bf16.mxu1 %v5549_v17  ;;  %v2745_v54 = vadd.f32 %v2687_v51, %v5504_v33  ;;  %v2747_v16 = vadd.f32 %v2728_v49, %v5506_v32  ;;  %v2689_v39 = vpop.f32.mrb[86].mxu0  ;;  %v2730_v60 = vpop.f32.mrb[86].mxu1  ;;  %v5591_v33 = vld [vmem:[%s5892_s4 + $0x28] ss:$16 sps:$4 sm:$0xff]   ;;  %v5610_v49 = vld [vmem:[%s5892_s4 + $0x40] ss:$16 sps:$4 sm:$0xff]  }
 0x70b   :  { %v2748_v2 = vadd.f32 %v2744_v46, %v4745_v5  ;;  %v2690_v20 = vpop.f32.mrb[87].mxu0  ;;  %v2731_v15 = vpop.f32.mrb[87].mxu1  ;;  %v5622_v39 = vld [vmem:[%s5892_s4 + $0x64] ss:$16 sps:$4 sm:$0xff]   ;;  %v2750_v60 = vadd.f32 %v2746_v40, %v6571_v34  ;;  %v5653_v40 = vld [vmem:[%s5892_s4 + $0x8c] ss:$16 sps:$4 sm:$0xff]  }
 0x70c   :  { %2905 = vmatmul.mubr.bf16.vlgmr.msra.gmra.mrb[92].mxu0 %v2788_v36  ;;  %2946 = vmatmul.mubr.bf16.vlgmr.msra.gmra.mrb[92].mxu1 %v2788_v36  ;;  %v2749_v26 = vadd.f32 %v2745_v54, %v4751_v13  ;;  %v5585_v36 = vld [vmem:[%s5892_s4 + $0x20] ss:$16 sps:$4 sm:$0xff]   ;;  %v2751_v51 = vadd.f32 %v2747_v16, %v6376_v62  ;;  %v5616_v54 = vld [vmem:[%s5892_s4 + $0x48] ss:$16 sps:$4 sm:$0xff]   ;;  %v5628_v16 = vld [vmem:[%s5892_s4 + $0x6c] ss:$16 sps:$4 sm:$0xff]  }
 0x70d   :  { %2955 = vmatpush1.bf16.msra.mxu0 %v5555_v58  ;;  %2996 = vmatpush1.bf16.msra.mxu1 %v5561_v21  ;;  %v2770_v32 = vmul.f32 0.5, %v2748_v2  ;;  %v5635_v2 = vld [vmem:[%s5892_s4 + $0x60] ss:$16 sps:$4 sm:$0xff]   ;;  %v5641_v20 = vld [vmem:[%s5892_s4 + $0x68] ss:$16 sps:$4 sm:$0xff]  }
 0x70e   :  { %2956 = vmatprep.subr.bf16.mxu0 %v5567_v53  ;;  %2997 = vmatprep.subr.bf16.mxu1 %v5573_v27  ;;  %v2771_v46 = vmul.f32 0.5, %v2749_v26  ;;  %v5647_v15 = vld [vmem:[%s5892_s4 + $0x84] ss:$16 sps:$4 sm:$0xff]   ;;  %v2772_v26 = vmul.f32 0.5, %v2750_v60  ;;  %v5677_v60 = vld [vmem:[%s5892_s4 + $0xac] ss:$16 sps:$4 sm:$0xff]  }
 0x70f   :  { %2986 = vmatprep.mubr.bf16.mxu0 %v6240_v63  ;;  %3027 = vmatprep.mubr.bf16.mxu1 %v6240_v63  ;;  %3757 = vtanh.f32 %v2770_v32  ;;  %v5659_v32 = vld [vmem:[%s5892_s4 + $0x80] ss:$16 sps:$4 sm:$0xff]   ;;  %v5671_v34 = vld [vmem:[%s5892_s4 + $0xa4] ss:$16 sps:$4 sm:$0xff]   ;;  %6636 = vst [vmem:[#allocation74_spill] sm:$0xff] %v5677_v60 }
 0x710   :  { %3759 = vtanh.f32 %v2771_v46  ;;  %6633 = vst [vmem:[#allocation71_spill] sm:$0xff] %v5659_v32  ;;  %v5665_v46 = vld [vmem:[%s5892_s4 + $0x88] ss:$16 sps:$4 sm:$0xff]   ;;  %6635 = vst [vmem:[#allocation73_spill] sm:$0xff] %v5671_v34 }
 0x711   :  { %2957 = vmatpush1.bf16.msra.mxu0 %v5585_v36  ;;  %2998 = vmatpush1.bf16.msra.mxu1 %v5591_v33  ;;  %3761 = vtanh.f32 %v2751_v51  ;;  %6634 = vst [vmem:[#allocation72_spill] sm:$0xff] %v5665_v46 }
 0x712   :  { %2958 = vmatprep.subr.bf16.mxu0 %v5597_v55  ;;  %2999 = vmatprep.subr.bf16.mxu1 %v5603_v10  ;;  %3763 = vtanh.f32 %v2772_v26 }
 0x715   :  { %2959 = vmatpush1.bf16.msra.mxu0 %v5610_v49  ;;  %3000 = vmatpush1.bf16.msra.mxu1 %v5616_v54 }
 0x716   :  { %2960 = vmatprep.subr.bf16.mxu0 %v5622_v39  ;;  %3001 = vmatprep.subr.bf16.mxu1 %v5628_v16 }
 0x719   :  { %2961 = vmatpush1.bf16.msra.mxu0 %v5635_v2  ;;  %3002 = vmatpush1.bf16.msra.mxu1 %v5641_v20  ;;  %v3758_v51 = vpop.eup %3757 }
 0x71a   :  { %2962 = vmatprep.subr.bf16.mxu0 %v5647_v15  ;;  %3003 = vmatprep.subr.bf16.mxu1 %v5653_v40  ;;  %v2776_v62 = vmul.f32 0.5, %v3758_v51  ;;  %v3760_v13 = vpop.eup %3759 }
 0x71c   :  { %v2779_v5 = vadd.f32 0.5, %v2776_v62  ;;  %v5695_v62 = vld [vmem:[%s5892_s4 + $0xc4] ss:$16 sps:$4 sm:$0xff]  }
 0x71d   :  { %2963 = vmatpush1.bf16.msra.mxu0 %v5659_v32  ;;  %3004 = vmatpush1.bf16.msra.mxu1 %v5665_v46  ;;  %v2777_v46 = vmul.f32 0.5, %v3760_v13  ;;  %v5683_v32 = vld [vmem:[%s5892_s4 + $0xa0] ss:$16 sps:$4 sm:$0xff]   ;;  %6639 = vst [vmem:[#allocation77_spill] sm:$0xff] %v5695_v62  ;;  %v5701_v13 = vld [vmem:[%s5892_s4 + $0xcc] ss:$16 sps:$4 sm:$0xff]  }
 0x71e   :  { %2964 = vmatprep.subr.bf16.mxu0 %v5671_v34  ;;  %3005 = vmatprep.subr.bf16.mxu1 %v5677_v60  ;;  %6637 = vst [vmem:[#allocation75_spill] sm:$0xff] %v5683_v32  ;;  %v5689_v34 = vld [vmem:[%s5892_s4 + $0xa8] ss:$16 sps:$4 sm:$0xff]   ;;  %v3762_v60 = vpop.eup %3761 }
 0x71f   :  { %6638 = vst [vmem:[#allocation76_spill] sm:$0xff] %v5689_v34  ;;  %v2780_v26 = vadd.f32 0.5, %v2777_v46  ;;  %v2784_v51 = vmul.f32 %v3762_v60, %v2779_v5  ;;  %v5720_v5 = vld [vmem:[%s5892_s4 + $0xe4] ss:$16 sps:$4 sm:$0xff]   ;;  %v5735_v60 = vld [vmem:[%s5892_s4 + $0xe0] ss:$16 sps:$4 sm:$0xff]  }
 0x720   :  { %6641 = vst [vmem:[#allocation66_spill] sm:$0xff] %v5720_v5 }
 0x721   :  { %2965 = vmatpush1.bf16.msra.mxu0 %v5683_v32  ;;  %3006 = vmatpush1.bf16.msra.mxu1 %v5689_v34  ;;  %v2783_v32 = vmul.f32 %v2780_v26, %v5447_v7  ;;  %v5708_v34 = vld [vmem:[%s5892_s4 + $0xc0] ss:$16 sps:$4 sm:$0xff]   ;;  %v5726_v7 = vld [vmem:[%s5892_s4 + $0xec] ss:$16 sps:$4 sm:$0xff]   ;;  %v5741_v26 = vld [vmem:[%s5892_s4 + $0xe8] ss:$16 sps:$4 sm:$0xff]  }
 0x722   :  { %2966 = vmatprep.subr.bf16.mxu0 %v5695_v62  ;;  %3007 = vmatprep.subr.bf16.mxu1 %v5701_v13  ;;  %v5714_v62 = vld [vmem:[%s5892_s4 + $0xc8] ss:$16 sps:$4 sm:$0xff]   ;;  %6642 = vst [vmem:[#allocation83_spill] sm:$0xff] %v5726_v7 }
 0x723   :  { %6640 = vst [vmem:[#allocation78_spill] sm:$0xff] %v5714_v62  ;;  %v5729_v46 = vadd.f32 %v2784_v51, %v2783_v32  ;;  %v3764_v32 = vpop.eup %3763 }
 0x724   :  { %v2778_v51 = vmul.f32 0.5, %v3764_v32 }
 0x725   :  { %2967 = vmatpush1.bf16.msra.mxu0 %v5708_v34  ;;  %3008 = vmatpush1.bf16.msra.mxu1 %v5714_v62  ;;  %6643 = vst [vmem:[#allocation84_spill] sm:$0xff] %v5729_v46  ;;  %3765 = vtanh.f32 %v5729_v46 }
 0x726   :  { %2968 = vmatprep.subr.bf16.mxu0 %v5720_v5  ;;  %3009 = vmatprep.subr.bf16.mxu1 %v5726_v7  ;;  %v2781_v46 = vadd.f32 0.5, %v2778_v51 }
 0x729   :  { %2969 = vmatpush1.bf16.msra.mxu0 %v5735_v60  ;;  %3010 = vmatpush1.bf16.msra.mxu1 %v5741_v26 }
 0x72a   :  { %3092 = vmatprep.subr.bf16.mxu0 %v6623_v18  ;;  %3133 = vmatprep.subr.bf16.mxu1 %v6624_v30 }
 0x72f   :  { %v3766_v7 = vpop.eup %3765 }
 0x730   :  { %v2787_v5 = vmul.f32 %v3766_v7, %v2781_v46 }
 0x732   :  { %v2789_v62 = vpack.c.bf16 %v2787_v5, %v2787_v5 }
 0x734   :  { %2987 = vmatmul.mubr.bf16.vlgmr.msra.gmra.mrb[96].mxu0 %v2789_v62  ;;  %3028 = vmatmul.mubr.bf16.vlgmr.msra.gmra.mrb[96].mxu1 %v2789_v62 }
 0x735   :  { %3093 = vmatpush1.bf16.msra.mxu0 %v4200_v41  ;;  %3134 = vmatpush1.bf16.msra.mxu1 %v4204_v42  ;;  %v6644_v41 = vld [vmem:[#allocation115_spill] sm:$0xff] }
 0x736   :  { %3094 = vmatprep.subr.bf16.mxu0 %v4252_v31  ;;  %3135 = vmatprep.subr.bf16.mxu1 %v4254_v44  ;;  %v202_v42 = vadd.f32 %v6644_v41, %v6625_v19  ;;  %v6645_v31 = vld [vmem:[#allocation117_spill] sm:$0xff] }
 0x737   :  { %3124 = vmatprep.mubr.bf16.mxu0 %v6240_v63  ;;  %3165 = vmatprep.mubr.bf16.mxu1 %v6240_v63  ;;  %v315_v44 = vadd.f32 %v6645_v31, %v6627_v52 }
 0x739   :  { %3095 = vmatpush1.bf16.msra.mxu0 %v4272_v50  ;;  %3136 = vmatpush1.bf16.msra.mxu1 %v4274_v9  ;;  %v6646_v50 = vld [vmem:[#allocation39_spill] sm:$0xff]  ;;  %v6647_v9 = vld [vmem:[#allocation116_spill] sm:$0xff] }
 0x73a   :  { %3096 = vmatprep.subr.bf16.mxu0 %v4278_v11  ;;  %3137 = vmatprep.subr.bf16.mxu1 %v6285_v8  ;;  %v204_v11 = vadd.f32 %v6647_v9, %v6646_v50  ;;  %v6648_v8 = vld [vmem:[#allocation40_spill] sm:$0xff] }
 0x73d   :  { %3097 = vmatpush1.bf16.msra.mxu0 %v6360_v14  ;;  %3138 = vmatpush1.bf16.msra.mxu1 %v6361_v56  ;;  %v6649_v14 = vld [vmem:[#allocation118_spill] sm:$0xff] }
 0x73e   :  { %3098 = vmatprep.subr.bf16.mxu0 %v6362_v45  ;;  %3139 = vmatprep.subr.bf16.mxu1 %v6363_v48  ;;  %v317_v56 = vadd.f32 %v6649_v14, %v6648_v8  ;;  %v6660_v8 = vld [vmem:[#allocation42_spill] sm:$0xff] }
 0x741   :  { %3099 = vmatpush1.bf16.msra.mxu0 %v6364_v47  ;;  %3140 = vmatpush1.bf16.msra.mxu1 %v6365_v57 }
 0x742   :  { %3100 = vmatprep.subr.bf16.mxu0 %v6430_v37  ;;  %3141 = vmatprep.subr.bf16.mxu1 %v6431_v1 }
 0x745   :  { %3101 = vmatpush1.bf16.msra.mxu0 %v6432_v22  ;;  %3142 = vmatpush1.bf16.msra.mxu1 %v6433_v43 }
 0x746   :  { %3102 = vmatprep.subr.bf16.mxu0 %v6434_v0  ;;  %3143 = vmatprep.subr.bf16.mxu1 %v6435_v38 }
 0x749   :  { %3103 = vmatpush1.bf16.msra.mxu0 %v6492_v4  ;;  %3144 = vmatpush1.bf16.msra.mxu1 %v6493_v12 }
 0x74a   :  { %3104 = vmatprep.subr.bf16.mxu0 %v6494_v3  ;;  %3145 = vmatprep.subr.bf16.mxu1 %v6495_v28 }
 0x74d   :  { %3105 = vmatpush1.bf16.msra.mxu0 %v6496_v25  ;;  %3146 = vmatpush1.bf16.msra.mxu1 %v6497_v23 }
 0x74e   :  { %3106 = vmatprep.subr.bf16.mxu0 %v6563_v29  ;;  %3147 = vmatprep.subr.bf16.mxu1 %v6564_v59 }
 0x751   :  { %3107 = vmatpush1.bf16.msra.mxu0 %v6565_v6  ;;  %3148 = vmatpush1.bf16.msra.mxu1 %v6566_v61 }
 0x752   :  { %3175 = vmatprep.subr.bf16.mxu0 %v5543_v35  ;;  %3216 = vmatprep.subr.bf16.mxu1 %v5549_v17 }
 0x7bf   :  { %v2824_v45 = vpop.f32.mrb[88].mxu0  ;;  %v2865_v48 = vpop.f32.mrb[88].mxu1 }
 0x7c0   :  { %v3043_v47 = vadd.f32 %v2824_v45, %v202_v42  ;;  %v3045_v57 = vadd.f32 %v2865_v48, %v315_v44  ;;  %v2826_v37 = vpop.f32.mrb[89].mxu0  ;;  %v2867_v1 = vpop.f32.mrb[89].mxu1  ;;  %v6661_v48 = vld [vmem:[#allocation37_spill] sm:$0xff] }
 0x7c1   :  { %v3044_v22 = vadd.f32 %v2826_v37, %v204_v11  ;;  %v3046_v43 = vadd.f32 %v2867_v1, %v317_v56  ;;  %v2828_v0 = vpop.f32.mrb[90].mxu0  ;;  %v2869_v38 = vpop.f32.mrb[90].mxu1  ;;  %v6663_v1 = vld [vmem:[#allocation65_spill] sm:$0xff] }
 0x7c2   :  { %v3055_v4 = vmul.f32 0.5, %v3043_v47  ;;  %v2829_v12 = vpop.f32.mrb[91].mxu0  ;;  %v2870_v3 = vpop.f32.mrb[91].mxu1  ;;  %v3057_v25 = vmul.f32 0.5, %v3045_v57 }
 0x7c3   :  { %v3056_v28 = vmul.f32 0.5, %v3044_v22 }
 0x7c4   :  { %3767 = vtanh.f32 %v3055_v4 }
 0x7c5   :  { %3769 = vtanh.f32 %v3056_v28 }
 0x7c6   :  { %3771 = vtanh.f32 %v3046_v43 }
 0x7c7   :  { %3773 = vtanh.f32 %v3057_v25 }
 0x7ce   :  { %v3768_v23 = vpop.eup %3767 }
 0x7cf   :  { %v3061_v29 = vmul.f32 0.5, %v3768_v23  ;;  %v3770_v59 = vpop.eup %3769 }
 0x7d0   :  { %v3062_v61 = vmul.f32 0.5, %v3770_v59  ;;  %v3772_v18 = vpop.eup %3771 }
 0x7d1   :  { %v3064_v6 = vadd.f32 0.5, %v3061_v29  ;;  %v3774_v17 = vpop.eup %3773  ;;  %v6664_v29 = vld [vmem:[#allocation84_spill] sm:$0xff] }
 0x7d2   :  { %v3065_v30 = vadd.f32 0.5, %v3062_v61  ;;  %v3063_v62 = vmul.f32 0.5, %v3774_v17  ;;  %v3283_v17 = vld [vmem:[%s5895_s6] sm:$0xff] }
 0x7d3   :  { %v3069_v19 = vmul.f32 %v3772_v18, %v3064_v6 }
 0x7d4   :  { %v3068_v52 = vmul.f32 %v3065_v30, %v5501_v24  ;;  %v3066_v42 = vadd.f32 0.5, %v3063_v62  ;;  %v6651_v24 = vld [vmem:[#allocation72_spill] sm:$0xff] }
 0x7d5   :  { %v3284_v62 = vld [vmem:[%s5895_s6 + $0x8] sm:$0xff] }
 0x7d6   :  { %v3070_v35 = vadd.f32 %v3069_v19, %v3068_v52 }
 0x7d8   :  { %3775 = vtanh.f32 %v3070_v35 }
 0x7df   :  { %v2906_v5 = vpop.f32.mrb[92].mxu0  ;;  %v2947_v7 = vpop.f32.mrb[92].mxu1 }
 0x7e0   :  { %v2908_v46 = vpop.f32.mrb[93].mxu0  ;;  %v2949_v32 = vpop.f32.mrb[93].mxu1 }
 0x7e1   :  { %v2910_v51 = vpop.f32.mrb[94].mxu0  ;;  %v2951_v41 = vpop.f32.mrb[94].mxu1 }
 0x7e2   :  { %v2911_v31 = vpop.f32.mrb[95].mxu0  ;;  %v2952_v44 = vpop.f32.mrb[95].mxu1  ;;  %v3287_v41 = vld [vmem:[%s5895_s6 + $0x20] sm:$0xff] }
 0x7e3   :  { %v3776_v50 = vpop.eup %3775  ;;  %v3289_v44 = vld [vmem:[%s5895_s6 + $0x30] sm:$0xff] }
 0x7e4   :  { %v3072_v9 = vmul.f32 %v3776_v50, %v3066_v42  ;;  %v3288_v42 = vld [vmem:[%s5895_s6 + $0x28] sm:$0xff]  ;;  %v3290_v50 = vld [vmem:[%s5895_s6 + $0x38] sm:$0xff] }
 0x7e5   :  { %v3568_v31 = vpack.c.bf16 %v3288_v42, %v3287_v41 }
 0x7e6   :  { %v3091_v11 = vpack.c.bf16 %v3072_v9, %v3072_v9  ;;  %v3571_v9 = vpack.c.bf16 %v3290_v50, %v3289_v44 }
 0x7e8   :  { %3125 = vmatmul.mubr.bf16.vlgmr.msra.gmra.mrb[100].mxu0 %v3091_v11  ;;  %3166 = vmatmul.mubr.bf16.vlgmr.msra.gmra.mrb[100].mxu1 %v3091_v11  ;;  %v3291_v11 = vld [vmem:[%s5895_s6 + $0x40] sm:$0xff] }
 0x7e9   :  { %3176 = vmatpush1.bf16.msra.mxu0 %v5555_v58  ;;  %3217 = vmatpush1.bf16.msra.mxu1 %v5561_v21  ;;  %v6652_v58 = vld [vmem:[#allocation73_spill] sm:$0xff]  ;;  %v6653_v21 = vld [vmem:[#allocation74_spill] sm:$0xff] }
 0x7ea   :  { %3177 = vmatprep.subr.bf16.mxu0 %v5567_v53  ;;  %3218 = vmatprep.subr.bf16.mxu1 %v5573_v27  ;;  %v6654_v53 = vld [vmem:[#allocation75_spill] sm:$0xff]  ;;  %v6655_v27 = vld [vmem:[#allocation76_spill] sm:$0xff] }
 0x7eb   :  { %3207 = vmatprep.mubr.bf16.mxu0 %v6240_v63  ;;  %3248 = vmatprep.mubr.bf16.mxu1 %v6240_v63  ;;  %v6650_v63 = vld [vmem:[#allocation71_spill] sm:$0xff] }
 0x7ed   :  { %3178 = vmatpush1.bf16.msra.mxu0 %v5585_v36  ;;  %3219 = vmatpush1.bf16.msra.mxu1 %v5591_v33  ;;  %v6656_v36 = vld [vmem:[#allocation77_spill] sm:$0xff]  ;;  %v6657_v33 = vld [vmem:[#allocation78_spill] sm:$0xff] }
 0x7ee   :  { %3179 = vmatprep.subr.bf16.mxu0 %v5597_v55  ;;  %3220 = vmatprep.subr.bf16.mxu1 %v5603_v10  ;;  %v6658_v55 = vld [vmem:[#allocation66_spill] sm:$0xff]  ;;  %v6659_v10 = vld [vmem:[#allocation83_spill] sm:$0xff] }
 0x7f1   :  { %3180 = vmatpush1.bf16.msra.mxu0 %v5610_v49  ;;  %3221 = vmatpush1.bf16.msra.mxu1 %v5616_v54 }
 0x7f2   :  { %3181 = vmatprep.subr.bf16.mxu0 %v5622_v39  ;;  %3222 = vmatprep.subr.bf16.mxu1 %v5628_v16 }
 0x7f5   :  { %3182 = vmatpush1.bf16.msra.mxu0 %v5635_v2  ;;  %3223 = vmatpush1.bf16.msra.mxu1 %v5641_v20 }
 0x7f6   :  { %3183 = vmatprep.subr.bf16.mxu0 %v5647_v15  ;;  %3224 = vmatprep.subr.bf16.mxu1 %v5653_v40 }
 0x7f9   :  { %3184 = vmatpush1.bf16.msra.mxu0 %v6650_v63  ;;  %3225 = vmatpush1.bf16.msra.mxu1 %v6651_v24  ;;  %v3292_v63 = vld [vmem:[%s5895_s6 + $0x48] sm:$0xff] }
 0x7fa   :  { %3185 = vmatprep.subr.bf16.mxu0 %v6652_v58  ;;  %3226 = vmatprep.subr.bf16.mxu1 %v6653_v21  ;;  %v3574_v24 = vpack.c.bf16 %v3292_v63, %v3291_v11  ;;  %v3293_v58 = vld [vmem:[%s5895_s6 + $0x50] sm:$0xff]  ;;  %v3294_v21 = vld [vmem:[%s5895_s6 + $0x58] sm:$0xff] }
 0x7fd   :  { %3186 = vmatpush1.bf16.msra.mxu0 %v6654_v53  ;;  %3227 = vmatpush1.bf16.msra.mxu1 %v6655_v27  ;;  %v3577_v53 = vpack.c.bf16 %v3294_v21, %v3293_v58  ;;  %v3295_v27 = vld [vmem:[%s5895_s6 + $0x60] sm:$0xff] }
 0x7fe   :  { %3187 = vmatprep.subr.bf16.mxu0 %v6656_v36  ;;  %3228 = vmatprep.subr.bf16.mxu1 %v5701_v13  ;;  %v3296_v36 = vld [vmem:[%s5895_s6 + $0x68] sm:$0xff] }
 0x801   :  { %3188 = vmatpush1.bf16.msra.mxu0 %v5708_v34  ;;  %3229 = vmatpush1.bf16.msra.mxu1 %v6657_v33  ;;  %v6665_v33 = vmov 0.0  }
 0x802   :  { %3189 = vmatprep.subr.bf16.mxu0 %v6658_v55  ;;  %3230 = vmatprep.subr.bf16.mxu1 %v6659_v10  ;;  %v3580_v55 = vpack.c.bf16 %v3296_v36, %v3295_v27  ;;  %v3297_v10 = vld [vmem:[%s5895_s6 + $0x70] sm:$0xff] }
 0x805   :  { %3190 = vmatpush1.bf16.msra.mxu0 %v5735_v60  ;;  %3231 = vmatpush1.bf16.msra.mxu1 %v5741_v26  ;;  %v6662_v26 = vld [vmem:[#allocation119_spill] sm:$0xff] }
 0x807   :  { %v2988_v49 = vpop.f32.mrb[96].mxu0  ;;  %v3029_v54 = vpop.f32.mrb[96].mxu1 }
 0x808   :  { %v3047_v39 = vadd.f32 %v2988_v49, %v2906_v5  ;;  %v3049_v16 = vadd.f32 %v3029_v54, %v2947_v7  ;;  %v2990_v2 = vpop.f32.mrb[97].mxu0  ;;  %v3031_v20 = vpop.f32.mrb[97].mxu1  ;;  %v3562_v5 = vpack.c.bf16 %v3284_v62, %v3283_v17  ;;  %v3863_v7 = vmov 0.0|0.0   ;;  %v3298_v49 = vld [vmem:[%s5895_s6 + $0x78] sm:$0xff] }
 0x809   :  { %v3048_v15 = vadd.f32 %v2990_v2, %v2908_v46  ;;  %v3050_v40 = vadd.f32 %v3031_v20, %v2949_v32  ;;  %v2992_v13 = vpop.f32.mrb[98].mxu0  ;;  %v3033_v34 = vpop.f32.mrb[98].mxu1  ;;  %3561 = vmatprep.subr.bf16.mxu0 %v3863_v7  ;;  %v3285_v46 = vld [vmem:[%s5895_s6 + $0x10] sm:$0xff]  ;;  %v3286_v32 = vld [vmem:[%s5895_s6 + $0x18] sm:$0xff]  ;;  %v3583_v54 = vpack.c.bf16 %v3298_v49, %v3297_v10 }
 0x80a   :  { %v3051_v14 = vadd.f32 %v3047_v39, %v6660_v8  ;;  %v2993_v56 = vpop.f32.mrb[99].mxu0  ;;  %v3034_v45 = vpop.f32.mrb[99].mxu1  ;;  %v3053_v22 = vadd.f32 %v3049_v16, %v6663_v1  ;;  %v3565_v51 = vpack.c.bf16 %v3286_v32, %v3285_v46 }
 0x80b   :  { %v3052_v47 = vadd.f32 %v3048_v15, %v6661_v48  ;;  %v3054_v37 = vadd.f32 %v3050_v40, %v6662_v26 }
 0x80c   :  { %v3073_v57 = vmul.f32 0.5, %v3051_v14  ;;  %v3075_v43 = vmul.f32 0.5, %v3053_v22 }
 0x80d   :  { %v3074_v60 = vmul.f32 0.5, %v3052_v47 }
 0x80e   :  { %3777 = vtanh.f32 %v3073_v57 }
 0x80f   :  { %3779 = vtanh.f32 %v3074_v60 }
 0x810   :  { %3781 = vtanh.f32 %v3054_v37 }
 0x811   :  { %3783 = vtanh.f32 %v3075_v43 }
 0x818   :  { %v3778_v0 = vpop.eup %3777 }
 0x819   :  { %v3079_v38 = vmul.f32 0.5, %v3778_v0  ;;  %v3780_v4 = vpop.eup %3779 }
 0x81a   :  { %v3080_v3 = vmul.f32 0.5, %v3780_v4  ;;  %v3782_v28 = vpop.eup %3781 }
 0x81b   :  { %v3082_v12 = vadd.f32 0.5, %v3079_v38  ;;  %v3784_v61 = vpop.eup %3783 }
 0x81c   :  { %v3083_v25 = vadd.f32 0.5, %v3080_v3  ;;  %v3081_v18 = vmul.f32 0.5, %v3784_v61 }
 0x81d   :  { %v3087_v23 = vmul.f32 %v3782_v28, %v3082_v12 }
 0x81e   :  { %v3086_v59 = vmul.f32 %v3083_v25, %v6664_v29  ;;  %v3084_v30 = vadd.f32 0.5, %v3081_v18 }
 0x820   :  { %v5826_v6 = vadd.f32 %v3087_v23, %v3086_v59 }
 0x822   :  { %3785 = vtanh.f32 %v5826_v6 }
 0x82c   :  { %v3786_v19 = vpop.eup %3785 }
 0x82d   :  { %v3090_v52 = vmul.f32 %v3786_v19, %v3084_v30 }
 0x82f   :  { %v3174_v35 = vpack.c.bf16 %v3090_v52, %v3090_v52 }
 0x831   :  { %3208 = vmatmul.mubr.bf16.vlgmr.msra.gmra.mrb[104].mxu0 %v3174_v35  ;;  %3249 = vmatmul.mubr.bf16.vlgmr.msra.gmra.mrb[104].mxu1 %v3174_v35 }
 0x832   :  { %3563 = vmatpush3.bf16.msra.mxu0 %v3562_v5  ;;  %3550 = vmatprep.mubr.msk.f32.mxu0 %vm3864_vm1, %v6665_v33 }
 0x833   :  { %3564 = vmatprep.subr.bf16.mxu0 %v3863_v7 }
 0x836   :  { %3566 = vmatpush3.bf16.msra.mxu0 %v3565_v51 }
 0x837   :  { %3567 = vmatprep.subr.bf16.mxu0 %v3863_v7 }
 0x83a   :  { %3569 = vmatpush3.bf16.msra.mxu0 %v3568_v31 }
 0x83b   :  { %3570 = vmatprep.subr.bf16.mxu0 %v3863_v7 }
 0x83e   :  { %3572 = vmatpush3.bf16.msra.mxu0 %v3571_v9 }
 0x83f   :  { %3573 = vmatprep.subr.bf16.mxu0 %v3863_v7 }
 0x842   :  { %3575 = vmatpush3.bf16.msra.mxu0 %v3574_v24 }
 0x843   :  { %3576 = vmatprep.subr.bf16.mxu0 %v3863_v7 }
 0x846   :  { %3578 = vmatpush3.bf16.msra.mxu0 %v3577_v53 }
 0x847   :  { %3579 = vmatprep.subr.bf16.mxu0 %v3863_v7 }
 0x84a   :  { %3581 = vmatpush3.bf16.msra.mxu0 %v3580_v55 }
 0x84b   :  { %3582 = vmatprep.subr.bf16.mxu0 %v3863_v7 }
 0x84e   :  { %3584 = vmatpush3.bf16.msra.mxu0 %v3583_v54 }
 0x8bb   :  { %v3126_v39 = vpop.f32.mrb[100].mxu0  ;;  %v3167_v16 = vpop.f32.mrb[100].mxu1 }
 0x8bc   :  { %v3128_v2 = vpop.f32.mrb[101].mxu0  ;;  %v3169_v20 = vpop.f32.mrb[101].mxu1 }
 0x8bd   :  { %v3130_v15 = vpop.f32.mrb[102].mxu0  ;;  %v3171_v40 = vpop.f32.mrb[102].mxu1 }
 0x8be   :  { %v3131_v13 = vpop.f32.mrb[103].mxu0  ;;  %v3172_v34 = vpop.f32.mrb[103].mxu1 }
 0x904   :  { %v3209_v14 = vpop.f32.mrb[104].mxu0  ;;  %v3250_v56 = vpop.f32.mrb[104].mxu1 }
 0x905   :  { %v3257_v45 = vadd.f32 %v3209_v14, %v3126_v39  ;;  %v3259_v47 = vadd.f32 %v3250_v56, %v3167_v16  ;;  %v3211_v57 = vpop.f32.mrb[105].mxu0  ;;  %v3252_v60 = vpop.f32.mrb[105].mxu1 }
 0x906   :  { %v3258_v37 = vadd.f32 %v3211_v57, %v3128_v2  ;;  %v3260_v22 = vadd.f32 %v3252_v60, %v3169_v20  ;;  %v3213_v43 = vpop.f32.mrb[106].mxu0  ;;  %v3254_v0 = vpop.f32.mrb[106].mxu1 }
 0x907   :  { %v3261_v38 = vadd.f32 %v3257_v45, %v6660_v8  ;;  %v3214_v4 = vpop.f32.mrb[107].mxu0  ;;  %v3255_v12 = vpop.f32.mrb[107].mxu1  ;;  %v3263_v29 = vadd.f32 %v3259_v47, %v6663_v1  ;;  %v3500_v1 = vld [vmem:[%s5896_s7] ss:$0 sm:$0xff] }
 0x908   :  { %v3262_v3 = vadd.f32 %v3258_v37, %v6661_v48  ;;  %v3264_v23 = vadd.f32 %v3260_v22, %v6662_v26 }
 0x909   :  { %v3265_v28 = vmul.f32 0.5, %v3261_v38  ;;  %v3267_v59 = vmul.f32 0.5, %v3263_v29 }
 0x90a   :  { %v3266_v25 = vmul.f32 0.5, %v3262_v3 }
 0x90b   :  { %3787 = vtanh.f32 %v3265_v28 }
 0x90c   :  { %3789 = vtanh.f32 %v3266_v25 }
 0x90d   :  { %3791 = vtanh.f32 %v3264_v23 }
 0x90e   :  { %3793 = vtanh.f32 %v3267_v59 }
 0x915   :  { %v3788_v61 = vpop.eup %3787 }
 0x916   :  { %v3271_v18 = vmul.f32 0.5, %v3788_v61  ;;  %v3790_v30 = vpop.eup %3789 }
 0x917   :  { %v3272_v8 = vmul.f32 0.5, %v3790_v30  ;;  %v3792_v52 = vpop.eup %3791 }
 0x918   :  { %v3274_v19 = vadd.f32 0.5, %v3271_v18  ;;  %v3794_v5 = vpop.eup %3793 }
 0x919   :  { %v3275_v35 = vadd.f32 0.5, %v3272_v8  ;;  %v3273_v26 = vmul.f32 0.5, %v3794_v5 }
 0x91a   :  { %v3279_v17 = vmul.f32 %v3792_v52, %v3274_v19 }
 0x91b   :  { %v3278_v48 = vmul.f32 %v3275_v35, %v5826_v6  ;;  %v3276_v7 = vadd.f32 0.5, %v3273_v26 }
 0x91d   :  { %v3280_v62 = vadd.f32 %v3279_v17, %v3278_v48 }
 0x91f   :  { %3795 = vtanh.f32 %v3280_v62 }
 0x929   :  { %v3796_v46 = vpop.eup %3795 }
 0x92a   :  { %v3282_v32 = vmul.f32 %v3796_v46, %v3276_v7 }
 0x92c   :  { %3551 = vmatmul.mubr.f32.vlgmr.msra.gmra.mrb[108].mxu0 %v3282_v32 }
 0x9ff   :  { %v3372_v51 = vpop.f32.mrb[108].mxu0 }
 0xa00   :  { %v3373_v41 = vadd.f32 %v3500_v1, %v3372_v51  ;;  %v3552_v42 = vpop.f32.mrb[109].mxu0 }
 0xa02   :  { %3376 = vst [vmem:[%s5897_s8] sm:$0xff] %v3373_v41 }

</bundles_post_ra>
